<compile_context>
chip_gen: v7x
topology: tpu7x:2x2x1
jax: 0.10.0
libtpu: 0.0.40
codegen_flags: <defaults>
</compile_context>

<pallas_src>
import functools
from typing import List

import jax
import jax.numpy as jnp
from jax import lax
from jax.experimental import pallas as pl
from jax.experimental.pallas import tpu as pltpu


def _take(elements, indexes):
    return list([elements[i] for i in indexes])


def _round_up(x, m):
    return (x + m - 1) // m * m


def _vmem_limit_default():
    # v5e/v6e: 128 MiB physical VMEM -> ~96 MiB scoped; v7x: 64 MiB -> 48 MiB.
    try:
        cap = pltpu.get_tpu_info().vmem_capacity_bytes
    except Exception:
        cap = 64 * 1024 * 1024          # conservative (v7x-safe) fallback
    return int(min(cap * 3 // 4, 96 * 1024 * 1024))


# ---------------------------------------------------------------------------
# Pallas kernel: K-concatenated 3x3 conv taps + bias + Mish for one row tile.
# ---------------------------------------------------------------------------
def _conv_mish_kernel(x_ref, w_ref, b_ref, o_ref, *, row_offsets, tile_h, owp, k, tn):
    # x_ref : (1, 1, RB, OWP, K)   bf16   gathered taps (K = 3*Cin or 9*Cin)
    # w_ref : (n_dots, K, TN)      bf16
    # b_ref : (1, TN)              f32
    # o_ref : (1, TH, OWP, TN)     bf16
    rows = tile_h * owp
    acc = b_ref[...]                                      # bias folded into init
    for d, r0 in enumerate(row_offsets):
        tap = x_ref[0, 0, r0:r0 + tile_h, :, :]           # (TH, OWP, K), contiguous
        acc = acc + jnp.dot(tap.reshape(rows, k), w_ref[d],
                            preferred_element_type=jnp.float32)
    # Mish(x) = x * tanh(softplus(x)) = x * t*(t+2) / (t*(t+2) + 2), t = e^x
    # (cancellation-free for negative x; factor == 1 to f32 precision at x >= 20).
    t = jnp.exp(jnp.minimum(acc, 20.0))
    num = t * (t + 2.0)
    y = acc * num * pl.reciprocal(num + 2.0, approx=True)
    o_ref[0] = y.reshape(tile_h, owp, tn).astype(o_ref.dtype)


# ---------------------------------------------------------------------------
# One conv3x3(pad=1, stride) + bias + Mish layer.
# ---------------------------------------------------------------------------
def conv3x3_mish(x, h, w_true, weight, bias, stride, *, lane=128,
                 vmem_limit_bytes=None, max_pixels_per_step=16384):
    """x: (N, HA, WA, C) NHWC (only [:, :h, :w_true, :] is valid; C >= true cin,
    extra channels hit zero weight rows).  weight: (3,3,cin_true,cout) f32,
    bias: (cout,) f32.  Returns (y, oh, ow): y is (N, OHP, OWP, CP) bf16 with
    the valid region [:, :oh, :ow, :cout]."""
    n, _, _, c = x.shape
    cin_true, cout = int(weight.shape[2]), int(weight.shape[3])
    assert cin_true <= c
    s = int(stride)
    oh = (h - 1) // s + 1
    ow = (w_true - 1) // s + 1
    owp = _round_up(ow, 16)              # bf16 sublane tile = 16 -> relayout-free reshapes
    cp = _round_up(cout, lane)
    tn = cp if cp <= 256 else (256 if cp % 256 == 0 else 128)
    nj = cp // tn
    if vmem_limit_bytes is None:
        vmem_limit_bytes = _vmem_limit_default()

    small_cin = (9 * c <= 2 * lane)      # tiny-cin (first) layer -> full im2col, 1 dot

    if small_cin:
        k_eff = 9 * c
        k = _round_up(k_eff, lane)
        n_dots, in_rows_per_out, halo_rows = 1, 1, 0
    else:
        k = 3 * c
        e = max(0, -(-(3 - s) // s))     # ceil((3-s)/s): halo rows per stride phase
        n_dots, in_rows_per_out, halo_rows = 3, s, s * e

    # ---- row-tile picker: largest tile that fits the VMEM budget -----------
    bytes_in_row = in_rows_per_out * owp * k * 2
    bytes_in_const = halo_rows * owp * k * 2
    bytes_out_row = owp * tn * 2
    bytes_acc_row = owp * tn * 4
    bytes_w = n_dots * k * tn * 2 + cp * 4
    budget = int(0.7 * vmem_limit_bytes)
    avail = budget - 2 * bytes_w - 2 * bytes_in_const
    per_row = 2 * bytes_in_row + 2 * bytes_out_row + bytes_acc_row
    th_max = max(1, min(oh, avail // per_row, max(1, max_pixels_per_step // owp)))
    t = -(-oh // th_max)
    th = -(-oh // t)                     # balanced tiles; OH padded up to t*th
    ohp = t * th

    xb = x.astype(jnp.bfloat16)

    if small_cin:
        # full 3x3 im2col: K index = kh*3c + kw*c + ch
        rb = th
        hp = (ohp - 1) * s + 3
        wp = (owp - 1) * s + 3
        xs = xb[:, :min(h, hp - 1), :min(w_true, wp - 1), :]
        xp = jnp.pad(xs, ((0, 0), (1, hp - 1 - xs.shape[1]),
                          (1, wp - 1 - xs.shape[2]), (0, 0)))
        xw = jnp.concatenate([xp[:, :, kw:kw + owp * s:s, :] for kw in range(3)], axis=-1)
        xr = jnp.concatenate([xw[:, kh:kh + ohp * s:s, :, :] for kh in range(3)], axis=-1)
        if k > k_eff:
            xr = jnp.pad(xr, ((0, 0), (0, 0), (0, 0), (0, k - k_eff)))
        xg = xr.reshape(n, t, th, owp, k)
        row_offsets = (0,)
        wz = jnp.zeros((3, 3, c, cout), jnp.float32).at[:, :, :cin_true, :].set(weight)
        wk = jnp.zeros((n_dots, k, cp), jnp.bfloat16)
        wk = wk.at[0, :k_eff, :cout].set(wz.reshape(9 * c, cout).astype(jnp.bfloat16))
    else:
        # kw-concat (K = 3*Cin) + stride-phase row split + row tiles with halo.
        rb = s * (th + e)
        hp = (ohp + e) * s
        wp = (owp - 1) * s + 3
        xs = xb[:, :min(h, hp - 1), :min(w_true, wp - 1), :]
        xp = jnp.pad(xs, ((0, 0), (1, hp - 1 - xs.shape[1]),
                          (1, wp - 1 - xs.shape[2]), (0, 0)))
        # xw[b, i, j, kw*c + ch] = xp[b, i, j*s + kw, ch]
        xw = jnp.concatenate([xp[:, :, kw:kw + owp * s:s, :] for kw in range(3)], axis=-1)
        # tile-row p*(th+e)+rr  <->  padded input row (ti*th + rr)*s + p
        parts = []
        for p in range(s):
            sp = xw[:, p::s]             # (N, ohp + e, OWP, K)
            parts.append(jnp.stack(
                [sp[:, ti * th: ti * th + th + e] for ti in range(t)], axis=1))
        xg = jnp.concatenate(parts, axis=2) if s > 1 else parts[0]
        row_offsets = tuple((kh % s) * (th + e) + kh // s for kh in range(3))
        wz = jnp.zeros((3, 3, c, cp), jnp.float32).at[:, :, :cin_true, :cout].set(weight)
        wk = wz.reshape(3, 3 * c, cp).astype(jnp.bfloat16)

    bz = jnp.zeros((1, cp), jnp.float32).at[0, :cout].set(bias.astype(jnp.float32))

    kern = functools.partial(_conv_mish_kernel, row_offsets=row_offsets,
                             tile_h=th, owp=owp, k=k, tn=tn)
    y = pl.pallas_call(
        kern,
        out_shape=jax.ShapeDtypeStruct((n, ohp, owp, cp), jnp.bfloat16),
        grid=(t, n, nj),                 # row tiles first (v7x megacore friendly)
        in_specs=[
            pl.BlockSpec((1, 1, rb, owp, k), lambda ti, bi, ji: (bi, ti, 0, 0, 0)),
            pl.BlockSpec((n_dots, k, tn), lambda ti, bi, ji: (0, 0, ji)),
            pl.BlockSpec((1, tn), lambda ti, bi, ji: (0, ji)),
        ],
        out_specs=pl.BlockSpec((1, th, owp, tn), lambda ti, bi, ji: (bi, ti, 0, ji)),
        compiler_params=pltpu.CompilerParams(
            dimension_semantics=("parallel", "parallel", "parallel"),
            vmem_limit_bytes=int(vmem_limit_bytes),
        ),
    )(xg, wk, bz)
    return y, oh, ow


# ---------------------------------------------------------------------------
# EncoderModule equivalent (concrete Conv3x3 + Mish encoder stack)
# ---------------------------------------------------------------------------
class EncoderModulePallas:
    def __init__(self, in_channels: int, channels: List[int], strides: List[int],
                 layers: List[int], key=None):
        assert len(channels) == len(strides)
        self._layers = list(layers)
        self._output_strides = _take(strides, layers)
        self._output_filters = _take(channels, layers)
        self._strides = list(strides)
        self._channels = list(channels)
        if key is None:
            key = jax.random.PRNGKey(0)
        self.params = []
        c_prev = in_channels
        for c_out in channels:
            key, kw_key, kb_key = jax.random.split(key, 3)
            fan_in = 9 * c_prev
            wgt = jax.random.normal(kw_key, (3, 3, c_prev, c_out), jnp.float32)
            wgt = wgt * (2.0 / fan_in) ** 0.5
            b = 0.01 * jax.random.normal(kb_key, (c_out,), jnp.float32)
            self.params.append((wgt, b))
            c_prev = c_out

    @property
    def output_strides(self):
        return self._output_strides

    @property
    def output_filters(self):
        return self._output_filters

    # TODO(synk): set_trainable / requires_grad is a training-time concept with no
    # forward-kernel equivalent (this is a forward-only Pallas implementation).

    def __call__(self, x_nchw):
        feat = jnp.transpose(x_nchw, (0, 2, 3, 1))   # single NCHW->NHWC at the input
        h, w = feat.shape[1], feat.shape[2]
        outputs = []
        for (wgt, b), s in zip(self.params, self._strides):
            feat, h, w = conv3x3_mish(feat, h, w, wgt, b, s)
            outputs.append((feat, h, w, wgt.shape[-1]))
        selected = _take(outputs, self._layers)
        return [jnp.transpose(f[:, :hh, :ww, :cc], (0, 3, 1, 2)).astype(jnp.float32)
                for f, hh, ww, cc in selected]


# ---------------------------------------------------------------------------
# Pure-JAX reference (mirrors the kernel's bf16 layer-boundary quantisation)
# ---------------------------------------------------------------------------
def _ref_forward(params, strides, layers, x_nchw):
    x = jnp.transpose(x_nchw, (0, 2, 3, 1)).astype(jnp.bfloat16).astype(jnp.float32)
    feats = []
    for (wgt, b), s in zip(params, strides):
        wq = wgt.astype(jnp.bfloat16).astype(jnp.float32)
        y = lax.conv_general_dilated(
            x, wq, (s, s), ((1, 1), (1, 1)),
            dimension_numbers=("NHWC", "HWIO", "NHWC"),
            preferred_element_type=jnp.float32,
        ) + b
        y = y * jnp.tanh(jax.nn.softplus(y))                 # exact Mish
        y = y.astype(jnp.bfloat16).astype(jnp.float32)       # layer-boundary quant
        feats.append(y)
        x = y
    return [jnp.transpose(f, (0, 3, 1, 2)) for f in _take(feats, layers)]


if __name__ == "__main__":
    key = jax.random.PRNGKey(0)
    k1, k2, k3, k4 = jax.random.split(key, 4)

    # ---- test 1: square input, 3 layers, strides [1, 2, 2] ------------------
    batch, in_ch, hw = 2, 4, 16
    channels, strides, layers = [8, 16, 32], [1, 2, 2], [0, 1, 2]
    x = jax.random.normal(k1, (batch, in_ch, hw, hw), jnp.float32)
    enc = EncoderModulePallas(in_ch, channels, strides, layers, key=k2)
    outs = jax.jit(enc.__call__)(x)
    outs = [jax.block_until_ready(o) for o in outs]
    refs = _ref_forward(enc.params, strides, layers, x)
    for o, r in zip(outs, refs):
        assert o.shape == r.shape, (o.shape, r.shape)
        assert bool(jnp.allclose(o, r, atol=3e-2, rtol=3e-2)), \
            float(jnp.max(jnp.abs(o - r)))

    # ---- test 2: non-square input, stride-2 first layer, per-layer check ----
    channels2, strides2, layers2 = [16, 24], [2, 1], [0, 1]
    x2 = jax.random.normal(k3, (1, 3, 13, 20), jnp.float32)
    enc2 = EncoderModulePallas(3, channels2, strides2, layers2, key=k4)
    outs2 = jax.jit(enc2.__call__)(x2)
    outs2 = [jax.block_until_ready(o) for o in outs2]
    refs2 = _ref_forward(enc2.params, strides2, layers2, x2)
    for o, r in zip(outs2, refs2):
        assert o.shape == r.shape, (o.shape, r.shape)
        assert bool(jnp.allclose(o, r, atol=3e-2, rtol=3e-2)), \
            float(jnp.max(jnp.abs(o - r)))

    print("KERNEL_OK")
</pallas_src>

<mosaic_0001>
module attributes {stable_mosaic.version = 11 : i64} {
  func.func @_conv_mish_kernel(%arg0: i32, %arg1: i32, %arg2: i32, %arg3: memref<1x1x16x16x128xbf16, #tpu.memory_space<vmem>>, %arg4: memref<1x128x128xbf16, #tpu.memory_space<vmem>>, %arg5: memref<1x128xf32, #tpu.memory_space<vmem>>, %arg6: memref<1x16x16x128xbf16, #tpu.memory_space<vmem>>) attributes {dimension_semantics = [#tpu.dimension_semantics<parallel>, #tpu.dimension_semantics<parallel>, #tpu.dimension_semantics<parallel>], iteration_bounds = array<i64: 1, 2, 1>, scalar_prefetch = 0 : i64, scratch_operands = 0 : i64, tpu.core_type = #tpu.core_type<tc>, window_params = [{transform_indices = @transform_0, window_bounds = array<i64: 1, 1, 16, 16, 128>}, {transform_indices = @transform_1, window_bounds = array<i64: 1, 128, 128>}, {transform_indices = @transform_2, window_bounds = array<i64: 1, 128>}, {transform_indices = @transform_3, window_bounds = array<i64: 1, 16, 16, 128>}]} {
    %c0 = arith.constant 0 : index
    %c0_0 = arith.constant 0 : index
    %0 = vector.load %arg5[%c0, %c0_0] : memref<1x128xf32, #tpu.memory_space<vmem>>, vector<1x128xf32>
    %c0_1 = arith.constant 0 : index
    %c0_2 = arith.constant 0 : index
    %c0_3 = arith.constant 0 : index
    %c0_4 = arith.constant 0 : index
    %c0_5 = arith.constant 0 : index
    %1 = vector.load %arg3[%c0_1, %c0_2, %c0_3, %c0_4, %c0_5] : memref<1x1x16x16x128xbf16, #tpu.memory_space<vmem>>, vector<1x1x16x16x128xbf16>
    %2 = vector.shape_cast %1 : vector<1x1x16x16x128xbf16> to vector<16x16x128xbf16>
    %3 = vector.shape_cast %2 : vector<16x16x128xbf16> to vector<256x128xbf16>
    %c0_6 = arith.constant 0 : index
    %c0_7 = arith.constant 0 : index
    %c0_8 = arith.constant 0 : index
    %4 = vector.load %arg4[%c0_6, %c0_7, %c0_8] : memref<1x128x128xbf16, #tpu.memory_space<vmem>>, vector<1x128x128xbf16>
    %5 = vector.shape_cast %4 : vector<1x128x128xbf16> to vector<128x128xbf16>
    %cst = arith.constant dense<0.000000e+00> : vector<256x128xf32>
    %6 = tpu.matmul %3, %5, %cst {dimension_numbers = #tpu.dot_dimension_numbers<[1], [0], [0], [1], [0, 0, 1, 1], [], []>} : vector<256x128xbf16>, vector<128x128xbf16>, vector<256x128xf32> -> vector<256x128xf32>
    %7 = vector.broadcast %0 : vector<1x128xf32> to vector<256x128xf32>
    %8 = arith.addf %7, %6 : vector<256x128xf32>
    %cst_9 = arith.constant 2.000000e+01 : f32
    %9 = vector.broadcast %cst_9 : f32 to vector<256x128xf32>
    %10 = arith.minimumf %8, %9 : vector<256x128xf32>
    %11 = math.exp %10 : vector<256x128xf32>
    %cst_10 = arith.constant 2.000000e+00 : f32
    %12 = vector.broadcast %cst_10 : f32 to vector<256x128xf32>
    %13 = arith.addf %11, %12 : vector<256x128xf32>
    %14 = arith.mulf %11, %13 : vector<256x128xf32>
    %15 = arith.mulf %8, %14 : vector<256x128xf32>
    %cst_11 = arith.constant 2.000000e+00 : f32
    %16 = vector.broadcast %cst_11 : f32 to vector<256x128xf32>
    %17 = arith.addf %14, %16 : vector<256x128xf32>
    %18 = tpu.reciprocal %17 {approx = true} : vector<256x128xf32> -> vector<256x128xf32>
    %19 = arith.mulf %15, %18 : vector<256x128xf32>
    %20 = vector.shape_cast %19 : vector<256x128xf32> to vector<16x16x128xf32>
    %21 = arith.truncf %20 : vector<16x16x128xf32> to vector<16x16x128xbf16>
    %c0_12 = arith.constant 0 : index
    %c0_13 = arith.constant 0 : index
    %c0_14 = arith.constant 0 : index
    %c0_15 = arith.constant 0 : index
    %22 = vector.load %arg6[%c0_12, %c0_13, %c0_14, %c0_15] : memref<1x16x16x128xbf16, #tpu.memory_space<vmem>>, vector<1x16x16x128xbf16>
    %23 = vector.shape_cast %22 : vector<1x16x16x128xbf16> to vector<16x16x128xbf16>
    %24 = vector.shape_cast %21 : vector<16x16x128xbf16> to vector<1x16x16x128xbf16>
    tpu.vector_store %arg6[%c0_12, %c0_13, %c0_14, %c0_15], %24 {strides = array<i32>} : memref<1x16x16x128xbf16, #tpu.memory_space<vmem>>, vector<1x16x16x128xbf16>,
    return
  }
  func.func @transform_0(%arg0: i32, %arg1: i32, %arg2: i32) -> (i32, i32, i32, i32, i32) {
    %c0_i32 = arith.constant 0 : i32
    %c0_i32_0 = arith.constant 0 : i32
    %c0_i32_1 = arith.constant 0 : i32
    %c0_i32_2 = arith.constant 0 : i32
    return %arg1, %arg0, %c0_i32, %c0_i32_0, %c0_i32_1 : i32, i32, i32, i32, i32
  }
  func.func @transform_1(%arg0: i32, %arg1: i32, %arg2: i32) -> (i32, i32, i32) {
    %c0_i32 = arith.constant 0 : i32
    %c0_i32_0 = arith.constant 0 : i32
    %c0_i32_1 = arith.constant 0 : i32
    return %c0_i32, %c0_i32_0, %arg2 : i32, i32, i32
  }
  func.func @transform_2(%arg0: i32, %arg1: i32, %arg2: i32) -> (i32, i32) {
    %c0_i32 = arith.constant 0 : i32
    %c0_i32_0 = arith.constant 0 : i32
    return %c0_i32, %arg2 : i32, i32
  }
  func.func @transform_3(%arg0: i32, %arg1: i32, %arg2: i32) -> (i32, i32, i32, i32) {
    %c0_i32 = arith.constant 0 : i32
    %c0_i32_0 = arith.constant 0 : i32
    return %arg1, %arg0, %c0_i32, %arg2 : i32, i32, i32, i32
  }
}

module attributes {stable_mosaic.version = 11 : i64} {
  func.func @_conv_mish_kernel(%arg0: i32, %arg1: i32, %arg2: i32, %arg3: memref<1x1x18x16x384xbf16, #tpu.memory_space<vmem>>, %arg4: memref<3x384x128xbf16, #tpu.memory_space<vmem>>, %arg5: memref<1x128xf32, #tpu.memory_space<vmem>>, %arg6: memref<1x8x16x128xbf16, #tpu.memory_space<vmem>>) attributes {dimension_semantics = [#tpu.dimension_semantics<parallel>, #tpu.dimension_semantics<parallel>, #tpu.dimension_semantics<parallel>], iteration_bounds = array<i64: 1, 2, 1>, scalar_prefetch = 0 : i64, scratch_operands = 0 : i64, tpu.core_type = #tpu.core_type<tc>, window_params = [{transform_indices = @transform_0, window_bounds = array<i64: 1, 1, 18, 16, 384>}, {transform_indices = @transform_1, window_bounds = array<i64: 3, 384, 128>}, {transform_indices = @transform_2, window_bounds = array<i64: 1, 128>}, {transform_indices = @transform_3, window_bounds = array<i64: 1, 8, 16, 128>}]} {
    %c0 = arith.constant 0 : index
    %c0_0 = arith.constant 0 : index
    %0 = vector.load %arg5[%c0, %c0_0] : memref<1x128xf32, #tpu.memory_space<vmem>>, vector<1x128xf32>
    %c0_1 = arith.constant 0 : index
    %c0_2 = arith.constant 0 : index
    %c0_3 = arith.constant 0 : index
    %c0_4 = arith.constant 0 : index
    %c0_5 = arith.constant 0 : index
    %1 = vector.load %arg3[%c0_1, %c0_2, %c0_3, %c0_4, %c0_5] : memref<1x1x18x16x384xbf16, #tpu.memory_space<vmem>>, vector<1x1x8x16x384xbf16>
    %2 = vector.shape_cast %1 : vector<1x1x8x16x384xbf16> to vector<8x16x384xbf16>
    %3 = vector.shape_cast %2 : vector<8x16x384xbf16> to vector<128x384xbf16>
    %c0_6 = arith.constant 0 : index
    %c0_7 = arith.constant 0 : index
    %c0_8 = arith.constant 0 : index
    %4 = vector.load %arg4[%c0_6, %c0_7, %c0_8] : memref<3x384x128xbf16, #tpu.memory_space<vmem>>, vector<1x384x128xbf16>
    %5 = vector.shape_cast %4 : vector<1x384x128xbf16> to vector<384x128xbf16>
    %cst = arith.constant dense<0.000000e+00> : vector<128x128xf32>
    %6 = tpu.matmul %3, %5, %cst {dimension_numbers = #tpu.dot_dimension_numbers<[1], [0], [0], [1], [0, 0, 1, 1], [], []>} : vector<128x384xbf16>, vector<384x128xbf16>, vector<128x128xf32> -> vector<128x128xf32>
    %7 = vector.broadcast %0 : vector<1x128xf32> to vector<128x128xf32>
    %8 = arith.addf %7, %6 : vector<128x128xf32>
    %c0_9 = arith.constant 0 : index
    %c0_10 = arith.constant 0 : index
    %c9 = arith.constant 9 : index
    %c0_11 = arith.constant 0 : index
    %c0_12 = arith.constant 0 : index
    %9 = vector.load %arg3[%c0_9, %c0_10, %c9, %c0_11, %c0_12] : memref<1x1x18x16x384xbf16, #tpu.memory_space<vmem>>, vector<1x1x8x16x384xbf16>
    %10 = vector.shape_cast %9 : vector<1x1x8x16x384xbf16> to vector<8x16x384xbf16>
    %11 = vector.shape_cast %10 : vector<8x16x384xbf16> to vector<128x384xbf16>
    %c1 = arith.constant 1 : index
    %c0_13 = arith.constant 0 : index
    %c0_14 = arith.constant 0 : index
    %12 = vector.load %arg4[%c1, %c0_13, %c0_14] : memref<3x384x128xbf16, #tpu.memory_space<vmem>>, vector<1x384x128xbf16>
    %13 = vector.shape_cast %12 : vector<1x384x128xbf16> to vector<384x128xbf16>
    %cst_15 = arith.constant dense<0.000000e+00> : vector<128x128xf32>
    %14 = tpu.matmul %11, %13, %cst_15 {dimension_numbers = #tpu.dot_dimension_numbers<[1], [0], [0], [1], [0, 0, 1, 1], [], []>} : vector<128x384xbf16>, vector<384x128xbf16>, vector<128x128xf32> -> vector<128x128xf32>
    %15 = arith.addf %8, %14 : vector<128x128xf32>
    %c0_16 = arith.constant 0 : index
    %c0_17 = arith.constant 0 : index
    %c1_18 = arith.constant 1 : index
    %c0_19 = arith.constant 0 : index
    %c0_20 = arith.constant 0 : index
    %16 = vector.load %arg3[%c0_16, %c0_17, %c1_18, %c0_19, %c0_20] : memref<1x1x18x16x384xbf16, #tpu.memory_space<vmem>>, vector<1x1x8x16x384xbf16>
    %17 = vector.shape_cast %16 : vector<1x1x8x16x384xbf16> to vector<8x16x384xbf16>
    %18 = vector.shape_cast %17 : vector<8x16x384xbf16> to vector<128x384xbf16>
    %c2 = arith.constant 2 : index
    %c0_21 = arith.constant 0 : index
    %c0_22 = arith.constant 0 : index
    %19 = vector.load %arg4[%c2, %c0_21, %c0_22] : memref<3x384x128xbf16, #tpu.memory_space<vmem>>, vector<1x384x128xbf16>
    %20 = vector.shape_cast %19 : vector<1x384x128xbf16> to vector<384x128xbf16>
    %cst_23 = arith.constant dense<0.000000e+00> : vector<128x128xf32>
    %21 = tpu.matmul %18, %20, %cst_23 {dimension_numbers = #tpu.dot_dimension_numbers<[1], [0], [0], [1], [0, 0, 1, 1], [], []>} : vector<128x384xbf16>, vector<384x128xbf16>, vector<128x128xf32> -> vector<128x128xf32>
    %22 = arith.addf %15, %21 : vector<128x128xf32>
    %cst_24 = arith.constant 2.000000e+01 : f32
    %23 = vector.broadcast %cst_24 : f32 to vector<128x128xf32>
    %24 = arith.minimumf %22, %23 : vector<128x128xf32>
    %25 = math.exp %24 : vector<128x128xf32>
    %cst_25 = arith.constant 2.000000e+00 : f32
    %26 = vector.broadcast %cst_25 : f32 to vector<128x128xf32>
    %27 = arith.addf %25, %26 : vector<128x128xf32>
    %28 = arith.mulf %25, %27 : vector<128x128xf32>
    %29 = arith.mulf %22, %28 : vector<128x128xf32>
    %cst_26 = arith.constant 2.000000e+00 : f32
    %30 = vector.broadcast %cst_26 : f32 to vector<128x128xf32>
    %31 = arith.addf %28, %30 : vector<128x128xf32>
    %32 = tpu.reciprocal %31 {approx = true} : vector<128x128xf32> -> vector<128x128xf32>
    %33 = arith.mulf %29, %32 : vector<128x128xf32>
    %34 = vector.shape_cast %33 : vector<128x128xf32> to vector<8x16x128xf32>
    %35 = arith.truncf %34 : vector<8x16x128xf32> to vector<8x16x128xbf16>
    %c0_27 = arith.constant 0 : index
    %c0_28 = arith.constant 0 : index
    %c0_29 = arith.constant 0 : index
    %c0_30 = arith.constant 0 : index
    %36 = vector.load %arg6[%c0_27, %c0_28, %c0_29, %c0_30] : memref<1x8x16x128xbf16, #tpu.memory_space<vmem>>, vector<1x8x16x128xbf16>
    %37 = vector.shape_cast %36 : vector<1x8x16x128xbf16> to vector<8x16x128xbf16>
    %38 = vector.shape_cast %35 : vector<8x16x128xbf16> to vector<1x8x16x128xbf16>
    tpu.vector_store %arg6[%c0_27, %c0_28, %c0_29, %c0_30], %38 {strides = array<i32>} : memref<1x8x16x128xbf16, #tpu.memory_space<vmem>>, vector<1x8x16x128xbf16>,
    return
  }
  func.func @transform_0(%arg0: i32, %arg1: i32, %arg2: i32) -> (i32, i32, i32, i32, i32) {
    %c0_i32 = arith.constant 0 : i32
    %c0_i32_0 = arith.constant 0 : i32
    %c0_i32_1 = arith.constant 0 : i32
    %c0_i32_2 = arith.constant 0 : i32
    return %arg1, %arg0, %c0_i32, %c0_i32_0, %c0_i32_1 : i32, i32, i32, i32, i32
  }
  func.func @transform_1(%arg0: i32, %arg1: i32, %arg2: i32) -> (i32, i32, i32) {
    %c0_i32 = arith.constant 0 : i32
    %c0_i32_0 = arith.constant 0 : i32
    %c0_i32_1 = arith.constant 0 : i32
    return %c0_i32, %c0_i32_0, %arg2 : i32, i32, i32
  }
  func.func @transform_2(%arg0: i32, %arg1: i32, %arg2: i32) -> (i32, i32) {
    %c0_i32 = arith.constant 0 : i32
    %c0_i32_0 = arith.constant 0 : i32
    return %c0_i32, %arg2 : i32, i32
  }
  func.func @transform_3(%arg0: i32, %arg1: i32, %arg2: i32) -> (i32, i32, i32, i32) {
    %c0_i32 = arith.constant 0 : i32
    %c0_i32_0 = arith.constant 0 : i32
    return %arg1, %arg0, %c0_i32, %arg2 : i32, i32, i32, i32
  }
}

module attributes {stable_mosaic.version = 11 : i64} {
  func.func @_conv_mish_kernel(%arg0: i32, %arg1: i32, %arg2: i32, %arg3: memref<1x1x10x16x384xbf16, #tpu.memory_space<vmem>>, %arg4: memref<3x384x128xbf16, #tpu.memory_space<vmem>>, %arg5: memref<1x128xf32, #tpu.memory_space<vmem>>, %arg6: memref<1x4x16x128xbf16, #tpu.memory_space<vmem>>) attributes {dimension_semantics = [#tpu.dimension_semantics<parallel>, #tpu.dimension_semantics<parallel>, #tpu.dimension_semantics<parallel>], iteration_bounds = array<i64: 1, 2, 1>, scalar_prefetch = 0 : i64, scratch_operands = 0 : i64, tpu.core_type = #tpu.core_type<tc>, window_params = [{transform_indices = @transform_0, window_bounds = array<i64: 1, 1, 10, 16, 384>}, {transform_indices = @transform_1, window_bounds = array<i64: 3, 384, 128>}, {transform_indices = @transform_2, window_bounds = array<i64: 1, 128>}, {transform_indices = @transform_3, window_bounds = array<i64: 1, 4, 16, 128>}]} {
    %c0 = arith.constant 0 : index
    %c0_0 = arith.constant 0 : index
    %0 = vector.load %arg5[%c0, %c0_0] : memref<1x128xf32, #tpu.memory_space<vmem>>, vector<1x128xf32>
    %c0_1 = arith.constant 0 : index
    %c0_2 = arith.constant 0 : index
    %c0_3 = arith.constant 0 : index
    %c0_4 = arith.constant 0 : index
    %c0_5 = arith.constant 0 : index
    %1 = vector.load %arg3[%c0_1, %c0_2, %c0_3, %c0_4, %c0_5] : memref<1x1x10x16x384xbf16, #tpu.memory_space<vmem>>, vector<1x1x4x16x384xbf16>
    %2 = vector.shape_cast %1 : vector<1x1x4x16x384xbf16> to vector<4x16x384xbf16>
    %3 = vector.shape_cast %2 : vector<4x16x384xbf16> to vector<64x384xbf16>
    %c0_6 = arith.constant 0 : index
    %c0_7 = arith.constant 0 : index
    %c0_8 = arith.constant 0 : index
    %4 = vector.load %arg4[%c0_6, %c0_7, %c0_8] : memref<3x384x128xbf16, #tpu.memory_space<vmem>>, vector<1x384x128xbf16>
    %5 = vector.shape_cast %4 : vector<1x384x128xbf16> to vector<384x128xbf16>
    %cst = arith.constant dense<0.000000e+00> : vector<64x128xf32>
    %6 = tpu.matmul %3, %5, %cst {dimension_numbers = #tpu.dot_dimension_numbers<[1], [0], [0], [1], [0, 0, 1, 1], [], []>} : vector<64x384xbf16>, vector<384x128xbf16>, vector<64x128xf32> -> vector<64x128xf32>
    %7 = vector.broadcast %0 : vector<1x128xf32> to vector<64x128xf32>
    %8 = arith.addf %7, %6 : vector<64x128xf32>
    %c0_9 = arith.constant 0 : index
    %c0_10 = arith.constant 0 : index
    %c5 = arith.constant 5 : index
    %c0_11 = arith.constant 0 : index
    %c0_12 = arith.constant 0 : index
    %9 = vector.load %arg3[%c0_9, %c0_10, %c5, %c0_11, %c0_12] : memref<1x1x10x16x384xbf16, #tpu.memory_space<vmem>>, vector<1x1x4x16x384xbf16>
    %10 = vector.shape_cast %9 : vector<1x1x4x16x384xbf16> to vector<4x16x384xbf16>
    %11 = vector.shape_cast %10 : vector<4x16x384xbf16> to vector<64x384xbf16>
    %c1 = arith.constant 1 : index
    %c0_13 = arith.constant 0 : index
    %c0_14 = arith.constant 0 : index
    %12 = vector.load %arg4[%c1, %c0_13, %c0_14] : memref<3x384x128xbf16, #tpu.memory_space<vmem>>, vector<1x384x128xbf16>
    %13 = vector.shape_cast %12 : vector<1x384x128xbf16> to vector<384x128xbf16>
    %cst_15 = arith.constant dense<0.000000e+00> : vector<64x128xf32>
    %14 = tpu.matmul %11, %13, %cst_15 {dimension_numbers = #tpu.dot_dimension_numbers<[1], [0], [0], [1], [0, 0, 1, 1], [], []>} : vector<64x384xbf16>, vector<384x128xbf16>, vector<64x128xf32> -> vector<64x128xf32>
    %15 = arith.addf %8, %14 : vector<64x128xf32>
    %c0_16 = arith.constant 0 : index
    %c0_17 = arith.constant 0 : index
    %c1_18 = arith.constant 1 : index
    %c0_19 = arith.constant 0 : index
    %c0_20 = arith.constant 0 : index
    %16 = vector.load %arg3[%c0_16, %c0_17, %c1_18, %c0_19, %c0_20] : memref<1x1x10x16x384xbf16, #tpu.memory_space<vmem>>, vector<1x1x4x16x384xbf16>
    %17 = vector.shape_cast %16 : vector<1x1x4x16x384xbf16> to vector<4x16x384xbf16>
    %18 = vector.shape_cast %17 : vector<4x16x384xbf16> to vector<64x384xbf16>
    %c2 = arith.constant 2 : index
    %c0_21 = arith.constant 0 : index
    %c0_22 = arith.constant 0 : index
    %19 = vector.load %arg4[%c2, %c0_21, %c0_22] : memref<3x384x128xbf16, #tpu.memory_space<vmem>>, vector<1x384x128xbf16>
    %20 = vector.shape_cast %19 : vector<1x384x128xbf16> to vector<384x128xbf16>
    %cst_23 = arith.constant dense<0.000000e+00> : vector<64x128xf32>
    %21 = tpu.matmul %18, %20, %cst_23 {dimension_numbers = #tpu.dot_dimension_numbers<[1], [0], [0], [1], [0, 0, 1, 1], [], []>} : vector<64x384xbf16>, vector<384x128xbf16>, vector<64x128xf32> -> vector<64x128xf32>
    %22 = arith.addf %15, %21 : vector<64x128xf32>
    %cst_24 = arith.constant 2.000000e+01 : f32
    %23 = vector.broadcast %cst_24 : f32 to vector<64x128xf32>
    %24 = arith.minimumf %22, %23 : vector<64x128xf32>
    %25 = math.exp %24 : vector<64x128xf32>
    %cst_25 = arith.constant 2.000000e+00 : f32
    %26 = vector.broadcast %cst_25 : f32 to vector<64x128xf32>
    %27 = arith.addf %25, %26 : vector<64x128xf32>
    %28 = arith.mulf %25, %27 : vector<64x128xf32>
    %29 = arith.mulf %22, %28 : vector<64x128xf32>
    %cst_26 = arith.constant 2.000000e+00 : f32
    %30 = vector.broadcast %cst_26 : f32 to vector<64x128xf32>
    %31 = arith.addf %28, %30 : vector<64x128xf32>
    %32 = tpu.reciprocal %31 {approx = true} : vector<64x128xf32> -> vector<64x128xf32>
    %33 = arith.mulf %29, %32 : vector<64x128xf32>
    %34 = vector.shape_cast %33 : vector<64x128xf32> to vector<4x16x128xf32>
    %35 = arith.truncf %34 : vector<4x16x128xf32> to vector<4x16x128xbf16>
    %c0_27 = arith.constant 0 : index
    %c0_28 = arith.constant 0 : index
    %c0_29 = arith.constant 0 : index
    %c0_30 = arith.constant 0 : index
    %36 = vector.load %arg6[%c0_27, %c0_28, %c0_29, %c0_30] : memref<1x4x16x128xbf16, #tpu.memory_space<vmem>>, vector<1x4x16x128xbf16>
    %37 = vector.shape_cast %36 : vector<1x4x16x128xbf16> to vector<4x16x128xbf16>
    %38 = vector.shape_cast %35 : vector<4x16x128xbf16> to vector<1x4x16x128xbf16>
    tpu.vector_store %arg6[%c0_27, %c0_28, %c0_29, %c0_30], %38 {strides = array<i32>} : memref<1x4x16x128xbf16, #tpu.memory_space<vmem>>, vector<1x4x16x128xbf16>,
    return
  }
  func.func @transform_0(%arg0: i32, %arg1: i32, %arg2: i32) -> (i32, i32, i32, i32, i32) {
    %c0_i32 = arith.constant 0 : i32
    %c0_i32_0 = arith.constant 0 : i32
    %c0_i32_1 = arith.constant 0 : i32
    %c0_i32_2 = arith.constant 0 : i32
    return %arg1, %arg0, %c0_i32, %c0_i32_0, %c0_i32_1 : i32, i32, i32, i32, i32
  }
  func.func @transform_1(%arg0: i32, %arg1: i32, %arg2: i32) -> (i32, i32, i32) {
    %c0_i32 = arith.constant 0 : i32
    %c0_i32_0 = arith.constant 0 : i32
    %c0_i32_1 = arith.constant 0 : i32
    return %c0_i32, %c0_i32_0, %arg2 : i32, i32, i32
  }
  func.func @transform_2(%arg0: i32, %arg1: i32, %arg2: i32) -> (i32, i32) {
    %c0_i32 = arith.constant 0 : i32
    %c0_i32_0 = arith.constant 0 : i32
    return %c0_i32, %arg2 : i32, i32
  }
  func.func @transform_3(%arg0: i32, %arg1: i32, %arg2: i32) -> (i32, i32, i32, i32) {
    %c0_i32 = arith.constant 0 : i32
    %c0_i32_0 = arith.constant 0 : i32
    return %arg1, %arg0, %c0_i32, %arg2 : i32, i32, i32, i32
  }
}

</mosaic_0001>

<bundles_post_ra>
// kernel: a_call__.3
= control target key start
LH: loop header
LB: loop body
LE: loop exit
PB: predicated region body
PF: predicated region fallthrough
CT: control target
= control target key end

     0   :  { %s1740_s12 = smov 0   ;;  %s1742_s13 = smov 0   ;;  %s2092_s0 = inlined_call_operand.vmem [shape: bf16[2,1,16,16,128], index: 0, kind: input, shape index: {}]   ;;  %s2093_s1 = inlined_call_operand.vmem [shape: bf16[1,128,128], index: 1, kind: input, shape index: {}]   ;;  %s2094_s2 = inlined_call_operand.vmem [shape: f32[1,128], index: 2, kind: input, shape index: {}]   ;;  %s2095_s3 = inlined_call_operand.vmem [shape: bf16[2,16,16,128], index: 3, kind: output, shape index: {}]  }
   0x1   :  { %s1744_s14 = smov 0  }
   0x2 LB: > { %s28_s15 = sadd.s32 1, %s1714_s13  ;;  %p1239_p0 = scmp.ge.s32.totalorder %s1718_s14, 1  ;;  %s1718_s14 = sphi %s1744_s14, %s13_s14   ;;  %s1714_s13 = sphi %s1742_s13, %s2099_s13   ;;  %s1710_s12 = sphi %s1740_s12, %s2098_s12  }
   0x3   : > { %p30_p1 = scmp.ge.s32.totalorder %s28_s15, 2  ;;  %p183_p2 = scmp.lt.s32.totalorder %s1718_s14, 3 }
   0x5   : > { %s2101_s15 = smov (%p30_p1, %s28_s15), 0  ;;  %p184_p3 = pnand %p1239_p0, %p183_p2 }
   0x6   : > { %v1544_v0 = vld [vmem:[%s2093_s1] sm:$0xff] (!%p184_p3)   ;;  %p226_p4 = scmp.lt.s32.totalorder (!%p184_p3), %s1710_s12, 1  ;;  %v1545_v1 = vld [vmem:[%s2093_s1 + $0x8] sm:$0xff] (!%p184_p3)   ;;  %v1546_v2 = vld [vmem:[%s2093_s1 + $0x10] sm:$0xff] (!%p184_p3)  }
   0x7   : > { %187 = sbr.rel (%p184_p3) target bundleno = 357 (0x165), region = 32  ;;  %1456 = vmatprep.subr.bf16.mxu0 (!%p184_p3), %v1544_v0  ;;  %1504 = vmatprep.subr.bf16.mxu1 (!%p184_p3), %v1544_v0  ;;  %v1547_v3 = vld [vmem:[%s2093_s1 + $0x18] sm:$0xff] (!%p184_p3)   ;;  %v1548_v6 = vld [vmem:[%s2093_s1 + $0x20] sm:$0xff] (!%p184_p3)   ;;  %v1549_v7 = vld [vmem:[%s2093_s1 + $0x28] sm:$0xff] (!%p184_p3)  }
   0x8   : > { %1457 = vmatpush3.bf16.msra.mxu0 (!%p184_p3), %v1544_v0  ;;  %1512 = vmatpush3.bf16.msra.mxu1 (!%p184_p3), %v1544_v0  ;;  %v1550_v8 = vld [vmem:[%s2093_s1 + $0x30] sm:$0xff] (!%p184_p3)   ;;  %v1551_v9 = vld [vmem:[%s2093_s1 + $0x38] sm:$0xff] (!%p184_p3)   ;;  %v1811_v24 = vld [vmem:[%s2094_s2] ss:$0 sm:$0xff] (!%p184_p3) }
   0x9   : > { %1458 = vmatprep.subr.bf16.mxu0 (!%p184_p3), %v1545_v1  ;;  %1505 = vmatprep.subr.bf16.mxu1 (!%p184_p3), %v1545_v1 }
   0xc   : > { %1459 = vmatpush3.bf16.msra.mxu0 (!%p184_p3), %v1545_v1  ;;  %1513 = vmatpush3.bf16.msra.mxu1 (!%p184_p3), %v1545_v1 }
   0xd   : > { %1460 = vmatprep.subr.bf16.mxu0 (!%p184_p3), %v1546_v2  ;;  %1506 = vmatprep.subr.bf16.mxu1 (!%p184_p3), %v1546_v2 }
   0xe   : > { %s2103_s12 = smov (!%p226_p4, %s1710_s12), 1 }
   0xf   : > { %s1303_s22 = sshll.u32 %s2103_s12, 7 }
  0x10   : > { %s1775_s25 = scalar_lea.vmem %s2092_s0, %s1303_s22  ;;  %1461 = vmatpush3.bf16.msra.mxu0 %v1546_v2  ;;  %1514 = vmatpush3.bf16.msra.mxu1 %v1546_v2  ;;  %s1944_s17 = scalar_lea.vmem %s2095_s3, %s1303_s22 }
  0x11   : > { %v1552_v4 = vld [vmem:[%s1775_s25] sm:$0xff]   ;;  %1462 = vmatprep.subr.bf16.mxu0 %v1547_v3  ;;  %1507 = vmatprep.subr.bf16.mxu1 %v1547_v3  ;;  %v1554_v10 = vld [vmem:[%s1775_s25 + $0x8] sm:$0xff]   ;;  %v1556_v12 = vld [vmem:[%s1775_s25 + $0x10] sm:$0xff]  }
  0x12   : > { %v1553_v5 = vld [vmem:[%s1775_s25 + $0x40] sm:$0xff]   ;;  %1472 = vmatprep.mubr.bf16.mxu0 %v1552_v4  ;;  %v1555_v11 = vld [vmem:[%s1775_s25 + $0x48] sm:$0xff]   ;;  %v1557_v13 = vld [vmem:[%s1775_s25 + $0x50] sm:$0xff]  }
  0x13   : > { %1488 = vmatprep.mubr.bf16.mxu1 %v1553_v5  ;;  %v1558_v14 = vld [vmem:[%s1775_s25 + $0x18] sm:$0xff]   ;;  %v1560_v16 = vld [vmem:[%s1775_s25 + $0x20] sm:$0xff]   ;;  %v1562_v18 = vld [vmem:[%s1775_s25 + $0x28] sm:$0xff]  }
  0x14   : > { %1463 = vmatpush3.bf16.msra.mxu0 %v1547_v3  ;;  %1515 = vmatpush3.bf16.msra.mxu1 %v1547_v3  ;;  %v1559_v15 = vld [vmem:[%s1775_s25 + $0x58] sm:$0xff]   ;;  %v1561_v17 = vld [vmem:[%s1775_s25 + $0x60] sm:$0xff]   ;;  %v1563_v19 = vld [vmem:[%s1775_s25 + $0x68] sm:$0xff]  }
  0x15   : > { %1464 = vmatprep.subr.bf16.mxu0 %v1548_v6  ;;  %1508 = vmatprep.subr.bf16.mxu1 %v1548_v6  ;;  %v1564_v20 = vld [vmem:[%s1775_s25 + $0x30] sm:$0xff]   ;;  %v1566_v22 = vld [vmem:[%s1775_s25 + $0x38] sm:$0xff]  }
  0x16   : > { %v1565_v21 = vld [vmem:[%s1775_s25 + $0x70] sm:$0xff]   ;;  %v1567_v23 = vld [vmem:[%s1775_s25 + $0x78] sm:$0xff]  }
  0x18   : > { %1465 = vmatpush3.bf16.msra.mxu0 %v1548_v6  ;;  %1516 = vmatpush3.bf16.msra.mxu1 %v1548_v6 }
  0x19   : > { %1466 = vmatprep.subr.bf16.mxu0 %v1549_v7  ;;  %1509 = vmatprep.subr.bf16.mxu1 %v1549_v7 }
  0x1c   : > { %1467 = vmatpush3.bf16.msra.mxu0 %v1549_v7  ;;  %1517 = vmatpush3.bf16.msra.mxu1 %v1549_v7 }
  0x1d   : > { %1468 = vmatprep.subr.bf16.mxu0 %v1550_v8  ;;  %1510 = vmatprep.subr.bf16.mxu1 %v1550_v8 }
  0x20   : > { %1469 = vmatpush3.bf16.msra.mxu0 %v1550_v8  ;;  %1518 = vmatpush3.bf16.msra.mxu1 %v1550_v8 }
  0x21   : > { %1470 = vmatprep.subr.bf16.mxu0 %v1551_v9  ;;  %1511 = vmatprep.subr.bf16.mxu1 %v1551_v9 }
  0x24   : > { %1471 = vmatpush3.bf16.msra.mxu0 %v1551_v9  ;;  %1519 = vmatpush3.bf16.msra.mxu1 %v1551_v9 }
  0x27   : > { %1473 = vmatmul.mubr.bf16.vlgmr.msra.gmra.mrb[0].mxu0 %v1554_v10  ;;  %1489 = vmatmul.mubr.bf16.vlgmr.msra.gmra.mrb[0].mxu1 %v1555_v11 }
  0x28   : > { %1476 = vmatprep.mubr.bf16.mxu0 %v1556_v12  ;;  %1492 = vmatprep.mubr.bf16.mxu1 %v1557_v13 }
  0x2f   : > { %1477 = vmatmul.mubr.bf16.gmra.mrb[4].mxu0 %v1558_v14  ;;  %1493 = vmatmul.mubr.bf16.gmra.mrb[4].mxu1 %v1559_v15 }
  0x30   : > { %1480 = vmatprep.mubr.bf16.mxu0 %v1560_v16  ;;  %1496 = vmatprep.mubr.bf16.mxu1 %v1561_v17 }
  0x37   : > { %1481 = vmatmul.mubr.bf16.gmra.mrb[8].mxu0 %v1562_v18  ;;  %1497 = vmatmul.mubr.bf16.gmra.mrb[8].mxu1 %v1563_v19 }
  0x38   : > { %1484 = vmatprep.mubr.bf16.mxu0 %v1564_v20  ;;  %1500 = vmatprep.mubr.bf16.mxu1 %v1565_v21 }
  0x3f   : > { %1485 = vmatmul.mubr.bf16.gmra.mrb[12].mxu0 %v1566_v22  ;;  %1501 = vmatmul.mubr.bf16.gmra.mrb[12].mxu1 %v1567_v23 }
  0xfa   : > { %v1474_v25 = vpop.f32.mrb[0].mxu0  ;;  %v1490_v26 = vpop.f32.mrb[0].mxu1 }
  0xfb   : > { %v1814_v27 = vadd.f32 %v1474_v25, %v1811_v24  ;;  %v1817_v28 = vadd.f32 %v1490_v26, %v1811_v24  ;;  %v484_v29 = vpop.f32.mrb[1].mxu0  ;;  %v548_v30 = vpop.f32.mrb[1].mxu1 }
  0xfc   : > { %v1820_v31 = vadd.f32 %v1811_v24, %v484_v29  ;;  %v1823_v32 = vadd.f32 %v1811_v24, %v548_v30  ;;  %v1475_v33 = vpop.f32.mrb[2].mxu0  ;;  %v1491_v34 = vpop.f32.mrb[2].mxu1 }
  0xfd   : > { %v651_v35 = vmin.f32 %v1814_v27, 20.0  ;;  %v667_v36 = vmin.f32 %v1817_v28, 20.0  ;;  %v1828_v37 = vadd.f32 %v1475_v33, %v1811_v24  ;;  %v1831_v38 = vadd.f32 %v1491_v34, %v1811_v24  ;;  %v487_v39 = vpop.f32.mrb[3].mxu0  ;;  %v551_v40 = vpop.f32.mrb[3].mxu1 }
  0xfe   : > { %v649_v41 = vmin.f32 %v1820_v31, 20.0  ;;  %v665_v42 = vmin.f32 %v1823_v32, 20.0  ;;  %v1836_v43 = vadd.f32 %v1811_v24, %v487_v39  ;;  %v1839_v44 = vadd.f32 %v1811_v24, %v551_v40 }
  0xff   : > { %v685_v45 = vmul.f32 1.442695, %v651_v35  ;;  %v717_v46 = vmul.f32 1.442695, %v667_v36  ;;  %v652_v47 = vmin.f32 %v1828_v37, 20.0  ;;  %v668_v48 = vmin.f32 %v1831_v38, 20.0 }
 0x100   : > { %v681_v49 = vmul.f32 1.442695, %v649_v41  ;;  %v713_v50 = vmul.f32 1.442695, %v665_v42  ;;  %v650_v51 = vmin.f32 %v1836_v43, 20.0  ;;  %v666_v52 = vmin.f32 %v1839_v44, 20.0 }
 0x101   : > { %1568 = vpow2.f32 %v685_v45  ;;  %v687_v53 = vmul.f32 1.442695, %v652_v47  ;;  %v719_v54 = vmul.f32 1.442695, %v668_v48 }
 0x102   : > { %1570 = vpow2.f32 %v717_v46  ;;  %v1478_v55 = vpop.f32.mrb[4].mxu0  ;;  %v1494_v56 = vpop.f32.mrb[4].mxu1  ;;  %v683_v57 = vmul.f32 1.442695, %v650_v51  ;;  %v715_v62 = vmul.f32 1.442695, %v666_v52 }
 0x103   : > { %1572 = vpow2.f32 %v681_v49  ;;  %v1846_v58 = vadd.f32 %v1478_v55, %v1811_v24  ;;  %v1849_v59 = vadd.f32 %v1494_v56, %v1811_v24  ;;  %v500_v60 = vpop.f32.mrb[5].mxu0  ;;  %v564_v61 = vpop.f32.mrb[5].mxu1 }
 0x104   : > { %1574 = vpow2.f32 %v713_v50  ;;  %v1852_v63 = vadd.f32 %v1811_v24, %v500_v60  ;;  %v1855_v0 = vadd.f32 %v1811_v24, %v564_v61  ;;  %v1479_v1 = vpop.f32.mrb[6].mxu0  ;;  %v1495_v2 = vpop.f32.mrb[6].mxu1 }
 0x105   : > { %1576 = vpow2.f32 %v687_v53  ;;  %v655_v3 = vmin.f32 %v1846_v58, 20.0  ;;  %v671_v4 = vmin.f32 %v1849_v59, 20.0  ;;  %v1860_v5 = vadd.f32 %v1479_v1, %v1811_v24  ;;  %v503_v6 = vpop.f32.mrb[7].mxu0  ;;  %v567_v7 = vpop.f32.mrb[7].mxu1 }
 0x106   : > { %1578 = vpow2.f32 %v719_v54  ;;  %v653_v8 = vmin.f32 %v1852_v63, 20.0  ;;  %v669_v9 = vmin.f32 %v1855_v0, 20.0  ;;  %v1865_v10 = vadd.f32 %v1495_v2, %v1811_v24 }
 0x107   : > { %1580 = vpow2.f32 %v683_v57  ;;  %v693_v11 = vmul.f32 1.442695, %v655_v3  ;;  %v725_v12 = vmul.f32 1.442695, %v671_v4  ;;  %v656_v13 = vmin.f32 %v1860_v5, 20.0 }
 0x108   : > { %1582 = vpow2.f32 %v715_v62  ;;  %v689_v14 = vmul.f32 1.442695, %v653_v8  ;;  %v721_v15 = vmul.f32 1.442695, %v669_v9  ;;  %v672_v16 = vmin.f32 %v1865_v10, 20.0 }
 0x109   : > { %1584 = vpow2.f32 %v693_v11  ;;  %v1870_v17 = vadd.f32 %v1811_v24, %v503_v6  ;;  %v1873_v18 = vadd.f32 %v1811_v24, %v567_v7  ;;  %v695_v19 = vmul.f32 1.442695, %v656_v13 }
 0x10a   : > { %1586 = vpow2.f32 %v725_v12  ;;  %v1482_v20 = vpop.f32.mrb[8].mxu0  ;;  %v1498_v21 = vpop.f32.mrb[8].mxu1  ;;  %v727_v23 = vmul.f32 1.442695, %v672_v16 }
 0x10b   : > { %v1569_v22 = vpop.eup %1568  ;;  %1588 = vpow2.f32 %v689_v14  ;;  %v654_v25 = vmin.f32 %v1870_v17, 20.0  ;;  %v516_v26 = vpop.f32.mrb[9].mxu0  ;;  %v670_v41 = vmin.f32 %v1873_v18, 20.0  ;;  %v1886_v48 = vadd.f32 %v1482_v20, %v1811_v24 }
 0x10c   : > { %v1876_v29 = vpop.f32.mrb[9].mxu1  ;;  %v1571_v30 = vpop.eup %1570  ;;  %v747_v33 = vadd.f32 2.0, %v1569_v22  ;;  %1590 = vpow2.f32 %v721_v15  ;;  %v1891_v53 = vadd.f32 %v1498_v21, %v1811_v24  ;;  %v1894_v2 = vadd.f32 %v1811_v24, %v516_v26 }
 0x10d   : > { %v1878_v34 = vpop.f32.mrb[10].mxu0  ;;  %v1880_v35 = vpop.f32.mrb[10].mxu1  ;;  %v763_v39 = vadd.f32 2.0, %v1571_v30  ;;  %v691_v40 = vmul.f32 1.442695, %v654_v25  ;;  %1592 = vpow2.f32 %v695_v19 }
 0x10e   : > { %v1573_v36 = vpop.eup %1572  ;;  %v1883_v42 = vpop.f32.mrb[11].mxu0  ;;  %v779_v46 = vmul.f32 %v1569_v22, %v747_v33  ;;  %1594 = vpow2.f32 %v727_v23  ;;  %v1896_v7 = vmul.f32 1.442695, %v670_v41 }
 0x10f   : > { %v1575_v45 = vpop.eup %1574  ;;  %v745_v47 = vadd.f32 2.0, %v1573_v36  ;;  %v1888_v49 = vpop.f32.mrb[11].mxu1  ;;  %v795_v51 = vmul.f32 %v1571_v30, %v763_v39  ;;  %1596 = vpow2.f32 %v691_v40 }
 0x110   : > { %v1577_v50 = vpop.eup %1576  ;;  %v761_v52 = vadd.f32 2.0, %v1575_v45  ;;  %v843_v55 = vadd.f32 2.0, %v779_v46  ;;  %v811_v30 = vmul.f32 %v779_v46, %v1814_v27 }
 0x111   : > { %v1579_v54 = vpop.eup %1578  ;;  %v777_v56 = vmul.f32 %v1573_v36, %v745_v47  ;;  %v748_v57 = vadd.f32 2.0, %v1577_v50  ;;  %v859_v61 = vadd.f32 2.0, %v795_v51 }
 0x112   : > { %v1581_v60 = vpop.eup %1580  ;;  %v793_v62 = vmul.f32 %v1575_v45, %v761_v52  ;;  %v764_v1 = vadd.f32 2.0, %v1579_v54  ;;  %1598 = vrcp.f32 %v843_v55  ;;  %v1898_v8 = vpop.f32.mrb[12].mxu0 }
 0x113   : > { %v1583_v3 = vpop.eup %1582  ;;  %v841_v4 = vadd.f32 2.0, %v777_v56  ;;  %v780_v6 = vmul.f32 %v1577_v50, %v748_v57  ;;  %v1900_v9 = vpop.f32.mrb[12].mxu1  ;;  %1600 = vrcp.f32 %v859_v61  ;;  %v746_v21 = vadd.f32 2.0, %v1581_v60 }
 0x114   : > { %v1585_v11 = vpop.eup %1584  ;;  %v857_v12 = vadd.f32 2.0, %v793_v62  ;;  %v796_v13 = vmul.f32 %v1579_v54, %v764_v1  ;;  %v1903_v15 = vpop.f32.mrb[13].mxu0  ;;  %v762_v36 = vadd.f32 2.0, %v1583_v3  ;;  %v827_v61 = vmul.f32 %v795_v51, %v1817_v28 }
 0x115   : > { %v1905_v16 = vpop.f32.mrb[13].mxu1  ;;  %v1587_v19 = vpop.eup %1586  ;;  %1602 = vrcp.f32 %v841_v4  ;;  %v844_v20 = vadd.f32 2.0, %v780_v6  ;;  %v778_v45 = vmul.f32 %v1581_v60, %v746_v21  ;;  %v751_v47 = vadd.f32 2.0, %v1585_v11 }
 0x116   : > { %v1908_v23 = vpop.f32.mrb[14].mxu0  ;;  %v1910_v25 = vpop.f32.mrb[14].mxu1  ;;  %1604 = vrcp.f32 %v857_v12  ;;  %v860_v33 = vadd.f32 2.0, %v796_v13  ;;  %v767_v50 = vadd.f32 2.0, %v1587_v19  ;;  %v794_v52 = vmul.f32 %v1583_v3, %v762_v36 }
 0x117   : > { %v1589_v26 = vpop.eup %1588  ;;  %v1913_v39 = vpop.f32.mrb[15].mxu0  ;;  %1606 = vrcp.f32 %v844_v20  ;;  %v842_v27 = vadd.f32 2.0, %v778_v45  ;;  %v783_v46 = vmul.f32 %v1585_v11, %v751_v47  ;;  %v809_v12 = vmul.f32 %v777_v56, %v1820_v31 }
 0x118   : > { %v1915_v40 = vpop.f32.mrb[15].mxu1  ;;  %v1591_v41 = vpop.eup %1590  ;;  %1608 = vrcp.f32 %v860_v33  ;;  %v749_v54 = vadd.f32 2.0, %v1589_v26  ;;  %v799_v1 = vmul.f32 %v1587_v19, %v767_v50  ;;  %v858_v22 = vadd.f32 2.0, %v794_v52 }
 0x119   : > { %v765_v55 = vadd.f32 2.0, %v1591_v41  ;;  %v1593_v57 = vpop.eup %1592  ;;  %v825_v21 = vmul.f32 %v793_v62, %v1823_v32  ;;  %v812_v3 = vmul.f32 %v780_v6, %v1828_v37  ;;  %1610 = vrcp.f32 %v842_v27 }
 0x11a   : > { %v1595_v4 = vpop.eup %1594  ;;  %v1919_v14 = vmul.f32 %v1589_v26, %v749_v54  ;;  %v847_v33 = vadd.f32 2.0, %v783_v46  ;;  %v828_v28 = vmul.f32 %v796_v13, %v1831_v38  ;;  %1612 = vrcp.f32 %v858_v22 }
 0x11b   : > { %v1921_v20 = vmul.f32 %v1591_v41, %v765_v55  ;;  %v1597_v60 = vpop.eup %1596  ;;  %v863_v51 = vadd.f32 2.0, %v799_v1  ;;  %v810_v31 = vmul.f32 %v778_v45, %v1836_v43  ;;  %v826_v56 = vmul.f32 %v794_v52, %v1839_v44 }
 0x11c   : > { %v845_v11 = vadd.f32 2.0, %v1919_v14  ;;  %v1599_v19 = vpop.eup %1598  ;;  %v1930_v26 = vmul.f32 %v783_v46, %v1846_v58  ;;  %v752_v36 = vadd.f32 2.0, %v1593_v57  ;;  %1614 = vrcp.f32 %v847_v33 }
 0x11d   : > { %v1601_v32 = vpop.eup %1600  ;;  %v861_v37 = vadd.f32 2.0, %v1921_v20  ;;  %v768_v62 = vadd.f32 2.0, %v1595_v4  ;;  %v750_v6 = vadd.f32 2.0, %v1597_v60  ;;  %v907_v13 = vmul.f32 %v1599_v19, %v811_v30 }
 0x11e   : > { %v1934_v22 = vmul.f32 %v799_v1, %v1849_v59  ;;  %1616 = vrcp.f32 %v863_v51  ;;  %v784_v41 = vmul.f32 %v1593_v57, %v752_v36  ;;  %v923_v44 = vmul.f32 %v1601_v32, %v827_v61 }
 0x11f   : > { %v1603_v38 = vpop.eup %1602  ;;  %1618 = vrcp.f32 %v845_v11  ;;  %v800_v58 = vmul.f32 %v1595_v4, %v768_v62  ;;  %v782_v45 = vmul.f32 %v1597_v60, %v750_v6  ;;  %v2096_v54 = vmin.f32 %v1886_v48, 20.0 }
 0x120   : > { %v1605_v43 = vpop.eup %1604  ;;  %v905_v50 = vmul.f32 %v1603_v38, %v809_v12  ;;  %v848_v52 = vadd.f32 2.0, %v784_v41  ;;  %1620 = vpow2.f32 %v1896_v7  ;;  %v2097_v7 = vmin.f32 %v1891_v53, 20.0 }
 0x121   : > { %v1607_v47 = vpop.eup %1606  ;;  %v701_v55 = vmul.f32 1.442695, %v2096_v54  ;;  %v921_v27 = vmul.f32 %v1605_v43, %v825_v21  ;;  %1622 = vrcp.f32 %v861_v37  ;;  %v864_v46 = vadd.f32 2.0, %v800_v58 }
 0x122   : > { %v1609_v30 = vpop.eup %1608  ;;  %v908_v59 = vmul.f32 %v1607_v47, %v812_v3  ;;  %1624 = vrcp.f32 %v848_v52  ;;  %v846_v61 = vadd.f32 2.0, %v782_v45  ;;  %v733_v1 = vmul.f32 1.442695, %v2097_v7 }
 0x123   : > { %v924_v57 = vmul.f32 %v1609_v30, %v828_v28  ;;  %1626 = vrcp.f32 %v864_v46  ;;  %v657_v12 = vmin.f32 %v1894_v2, 20.0  ;;  %v1951_v60 = vadd.f32 %v1811_v24, %v1876_v29  ;;  %v1611_v21 = vpop.eup %1610 }
 0x124   : > { %v1345_v4 = vpack.c.bf16 %v908_v59, %v907_v13  ;;  %1628 = vrcp.f32 %v846_v61  ;;  %v1955_v33 = vadd.f32 %v1878_v34, %v1811_v24  ;;  %v1959_v28 = vadd.f32 %v1880_v35, %v1811_v24  ;;  %v1613_v51 = vpop.eup %1612 }
 0x125   : > { %v1385_v3 = vpack.c.bf16 %v924_v57, %v923_v44  ;;  %v906_v11 = vmul.f32 %v1611_v21, %v810_v31  ;;  %1630 = vpow2.f32 %v701_v55  ;;  %v697_v19 = vmul.f32 1.442695, %v657_v12 }
 0x126   : > { %1417 = vst [vmem:[%s1944_s17 + $0x8] sm:$0xff] %v1345_v4   ;;  %v673_v36 = vmin.f32 %v1951_v60, 20.0  ;;  %v922_v29 = vmul.f32 %v1613_v51, %v826_v56  ;;  %1632 = vpow2.f32 %v733_v1  ;;  %v660_v32 = vmin.f32 %v1955_v33, 20.0  ;;  %v1615_v37 = vpop.eup %1614 }
 0x127   : > { %1425 = vst [vmem:[%s1944_s17 + $0x48] sm:$0xff] %v1385_v3   ;;  %v676_v34 = vmin.f32 %v1959_v28, 20.0  ;;  %v1340_v62 = vpack.c.bf16 %v906_v11, %v905_v50  ;;  %v813_v35 = vmul.f32 %v1919_v14, %v1852_v63  ;;  %1634 = vpow2.f32 %v697_v19 }
 0x128   : > { %v729_v31 = vmul.f32 1.442695, %v673_v36  ;;  %v1617_v6 = vpop.eup %1616  ;;  %v1380_v38 = vpack.c.bf16 %v922_v29, %v921_v27  ;;  %v816_v13 = vmul.f32 %v784_v41, %v1860_v5  ;;  %v703_v43 = vmul.f32 1.442695, %v660_v32 }
 0x129   : > { %v735_v44 = vmul.f32 1.442695, %v676_v34  ;;  %v1619_v56 = vpop.eup %1618  ;;  %1341 = vst [vmem:[%s1944_s17] sm:$0xff] %v1340_v62   ;;  %v832_v47 = vmul.f32 %v800_v58, %v1865_v10  ;;  %v1973_v50 = vadd.f32 %v1811_v24, %v1883_v42  ;;  %v1977_v63 = vadd.f32 %v1811_v24, %v1888_v49 }
 0x12a   : > { %1636 = vpow2.f32 %v729_v31  ;;  %v1621_v14 = vpop.eup %1620  ;;  %1424 = vst [vmem:[%s1944_s17 + $0x40] sm:$0xff] %v1380_v38   ;;  %v814_v52 = vmul.f32 %v782_v45, %v1870_v17  ;;  %v1983_v5 = vadd.f32 %v1898_v8, %v1811_v24  ;;  %v1987_v10 = vadd.f32 %v1900_v9, %v1811_v24 }
 0x12b   : > { %1638 = vpow2.f32 %v703_v43  ;;  %v1989_v41 = vpop.eup %1622  ;;  %v766_v42 = vadd.f32 2.0, %v1621_v14  ;;  %v658_v49 = vmin.f32 %v1973_v50, 20.0  ;;  %v674_v58 = vmin.f32 %v1977_v63, 20.0 }
 0x12c   : > { %1640 = vpow2.f32 %v735_v44  ;;  %v1625_v54 = vpop.eup %1624  ;;  %v911_v17 = vmul.f32 %v1615_v37, %v1930_v26  ;;  %v663_v45 = vmin.f32 %v1983_v5, 20.0  ;;  %v679_v8 = vmin.f32 %v1987_v10, 20.0 }
 0x12d   : > { %v1998_v55 = vadd.f32 %v1811_v24, %v1905_v16  ;;  %v1627_v9 = vpop.eup %1626  ;;  %v912_v30 = vmul.f32 %v1625_v54, %v816_v13  ;;  %v798_v27 = vmul.f32 %v1621_v14, %v766_v42  ;;  %v699_v59 = vmul.f32 1.442695, %v658_v49 }
 0x12e   : > { %v2002_v46 = vadd.f32 %v1811_v24, %v1903_v15  ;;  %v1629_v57 = vpop.eup %1628  ;;  %v927_v26 = vmul.f32 %v1617_v6, %v1934_v22  ;;  %v909_v61 = vmul.f32 %v1619_v56, %v813_v35  ;;  %v928_v7 = vmul.f32 %v1627_v9, %v832_v47 }
 0x12f   : > { %v731_v1 = vmul.f32 1.442695, %v674_v58  ;;  %v1631_v4 = vpop.eup %1630  ;;  %v1355_v12 = vpack.c.bf16 %v912_v30, %v911_v17  ;;  %v910_v16 = vmul.f32 %v1629_v57, %v814_v52  ;;  %v862_v21 = vadd.f32 2.0, %v798_v27 }
 0x130   : > { %v709_v3 = vmul.f32 1.442695, %v663_v45  ;;  %v1633_v51 = vpop.eup %1632  ;;  %v1395_v11 = vpack.c.bf16 %v928_v7, %v927_v26  ;;  %v755_v19 = vadd.f32 2.0, %v1631_v4  ;;  %1642 = vpow2.f32 %v699_v59 }
 0x131   : > { %v741_v15 = vmul.f32 1.442695, %v679_v8  ;;  %v1635_v36 = vpop.eup %1634  ;;  %1419 = vst [vmem:[%s1944_s17 + $0x18] sm:$0xff] %v1355_v12   ;;  %v1350_v29 = vpack.c.bf16 %v910_v16, %v909_v61  ;;  %1644 = vrcp.f32 %v862_v21  ;;  %v771_v22 = vadd.f32 2.0, %v1633_v51 }
 0x132   : > { %v661_v32 = vmin.f32 %v2002_v46, 20.0  ;;  %1427 = vst [vmem:[%s1944_s17 + $0x58] sm:$0xff] %v1395_v11   ;;  %v2008_v34 = vmul.f32 %v1631_v4, %v755_v19  ;;  %v753_v37 = vadd.f32 2.0, %v1635_v36  ;;  %1646 = vpow2.f32 %v731_v1 }
 0x133   : > { %1418 = vst [vmem:[%s1944_s17 + $0x10] sm:$0xff] %v1350_v29   ;;  %v2011_v35 = vmul.f32 %v1633_v51, %v771_v22  ;;  %1648 = vpow2.f32 %v709_v3  ;;  %v677_v31 = vmin.f32 %v1998_v55, 20.0  ;;  %v2016_v6 = vadd.f32 %v1908_v23, %v1811_v24 }
 0x134   : > { %v1637_v62 = vpop.eup %1636  ;;  %v851_v13 = vadd.f32 2.0, %v2008_v34  ;;  %v2019_v43 = vmul.f32 %v1635_v36, %v753_v37  ;;  %v2023_v56 = vadd.f32 %v1910_v25, %v1811_v24  ;;  %1650 = vpow2.f32 %v741_v15 }
 0x135   : > { %v1639_v38 = vpop.eup %1638  ;;  %v769_v44 = vadd.f32 2.0, %v1637_v62  ;;  %v867_v14 = vadd.f32 2.0, %v2011_v35  ;;  %v705_v42 = vmul.f32 1.442695, %v661_v32  ;;  %v829_v23 = vmul.f32 %v1921_v20, %v1855_v0 }
 0x136   : > { %v1641_v47 = vpop.eup %1640  ;;  %v756_v52 = vadd.f32 2.0, %v1639_v38  ;;  %1652 = vrcp.f32 %v851_v13  ;;  %v849_v49 = vadd.f32 2.0, %v2019_v43  ;;  %v664_v25 = vmin.f32 %v2016_v6, 20.0 }
 0x137   : > { %v2029_v58 = vmul.f32 %v1637_v62, %v769_v44  ;;  %1654 = vrcp.f32 %v867_v14  ;;  %v772_v17 = vadd.f32 2.0, %v1641_v47  ;;  %v737_v8 = vmul.f32 1.442695, %v677_v31 }
 0x138   : > { %v788_v54 = vmul.f32 %v1639_v38, %v756_v52  ;;  %1656 = vrcp.f32 %v849_v49  ;;  %v680_v9 = vmin.f32 %v2023_v56, 20.0  ;;  %v925_v30 = vmul.f32 %v1989_v41, %v829_v23 }
 0x139   : > { %v865_v45 = vadd.f32 2.0, %v2029_v58  ;;  %v804_v0 = vmul.f32 %v1641_v47, %v772_v17  ;;  %1658 = vpow2.f32 %v705_v42  ;;  %v830_v57 = vmul.f32 %v798_v27, %v1873_v18 }
 0x13a   : > { %v852_v59 = vadd.f32 2.0, %v788_v54  ;;  %v1643_v20 = vpop.eup %1642  ;;  %v711_v26 = vmul.f32 1.442695, %v664_v25  ;;  %v2038_v61 = vadd.f32 %v1811_v24, %v1913_v39  ;;  %v743_v12 = vmul.f32 1.442695, %v680_v9 }
 0x13b   : > { %1660 = vrcp.f32 %v865_v45  ;;  %v1645_v7 = vpop.eup %1644  ;;  %v868_v1 = vadd.f32 2.0, %v804_v0  ;;  %v754_v4 = vadd.f32 2.0, %v1643_v20  ;;  %v2043_v18 = vadd.f32 %v1811_v24, %v1915_v40 }
 0x13c   : > { %1662 = vrcp.f32 %v852_v59  ;;  %v1647_v16 = vpop.eup %1646  ;;  %v926_v21 = vmul.f32 %v1645_v7, %v830_v57  ;;  %v662_v41 = vmin.f32 %v2038_v61, 20.0  ;;  %v819_v44 = vmul.f32 %v2008_v34, %v1886_v48 }
 0x13d   : > { %1664 = vpow2.f32 %v737_v8  ;;  %v1649_v27 = vpop.eup %1648  ;;  %v786_v3 = vmul.f32 %v1643_v20, %v754_v4  ;;  %v770_v39 = vadd.f32 2.0, %v1647_v16  ;;  %v678_v32 = vmin.f32 %v2043_v18, 20.0 }
 0x13e   : > { %1666 = vrcp.f32 %v868_v1  ;;  %v1390_v51 = vpack.c.bf16 %v926_v21, %v925_v30  ;;  %v707_v11 = vmul.f32 1.442695, %v662_v41  ;;  %v1651_v19 = vpop.eup %1650  ;;  %v759_v22 = vadd.f32 2.0, %v1649_v27 }
 0x13f   : > { %1668 = vpow2.f32 %v711_v26  ;;  %v850_v15 = vadd.f32 2.0, %v786_v3  ;;  %v802_v36 = vmul.f32 %v1647_v16, %v770_v39  ;;  %v775_v40 = vadd.f32 2.0, %v1651_v19 }
 0x140   : > { %1670 = vpow2.f32 %v743_v12  ;;  %v1653_v29 = vpop.eup %1652  ;;  %1426 = vst [vmem:[%s1944_s17 + $0x50] sm:$0xff] %v1390_v51   ;;  %v739_v38 = vmul.f32 1.442695, %v678_v32  ;;  %v820_v47 = vmul.f32 %v788_v54, %v1955_v33  ;;  %v2050_v14 = vmul.f32 %v1649_v27, %v759_v22 }
 0x141   : > { %1672 = vpow2.f32 %v707_v11  ;;  %v1655_v37 = vpop.eup %1654  ;;  %v866_v24 = vadd.f32 2.0, %v802_v36  ;;  %v835_v23 = vmul.f32 %v2011_v35, %v1891_v53  ;;  %v2054_v49 = vmul.f32 %v1651_v19, %v775_v40 }
 0x142   : > { %1674 = vrcp.f32 %v850_v15  ;;  %v1657_v62 = vpop.eup %1656  ;;  %v915_v25 = vmul.f32 %v1653_v29, %v819_v44  ;;  %v836_v8 = vmul.f32 %v804_v0, %v1959_v28  ;;  %v855_v59 = vadd.f32 2.0, %v2050_v14 }
 0x143   : > { %v1659_v31 = vpop.eup %1658  ;;  %1676 = vrcp.f32 %v866_v24  ;;  %v931_v34 = vmul.f32 %v1655_v37, %v835_v23  ;;  %v817_v53 = vmul.f32 %v2019_v43, %v1894_v2  ;;  %v833_v35 = vmul.f32 %v2029_v58, %v1951_v60 }
 0x144   : > { %v757_v52 = vadd.f32 2.0, %v1659_v31  ;;  %1678 = vpow2.f32 %v739_v38  ;;  %v871_v26 = vadd.f32 2.0, %v2054_v49  ;;  %v818_v1 = vmul.f32 %v786_v3, %v1973_v50 }
 0x145   : > { %v1661_v13 = vpop.eup %1660  ;;  %v913_v21 = vmul.f32 %v1657_v62, %v817_v53  ;;  %v834_v41 = vmul.f32 %v802_v36, %v1977_v63  ;;  %1680 = vrcp.f32 %v855_v59  ;;  %v823_v38 = vmul.f32 %v2050_v14, %v1983_v5 }
 0x146   : > { %v1663_v42 = vpop.eup %1662  ;;  %v789_v9 = vmul.f32 %v1659_v31, %v757_v52  ;;  %v929_v51 = vmul.f32 %v1661_v13, %v833_v35  ;;  %1682 = vrcp.f32 %v871_v26 }
 0x147   : > { %v1665_v17 = vpop.eup %1664  ;;  %v916_v45 = vmul.f32 %v1663_v42, %v820_v47  ;;  %v839_v47 = vmul.f32 %v2054_v49, %v1987_v10 }
 0x148   : > { %v1667_v48 = vpop.eup %1666  ;;  %v773_v20 = vadd.f32 2.0, %v1665_v17  ;;  %v853_v4 = vadd.f32 2.0, %v789_v9 }
 0x149   : > { %v1669_v33 = vpop.eup %1668  ;;  %v1365_v54 = vpack.c.bf16 %v916_v45, %v915_v25  ;;  %v932_v30 = vmul.f32 %v1667_v48, %v836_v8 }
 0x14a   : > { %v1671_v57 = vpop.eup %1670  ;;  %v760_v28 = vadd.f32 2.0, %v1669_v33  ;;  %v805_v60 = vmul.f32 %v1665_v17, %v773_v20  ;;  %1684 = vrcp.f32 %v853_v4  ;;  %v821_v17 = vmul.f32 %v789_v9, %v2002_v46 }
 0x14b   : > { %v1673_v0 = vpop.eup %1672  ;;  %1421 = vst [vmem:[%s1944_s17 + $0x28] sm:$0xff] %v1365_v54   ;;  %v1405_v7 = vpack.c.bf16 %v932_v30, %v931_v34  ;;  %v776_v12 = vadd.f32 2.0, %v1671_v57 }
 0x14c   : > { %v1675_v16 = vpop.eup %1674  ;;  %v792_v27 = vmul.f32 %v1669_v33, %v760_v28  ;;  %v758_v39 = vadd.f32 2.0, %v1673_v0  ;;  %v869_v22 = vadd.f32 2.0, %v805_v60  ;;  %v837_v49 = vmul.f32 %v805_v60, %v1998_v55 }
 0x14d   : > { %1429 = vst [vmem:[%s1944_s17 + $0x68] sm:$0xff] %v1405_v7   ;;  %v914_v2 = vmul.f32 %v1675_v16, %v818_v1  ;;  %v808_v43 = vmul.f32 %v1671_v57, %v776_v12  ;;  %v1677_v58 = vpop.eup %1676 }
 0x14e   : > { %v856_v11 = vadd.f32 2.0, %v792_v27  ;;  %v790_v50 = vmul.f32 %v1673_v0, %v758_v39  ;;  %v930_v19 = vmul.f32 %v1677_v58, %v834_v41  ;;  %v1679_v29 = vpop.eup %1678  ;;  %v824_v13 = vmul.f32 %v792_v27, %v2016_v6 }
 0x14f   : > { %v1360_v3 = vpack.c.bf16 %v914_v2, %v913_v21  ;;  %v872_v15 = vadd.f32 2.0, %v808_v43  ;;  %v774_v32 = vadd.f32 2.0, %v1679_v29  ;;  %v1681_v40 = vpop.eup %1680  ;;  %v840_v52 = vmul.f32 %v808_v43, %v2023_v56 }
 0x150   : > { %1686 = vrcp.f32 %v856_v11  ;;  %v854_v63 = vadd.f32 2.0, %v790_v50  ;;  %v1400_v36 = vpack.c.bf16 %v930_v19, %v929_v51  ;;  %v1683_v62 = vpop.eup %1682  ;;  %v919_v23 = vmul.f32 %v1681_v40, %v823_v38 }
 0x151   : > { %1420 = vst [vmem:[%s1944_s17 + $0x20] sm:$0xff] %v1360_v3   ;;  %1688 = vrcp.f32 %v872_v15  ;;  %v806_v37 = vmul.f32 %v1679_v29, %v774_v32  ;;  %v822_v45 = vmul.f32 %v790_v50, %v2038_v61  ;;  %v935_v5 = vmul.f32 %v1683_v62, %v839_v47 }
 0x152   : > { %1690 = vrcp.f32 %v854_v63  ;;  %1428 = vst [vmem:[%s1944_s17 + $0x60] sm:$0xff] %v1400_v36  }
 0x153   : > { %1692 = vrcp.f32 %v869_v22  ;;  %v870_v24 = vadd.f32 2.0, %v806_v37  ;;  %v838_v46 = vmul.f32 %v806_v37, %v2043_v18 }
 0x154   : > { %v1685_v31 = vpop.eup %1684 }
 0x155   : > { %1694 = vrcp.f32 %v870_v24  ;;  %v917_v6 = vmul.f32 %v1685_v31, %v821_v17 }
 0x15a   : > { %v1687_v44 = vpop.eup %1686 }
 0x15b   : > { %v1689_v42 = vpop.eup %1688  ;;  %v920_v25 = vmul.f32 %v1687_v44, %v824_v13 }
 0x15c   : > { %v1691_v8 = vpop.eup %1690  ;;  %v936_v14 = vmul.f32 %v1689_v42, %v840_v52 }
 0x15d   : > { %v1375_v48 = vpack.c.bf16 %v920_v25, %v919_v23  ;;  %v918_v34 = vmul.f32 %v1691_v8, %v822_v45  ;;  %v1693_v10 = vpop.eup %1692 }
 0x15e   : > { %v1415_v33 = vpack.c.bf16 %v936_v14, %v935_v5  ;;  %v933_v54 = vmul.f32 %v1693_v10, %v837_v49 }
 0x15f   : > { %1423 = vst [vmem:[%s1944_s17 + $0x38] sm:$0xff] %v1375_v48   ;;  %v1370_v56 = vpack.c.bf16 %v918_v34, %v917_v6  ;;  %v1695_v9 = vpop.eup %1694 }
 0x160   : > { %1431 = vst [vmem:[%s1944_s17 + $0x78] sm:$0xff] %v1415_v33   ;;  %v934_v61 = vmul.f32 %v1695_v9, %v838_v46 }
 0x161   : > { %1422 = vst [vmem:[%s1944_s17 + $0x30] sm:$0xff] %v1370_v56  }
 0x162   : > { %v1410_v30 = vpack.c.bf16 %v934_v61, %v933_v54 }
 0x164   : > { %1430 = vst [vmem:[%s1944_s17 + $0x70] sm:$0xff] %v1410_v30  }
 0x165 PF: > { %s13_s14 = sadd.s32 1, %s1718_s14   ;;  %s2098_s12 = smov %s1714_s13 }
 0x166   : > { %p10_p5 = scmp.ge.s32.totalorder %s13_s14, 4   ;;  %s2099_s13 = smov %s2101_s15 }
 0x168   :  { %12 = sbr.rel (!%p10_p5) target bundleno = 2 (0x2), region = 68 }

// kernel: a_call__.4
= control target key start
LH: loop header
LB: loop body
LE: loop exit
PB: predicated region body
PF: predicated region fallthrough
CT: control target
= control target key end

     0   :  { %s3439_s12 = smov 0   ;;  %s3441_s13 = smov 0   ;;  %s4014_s0 = inlined_call_operand.vmem [shape: bf16[2,1,18,16,384], index: 0, kind: input, shape index: {}]   ;;  %s4015_s1 = inlined_call_operand.vmem [shape: bf16[3,384,128], index: 1, kind: input, shape index: {}]   ;;  %s4016_s2 = inlined_call_operand.vmem [shape: f32[1,128], index: 2, kind: input, shape index: {}]   ;;  %s4017_s3 = inlined_call_operand.vmem [shape: bf16[2,8,16,128], index: 3, kind: output, shape index: {}]  }
   0x1   :  { %s3443_s14 = smov 0  }
   0x2 LB: > { %s28_s15 = sadd.s32 1, %s3413_s13  ;;  %p2320_p0 = scmp.ge.s32.totalorder %s3417_s14, 1  ;;  %s3417_s14 = sphi %s3443_s14, %s13_s14   ;;  %s3413_s13 = sphi %s3441_s13, %s4019_s13   ;;  %s3409_s12 = sphi %s3439_s12, %s4018_s12  }
   0x3   : > { %p30_p1 = scmp.ge.s32.totalorder %s28_s15, 2  ;;  %p183_p2 = scmp.lt.s32.totalorder %s3417_s14, 3 }
   0x5   : > { %s4021_s15 = smov (%p30_p1, %s28_s15), 0  ;;  %p184_p3 = pnand %p2320_p0, %p183_p2 }
   0x6   : > { %v3184_v0 = vld [vmem:[%s4015_s1 + $0x40] sm:$0xff] (!%p184_p3)   ;;  %v3187_v3 = vld [vmem:[%s4015_s1 + $0x48] sm:$0xff] (!%p184_p3)   ;;  %v3190_v6 = vld [vmem:[%s4015_s1 + $0x50] sm:$0xff] (!%p184_p3)   ;;  %p226_p4 = scmp.lt.s32.totalorder (!%p184_p3), %s3409_s12, 1 }
   0x7   : > { %187 = sbr.rel (%p184_p3) target bundleno = 448 (0x1c0), region = 32  ;;  %v3185_v1 = vld [vmem:[%s4015_s1 + $0x80] sm:$0xff] (!%p184_p3)   ;;  %2711 = vmatprep.subr.bf16.mxu0 (!%p184_p3), %v3184_v0  ;;  %v3188_v4 = vld [vmem:[%s4015_s1 + $0x88] sm:$0xff] (!%p184_p3)   ;;  %v3191_v7 = vld [vmem:[%s4015_s1 + $0x90] sm:$0xff] (!%p184_p3)  }
   0x8   : > { %v3186_v2 = vld [vmem:[%s4015_s1] sm:$0xff] (!%p184_p3)   ;;  %2951 = vmatprep.subr.bf16.mxu1 (!%p184_p3), %v3185_v1  ;;  %v3189_v5 = vld [vmem:[%s4015_s1 + $0x8] sm:$0xff] (!%p184_p3)   ;;  %v3192_v8 = vld [vmem:[%s4015_s1 + $0x10] sm:$0xff] (!%p184_p3)  }
   0x9   : > { %2712 = vmatpush3.bf16.msra.mxu0 (!%p184_p3), %v3186_v2  ;;  %2952 = vmatpush3.bf16.msra.mxu1 (!%p184_p3), %v3185_v1  ;;  %v3193_v9 = vld [vmem:[%s4015_s1 + $0x58] sm:$0xff] (!%p184_p3)   ;;  %v3196_v12 = vld [vmem:[%s4015_s1 + $0x60] sm:$0xff] (!%p184_p3)   ;;  %v3199_v15 = vld [vmem:[%s4015_s1 + $0x68] sm:$0xff] (!%p184_p3)  }
   0xa   : > { %2713 = vmatprep.subr.bf16.mxu0 (!%p184_p3), %v3187_v3  ;;  %2953 = vmatprep.subr.bf16.mxu1 (!%p184_p3), %v3188_v4  ;;  %v3194_v10 = vld [vmem:[%s4015_s1 + $0x98] sm:$0xff] (!%p184_p3)   ;;  %v3197_v13 = vld [vmem:[%s4015_s1 + $0xa0] sm:$0xff] (!%p184_p3)   ;;  %v3200_v16 = vld [vmem:[%s4015_s1 + $0xa8] sm:$0xff] (!%p184_p3)  }
   0xb   : > { %v3195_v11 = vld [vmem:[%s4015_s1 + $0x18] sm:$0xff] (!%p184_p3)   ;;  %v3198_v14 = vld [vmem:[%s4015_s1 + $0x20] sm:$0xff] (!%p184_p3)   ;;  %v3201_v17 = vld [vmem:[%s4015_s1 + $0x28] sm:$0xff] (!%p184_p3)  }
   0xc   : > { %v3202_v18 = vld [vmem:[%s4015_s1 + $0x70] sm:$0xff] (!%p184_p3)   ;;  %v3205_v21 = vld [vmem:[%s4015_s1 + $0x78] sm:$0xff] (!%p184_p3)   ;;  %v3213_v26 = vld [vmem:[%s4015_s1 + $0x100] sm:$0xff] (!%p184_p3)  }
   0xd   : > { %2714 = vmatpush3.bf16.msra.mxu0 (!%p184_p3), %v3189_v5  ;;  %2954 = vmatpush3.bf16.msra.mxu1 (!%p184_p3), %v3188_v4  ;;  %v3203_v19 = vld [vmem:[%s4015_s1 + $0xb0] sm:$0xff] (!%p184_p3)   ;;  %v3206_v22 = vld [vmem:[%s4015_s1 + $0xb8] sm:$0xff] (!%p184_p3)   ;;  %v3214_v28 = vld [vmem:[%s4015_s1 + $0x1c0] sm:$0xff] (!%p184_p3)  }
   0xe   : > { %2715 = vmatprep.subr.bf16.mxu0 %v3190_v6  ;;  %2955 = vmatprep.subr.bf16.mxu1 %v3191_v7  ;;  %s4023_s12 = smov (!%p226_p4, %s3409_s12), 1  ;;  %v3204_v20 = vld [vmem:[%s4015_s1 + $0x30] sm:$0xff]   ;;  %v3207_v25 = vld [vmem:[%s4015_s1 + $0x38] sm:$0xff]   ;;  %v3215_v30 = vld [vmem:[%s4015_s1 + $0xc0] sm:$0xff]  }
   0xf   : > { %s3159_s27 = smul.u32 432, %s4023_s12  ;;  %v3216_v31 = vld [vmem:[%s4015_s1 + $0x180] sm:$0xff]   ;;  %v3217_v32 = vld [vmem:[%s4015_s1 + $0x108] sm:$0xff]   ;;  %v3224_v38 = vld [vmem:[%s4015_s1 + $0x110] sm:$0xff]   ;;  %s2647_s4 = sshll.u32 %s4023_s12, 6 }
  0x10   : > { %v3218_v35 = vld [vmem:[%s4015_s1 + $0xc8] sm:$0xff]   ;;  %v3226_v40 = vld [vmem:[%s4015_s1 + $0xd0] sm:$0xff]   ;;  %v3228_v42 = vld [vmem:[%s4015_s1 + $0x118] sm:$0xff]   ;;  %s3978_s6 = scalar_lea.vmem %s4017_s3, %s2647_s4 }
  0x11   : > { %2716 = vmatpush3.bf16.msra.mxu0 %v3192_v8  ;;  %2956 = vmatpush3.bf16.msra.mxu1 %v3191_v7  ;;  %s3530_s11 = scalar_lea.vmem %s4014_s0, %s3159_s27  ;;  %v3225_v39 = vld [vmem:[%s4015_s1 + $0x1c8] sm:$0xff]   ;;  %v3229_v44 = vld [vmem:[%s4015_s1 + $0xd8] sm:$0xff]   ;;  %v3235_v48 = vld [vmem:[%s4015_s1 + $0x120] sm:$0xff]  }
  0x12   : > { %2717 = vmatprep.subr.bf16.mxu0 %v3193_v9  ;;  %2957 = vmatprep.subr.bf16.mxu1 %v3194_v10  ;;  %v3210_v23 = vld [vmem:[%s3530_s11 + $0x4] ss:$12 sps:$4 sm:$0xff]   ;;  %v3211_v24 = vld [vmem:[%s3530_s11 + $0x8] ss:$12 sps:$4 sm:$0xff]   ;;  %v3208_v27 = vld [vmem:[%s3530_s11] ss:$12 sps:$4 sm:$0xff]  }
  0x13   : > { %642 = vmatprep.mubr.bf16.mxu0 %v3210_v23  ;;  %2967 = vmatprep.mubr.bf16.mxu1 %v3211_v24  ;;  %v3212_v29 = vld [vmem:[%s3530_s11 + $0x20] ss:$12 sps:$4 sm:$0xff]   ;;  %v3561_v33 = vld [vmem:[%s3530_s11 + $0x1c] ss:$12 sps:$4 sm:$0xff]   ;;  %v3221_v34 = vld [vmem:[%s3530_s11 + $0x38] ss:$12 sps:$4 sm:$0xff]  }
  0x14   : > { %v3569_v36 = vld [vmem:[%s3530_s11 + $0x18] ss:$12 sps:$4 sm:$0xff]   ;;  %v3223_v37 = vld [vmem:[%s3530_s11 + $0x50] ss:$12 sps:$4 sm:$0xff]   ;;  %v3227_v41 = vld [vmem:[%s4015_s1 + $0x188] sm:$0xff]  }
  0x15   : > { %2718 = vmatpush3.bf16.msra.mxu0 %v3195_v11  ;;  %2958 = vmatpush3.bf16.msra.mxu1 %v3194_v10  ;;  %v3589_v43 = vld [vmem:[%s3530_s11 + $0x34] ss:$12 sps:$4 sm:$0xff]   ;;  %v3597_v46 = vld [vmem:[%s3530_s11 + $0x30] ss:$12 sps:$4 sm:$0xff]   ;;  %v3239_v52 = vld [vmem:[%s4015_s1 + $0x128] sm:$0xff]  }
  0x16   : > { %2719 = vmatprep.subr.bf16.mxu0 %v3196_v12  ;;  %2959 = vmatprep.subr.bf16.mxu1 %v3197_v13  ;;  %v3232_v45 = vld [vmem:[%s3530_s11 + $0x68] ss:$12 sps:$4 sm:$0xff]   ;;  %v3234_v47 = vld [vmem:[%s3530_s11 + $0x80] ss:$12 sps:$4 sm:$0xff]   ;;  %v3243_v55 = vld [vmem:[%s3530_s11 + $0x98] ss:$12 sps:$4 sm:$0xff]  }
  0x17   : > { %v3236_v49 = vld [vmem:[%s4015_s1 + $0x1d0] sm:$0xff]   ;;  %v3237_v50 = vld [vmem:[%s4015_s1 + $0xe0] sm:$0xff]   ;;  %v3240_v53 = vld [vmem:[%s4015_s1 + $0xe8] sm:$0xff]  }
  0x18   : > { %v3238_v51 = vld [vmem:[%s4015_s1 + $0x190] sm:$0xff]   ;;  %v3620_v54 = vld [vmem:[%s3530_s11 + $0x4c] ss:$12 sps:$4 sm:$0xff]   ;;  %v3256_v2 = vld [vmem:[%s3530_s11 + $0xdc] ss:$12 sps:$4 sm:$0xff]  }
  0x19   : > { %2720 = vmatpush3.bf16.msra.mxu0 %v3198_v14  ;;  %2960 = vmatpush3.bf16.msra.mxu1 %v3197_v13  ;;  %v3625_v56 = vld [vmem:[%s3530_s11 + $0x48] ss:$12 sps:$4 sm:$0xff]   ;;  %v3245_v57 = vld [vmem:[%s3530_s11 + $0xb0] ss:$12 sps:$4 sm:$0xff]   ;;  %v3254_v1 = vld [vmem:[%s3530_s11 + $0xd8] ss:$12 sps:$4 sm:$0xff]  }
  0x1a   : > { %2721 = vmatprep.subr.bf16.mxu0 %v3199_v15  ;;  %2961 = vmatprep.subr.bf16.mxu1 %v3200_v16  ;;  %v3246_v58 = vld [vmem:[%s4015_s1 + $0x130] sm:$0xff]   ;;  %v3247_v59 = vld [vmem:[%s4015_s1 + $0x1d8] sm:$0xff]   ;;  %v3653_v3 = vld [vmem:[%s3530_s11 + $0x60] ss:$12 sps:$4 sm:$0xff]  }
  0x1b   : > { %v3248_v60 = vld [vmem:[%s4015_s1 + $0xf0] sm:$0xff]   ;;  %v3249_v61 = vld [vmem:[%s4015_s1 + $0x198] sm:$0xff]   ;;  %v3258_v4 = vld [vmem:[%s4015_s1 + $0x140] sm:$0xff]  }
  0x1c   : > { %v3250_v62 = vld [vmem:[%s4015_s1 + $0x138] sm:$0xff]   ;;  %v3648_v0 = vld [vmem:[%s3530_s11 + $0x64] ss:$12 sps:$4 sm:$0xff]   ;;  %v3263_v8 = vld [vmem:[%s3530_s11 + $0xf4] ss:$12 sps:$4 sm:$0xff]  }
  0x1d   : > { %2722 = vmatpush3.bf16.msra.mxu0 %v3201_v17  ;;  %2962 = vmatpush3.bf16.msra.mxu1 %v3200_v16  ;;  %v3251_v63 = vld [vmem:[%s4015_s1 + $0xf8] sm:$0xff]   ;;  %v3259_v5 = vld [vmem:[%s4015_s1 + $0x1e0] sm:$0xff]   ;;  %v3267_v11 = vld [vmem:[%s4015_s1 + $0x148] sm:$0xff]  }
  0x1e   : > { %2723 = vmatprep.subr.bf16.mxu0 %v3202_v18  ;;  %2963 = vmatprep.subr.bf16.mxu1 %v3203_v19  ;;  %v3260_v6 = vld [vmem:[%s4015_s1 + $0x1a0] sm:$0xff]   ;;  %v3667_v7 = vld [vmem:[%s3530_s11 + $0x7c] ss:$12 sps:$4 sm:$0xff]   ;;  %v3272_v15 = vld [vmem:[%s3530_s11 + $0x10c] ss:$12 sps:$4 sm:$0xff]  }
  0x1f   : > { %v3672_v9 = vld [vmem:[%s3530_s11 + $0x78] ss:$12 sps:$4 sm:$0xff]   ;;  %v3266_v10 = vld [vmem:[%s3530_s11 + $0xf0] ss:$12 sps:$4 sm:$0xff]   ;;  %v3268_v12 = vld [vmem:[%s4015_s1 + $0x1e8] sm:$0xff]  }
  0x20   : > { %v3269_v13 = vld [vmem:[%s4015_s1 + $0x1a8] sm:$0xff]   ;;  %v3685_v14 = vld [vmem:[%s3530_s11 + $0x94] ss:$12 sps:$4 sm:$0xff]   ;;  %v3694_v17 = vld [vmem:[%s3530_s11 + $0x90] ss:$12 sps:$4 sm:$0xff]  }
  0x21   : > { %2724 = vmatpush3.bf16.msra.mxu0 %v3204_v20  ;;  %2964 = vmatpush3.bf16.msra.mxu1 %v3203_v19  ;;  %v3276_v16 = vld [vmem:[%s4015_s1 + $0x150] sm:$0xff]   ;;  %v3285_v23 = vld [vmem:[%s4015_s1 + $0x158] sm:$0xff]  }
  0x22   : > { %2725 = vmatprep.subr.bf16.mxu0 %v3205_v21  ;;  %2965 = vmatprep.subr.bf16.mxu1 %v3206_v22  ;;  %v3277_v18 = vld [vmem:[%s4015_s1 + $0x1f0] sm:$0xff]   ;;  %v3704_v21 = vld [vmem:[%s3530_s11 + $0xac] ss:$12 sps:$4 sm:$0xff]  }
  0x23   : > { %v3278_v19 = vld [vmem:[%s4015_s1 + $0x1b0] sm:$0xff]   ;;  %v3286_v24 = vld [vmem:[%s4015_s1 + $0x1f8] sm:$0xff]  }
  0x24   : > { %v3275_v20 = vld [vmem:[%s3530_s11 + $0x108] ss:$12 sps:$4 sm:$0xff]  }
  0x25   : > { %2726 = vmatpush3.bf16.msra.mxu0 %v3207_v25  ;;  %2966 = vmatpush3.bf16.msra.mxu1 %v3206_v22  ;;  %v3281_v22 = vld [vmem:[%s3530_s11 + $0x124] ss:$12 sps:$4 sm:$0xff]   ;;  %v3287_v25 = vld [vmem:[%s4015_s1 + $0x1b8] sm:$0xff]  }
  0x26   : > { %2791 = vmatprep.subr.bf16.mxu1 %v3213_v26  ;;  %2871 = vmatprep.subr.bf16.mxu0 %v3214_v28  ;;  %v3719_v26 = vld [vmem:[%s3530_s11 + $0xa8] ss:$12 sps:$4 sm:$0xff]   ;;  %v3291_v28 = vld [vmem:[%s4015_s1 + $0x160] sm:$0xff]  }
  0x28   : > { %643 = vmatmul.mubr.bf16.vlgmr.msra.gmra.mrb[0].mxu0 %v3208_v27  ;;  %2968 = vmatmul.mubr.bf16.vlgmr.msra.gmra.mrb[0].mxu1 %v3212_v29  ;;  %v3284_v27 = vld [vmem:[%s3530_s11 + $0x120] ss:$12 sps:$4 sm:$0xff]  }
  0x29   : > { %2792 = vmatpush3.bf16.msra.mxu1 %v3215_v30  ;;  %2872 = vmatpush3.bf16.msra.mxu0 %v3216_v31  ;;  %v3728_v29 = vld [vmem:[%s4015_s1 + $0x200] sm:$0xff]   ;;  %v3288_v30 = vld [vmem:[%s3530_s11 + $0x13c] ss:$12 sps:$4 sm:$0xff]  }
  0x2a   : > { %2793 = vmatprep.subr.bf16.mxu1 %v3217_v32  ;;  %650 = vmatprep.mubr.bf16.mxu0 %v3561_v33  ;;  %v3296_v31 = vld [vmem:[%s4015_s1 + $0x168] sm:$0xff]   ;;  %v3301_v32 = vld [vmem:[%s4015_s1 + $0x170] sm:$0xff]  }
  0x2b   : > { %2971 = vmatprep.mubr.bf16.mxu1 %v3221_v34  ;;  %2873 = vmatprep.subr.bf16.mxu0 %v3225_v39  ;;  %v3290_v34 = vld [vmem:[%s3530_s11 + $0x138] ss:$12 sps:$4 sm:$0xff]   ;;  %v3295_v39 = vld [vmem:[%s3530_s11 + $0x150] ss:$12 sps:$4 sm:$0xff]  }
  0x2d   : > { %2794 = vmatpush3.bf16.msra.mxu1 %v3218_v35  ;;  %2874 = vmatpush3.bf16.msra.mxu0 %v3227_v41  ;;  %v3293_v35 = vld [vmem:[%s3530_s11 + $0x154] ss:$12 sps:$4 sm:$0xff]  }
  0x2e   : > { %2795 = vmatprep.subr.bf16.mxu1 %v3224_v38  ;;  %2875 = vmatprep.subr.bf16.mxu0 %v3236_v49  ;;  %v3302_v38 = vld [vmem:[%s4015_s1 + $0x210] sm:$0xff]   ;;  %v3310_v41 = vld [vmem:[%s4015_s1 + $0x220] sm:$0xff]  }
  0x2f   : > { %v3309_v49 = vld [vmem:[%s3530_s11 + $0xf8] ss:$12 sps:$4 sm:$0xff]  }
  0x30   : > { %651 = vmatmul.mubr.bf16.gmra.mrb[4].mxu0 %v3569_v36  ;;  %2972 = vmatmul.mubr.bf16.gmra.mrb[4].mxu1 %v3223_v37  ;;  %v3297_v37 = vld [vmem:[%s4015_s1 + $0x208] sm:$0xff]  }
  0x31   : > { %2796 = vmatpush3.bf16.msra.mxu1 %v3226_v40  ;;  %658 = vmatprep.mubr.bf16.mxu0 %v3589_v43  ;;  %v3298_v40 = vld [vmem:[%s3530_s11 + $0x16c] ss:$12 sps:$4 sm:$0xff]  }
  0x32   : > { %2797 = vmatprep.subr.bf16.mxu1 %v3228_v42  ;;  %2975 = vmatprep.mubr.bf16.mxu1 %v3232_v45  ;;  %v3300_v42 = vld [vmem:[%s3530_s11 + $0x168] ss:$12 sps:$4 sm:$0xff]  }
  0x33   : > { %2876 = vmatpush3.bf16.msra.mxu0 %v3238_v51  ;;  %v3316_v45 = vld [vmem:[%s4015_s1 + $0x230] sm:$0xff]  }
  0x34   : > { %2877 = vmatprep.subr.bf16.mxu0 %v3247_v59  ;;  %v3312_v51 = vld [vmem:[%s3530_s11 + $0x128] ss:$12 sps:$4 sm:$0xff]   ;;  %v3324_v59 = vld [vmem:[%s3530_s11 + $0x80] ss:$12 sps:$4 sm:$0xff]  }
  0x35   : > { %2798 = vmatpush3.bf16.msra.mxu1 %v3229_v44  ;;  %v3313_v44 = vld [vmem:[%s4015_s1 + $0x228] sm:$0xff]  }
  0x36   : > { %2799 = vmatprep.subr.bf16.mxu1 %v3235_v48  ;;  %v3322_v48 = vld [vmem:[%s4015_s1 + $0x238] sm:$0xff]  }
  0x37   : > { %2878 = vmatpush3.bf16.msra.mxu0 %v3249_v61  ;;  %v3326_v61 = vld [vmem:[%s3530_s11 + $0x98] ss:$12 sps:$4 sm:$0xff]  }
  0x38   : > { %659 = vmatmul.mubr.bf16.gmra.mrb[8].mxu0 %v3597_v46  ;;  %2976 = vmatmul.mubr.bf16.gmra.mrb[8].mxu1 %v3234_v47  ;;  %v3308_v47 = vld [vmem:[%s3530_s11 + $0xe0] ss:$12 sps:$4 sm:$0xff]  }
  0x39   : > { %2800 = vmatpush3.bf16.msra.mxu1 %v3237_v50  ;;  %666 = vmatprep.mubr.bf16.mxu0 %v3620_v54  ;;  %v3311_v50 = vld [vmem:[%s3530_s11 + $0x110] ss:$12 sps:$4 sm:$0xff]  }
  0x3a   : > { %2801 = vmatprep.subr.bf16.mxu1 %v3239_v52  ;;  %2979 = vmatprep.mubr.bf16.mxu1 %v3243_v55  ;;  %v3314_v52 = vld [vmem:[%s3530_s11 + $0x140] ss:$12 sps:$4 sm:$0xff]   ;;  %v3318_v55 = vld [vmem:[%s3530_s11 + $0xc4] ss:$12 sps:$4 sm:$0xff]  }
  0x3b   : > { %2879 = vmatprep.subr.bf16.mxu0 %v3259_v5 }
  0x3c   : > { %2880 = vmatpush3.bf16.msra.mxu0 %v3260_v6 }
  0x3d   : > { %2802 = vmatpush3.bf16.msra.mxu1 %v3240_v53  ;;  %2881 = vmatprep.subr.bf16.mxu0 %v3268_v12  ;;  %v3315_v53 = vld [vmem:[%s3530_s11 + $0x158] ss:$12 sps:$4 sm:$0xff]  }
  0x3e   : > { %2803 = vmatprep.subr.bf16.mxu1 %v3246_v58  ;;  %v3323_v58 = vld [vmem:[%s3530_s11 + $0x20] ss:$12 sps:$4 sm:$0xff]  }
  0x40   : > { %667 = vmatmul.mubr.bf16.gmra.mrb[12].mxu0 %v3625_v56  ;;  %2980 = vmatmul.mubr.bf16.gmra.mrb[12].mxu1 %v3245_v57  ;;  %v3321_v57 = vld [vmem:[%s3530_s11 + $0xc0] ss:$12 sps:$4 sm:$0xff]  }
  0x41   : > { %2804 = vmatpush3.bf16.msra.mxu1 %v3248_v60  ;;  %674 = vmatprep.mubr.bf16.mxu0 %v3648_v0  ;;  %v3325_v60 = vld [vmem:[%s3530_s11 + $0x38] ss:$12 sps:$4 sm:$0xff]  }
  0x42   : > { %2805 = vmatprep.subr.bf16.mxu1 %v3250_v62  ;;  %1212 = vmatprep.mubr.bf16.mxu1 %v3256_v2  ;;  %v3327_v62 = vld [vmem:[%s3530_s11 + $0x50] ss:$12 sps:$4 sm:$0xff]  }
  0x43   : > { %2882 = vmatpush3.bf16.msra.mxu0 %v3269_v13 }
  0x44   : > { %2883 = vmatprep.subr.bf16.mxu0 %v3277_v18 }
  0x45   : > { %2806 = vmatpush3.bf16.msra.mxu1 %v3251_v63  ;;  %v3328_v63 = vld [vmem:[%s3530_s11 + $0xb0] ss:$12 sps:$4 sm:$0xff]  }
  0x46   : > { %2983 = vmatprep.subr.bf16.mxu1 %v3258_v4 }
  0x47   : > { %2884 = vmatpush3.bf16.msra.mxu0 %v3278_v19 }
  0x48   : > { %675 = vmatmul.mubr.bf16.gmra.mrb[16].mxu0 %v3653_v3  ;;  %1213 = vmatmul.mubr.bf16.vlgmr.msra.gmra.mrb[16].mxu1 %v3254_v1  ;;  %v3330_v1 = vld [vmem:[%s3530_s11 + $0xc8] ss:$12 sps:$4 sm:$0xff]  }
  0x49   : > { %2984 = vmatpush3.bf16.msra.mxu1 %v3258_v4  ;;  %682 = vmatprep.mubr.bf16.mxu0 %v3667_v7 }
  0x4a   : > { %1220 = vmatprep.mubr.bf16.mxu1 %v3263_v8  ;;  %2985 = vmatprep.subr.bf16.mxu1 %v3267_v11 }
  0x4b   : > { %2885 = vmatprep.subr.bf16.mxu0 %v3286_v24 }
  0x4c   : > { %2886 = vmatpush3.bf16.msra.mxu0 %v3287_v25 }
  0x4d   : > { %2986 = vmatpush3.bf16.msra.mxu1 %v3267_v11  ;;  %3015 = vmatprep.subr.bf16.mxu0 %v3728_v29 }
  0x4e   : > { %2987 = vmatprep.subr.bf16.mxu1 %v3276_v16 }
  0x50   : > { %683 = vmatmul.mubr.bf16.gmra.mrb[20].mxu0 %v3672_v9  ;;  %1221 = vmatmul.mubr.bf16.gmra.mrb[20].mxu1 %v3266_v10 }
  0x51   : > { %690 = vmatprep.mubr.bf16.mxu0 %v3685_v14  ;;  %1228 = vmatprep.mubr.bf16.mxu1 %v3272_v15 }
  0x52   : > { %2988 = vmatpush3.bf16.msra.mxu1 %v3276_v16 }
  0x53   : > { %2989 = vmatprep.subr.bf16.mxu1 %v3285_v23 }
  0x56   : > { %2990 = vmatpush3.bf16.msra.mxu1 %v3285_v23 }
  0x57   : > { %2991 = vmatprep.subr.bf16.mxu1 %v3291_v28 }
  0x58   : > { %691 = vmatmul.mubr.bf16.gmra.mrb[24].mxu0 %v3694_v17  ;;  %1229 = vmatmul.mubr.bf16.gmra.mrb[24].mxu1 %v3275_v20 }
  0x59   : > { %698 = vmatprep.mubr.bf16.mxu0 %v3704_v21  ;;  %1236 = vmatprep.mubr.bf16.mxu1 %v3281_v22 }
  0x5a   : > { %2992 = vmatpush3.bf16.msra.mxu1 %v3291_v28 }
  0x5b   : > { %2993 = vmatprep.subr.bf16.mxu1 %v3296_v31 }
  0x5e   : > { %2994 = vmatpush3.bf16.msra.mxu1 %v3296_v31 }
  0x5f   : > { %2995 = vmatprep.subr.bf16.mxu1 %v3301_v32 }
  0x60   : > { %699 = vmatmul.mubr.bf16.gmra.mrb[28].mxu0 %v3719_v26  ;;  %1237 = vmatmul.mubr.bf16.gmra.mrb[28].mxu1 %v3284_v27 }
  0x61   : > { %1244 = vmatprep.mubr.bf16.mxu1 %v3288_v30  ;;  %1776 = vmatprep.mubr.bf16.mxu0 %v3561_v33  ;;  %v3306_v33 = vld [vmem:[%s4015_s1 + $0x178] sm:$0xff]  }
  0x62   : > { %2996 = vmatpush3.bf16.msra.mxu1 %v3301_v32 }
  0x63   : > { %2997 = vmatprep.subr.bf16.mxu1 %v3306_v33 }
  0x66   : > { %2998 = vmatpush3.bf16.msra.mxu1 %v3306_v33 }
  0x67   : > { %3047 = vmatprep.subr.bf16.mxu1 %v3728_v29 }
  0x68   : > { %1245 = vmatmul.mubr.bf16.gmra.mrb[32].mxu1 %v3290_v34  ;;  %1777 = vmatmul.mubr.bf16.vlgmr.msra.gmra.mrb[32].mxu0 %v3569_v36  ;;  %v3307_v36 = vld [vmem:[%s4015_s1 + $0x218] sm:$0xff]  }
  0x69   : > { %3016 = vmatpush3.bf16.msra.mxu0 %v3728_v29  ;;  %1252 = vmatprep.mubr.bf16.mxu1 %v3293_v35 }
  0x6a   : > { %1784 = vmatprep.mubr.bf16.mxu0 %v3589_v43  ;;  %3017 = vmatprep.subr.bf16.mxu0 %v3297_v37  ;;  %v3303_v43 = vld [vmem:[%s3530_s11 + $0x184] ss:$12 sps:$4 sm:$0xff]  }
  0x6d   : > { %3018 = vmatpush3.bf16.msra.mxu0 %v3297_v37 }
  0x6e   : > { %3019 = vmatprep.subr.bf16.mxu0 %v3302_v38 }
  0x70   : > { %1253 = vmatmul.mubr.bf16.gmra.mrb[36].mxu1 %v3295_v39  ;;  %1785 = vmatmul.mubr.bf16.gmra.mrb[36].mxu0 %v3597_v46  ;;  %v3305_v46 = vld [vmem:[%s3530_s11 + $0x180] ss:$12 sps:$4 sm:$0xff]  }
  0x71   : > { %1260 = vmatprep.mubr.bf16.mxu1 %v3298_v40  ;;  %1792 = vmatprep.mubr.bf16.mxu0 %v3620_v54  ;;  %v3317_v54 = vld [vmem:[%s3530_s11 + $0x170] ss:$12 sps:$4 sm:$0xff]  }
  0x72   : > { %3020 = vmatpush3.bf16.msra.mxu0 %v3302_v38 }
  0x73   : > { %3021 = vmatprep.subr.bf16.mxu0 %v3307_v36 }
  0x76   : > { %3022 = vmatpush3.bf16.msra.mxu0 %v3307_v36 }
  0x77   : > { %3023 = vmatprep.subr.bf16.mxu0 %v3310_v41 }
  0x78   : > { %1261 = vmatmul.mubr.bf16.gmra.mrb[40].mxu1 %v3300_v42  ;;  %1793 = vmatmul.mubr.bf16.gmra.mrb[40].mxu0 %v3625_v56  ;;  %v3320_v56 = vld [vmem:[%s3530_s11 + $0x188] ss:$12 sps:$4 sm:$0xff]  }
  0x79   : > { %1268 = vmatprep.mubr.bf16.mxu1 %v3303_v43  ;;  %1800 = vmatprep.mubr.bf16.mxu0 %v3648_v0  ;;  %v3329_v0 = vld [vmem:[%s3530_s11 + $0x68] ss:$12 sps:$4 sm:$0xff]  }
  0x7a   : > { %3024 = vmatpush3.bf16.msra.mxu0 %v3310_v41 }
  0x7b   : > { %3025 = vmatprep.subr.bf16.mxu0 %v3313_v44 }
  0x7e   : > { %3026 = vmatpush3.bf16.msra.mxu0 %v3313_v44 }
  0x7f   : > { %3027 = vmatprep.subr.bf16.mxu0 %v3316_v45 }
  0x80   : > { %1269 = vmatmul.mubr.bf16.gmra.mrb[44].mxu1 %v3305_v46  ;;  %1801 = vmatmul.mubr.bf16.gmra.mrb[44].mxu0 %v3653_v3 }
  0x81   : > { %2999 = vmatprep.mubr.bf16.mxu1 %v3308_v47  ;;  %1808 = vmatprep.mubr.bf16.mxu0 %v3667_v7 }
  0x82   : > { %3028 = vmatpush3.bf16.msra.mxu0 %v3316_v45 }
  0x83   : > { %3029 = vmatprep.subr.bf16.mxu0 %v3322_v48 }
  0x86   : > { %3030 = vmatpush3.bf16.msra.mxu0 %v3322_v48 }
  0x88   : > { %3000 = vmatmul.mubr.bf16.vlgmr.msra.gmra.mrb[0].mxu1 %v3309_v49  ;;  %1809 = vmatmul.mubr.bf16.gmra.mrb[48].mxu0 %v3672_v9 }
  0x89   : > { %3055 = vmatpush3.bf16.msra.mxu1 %v3728_v29  ;;  %3003 = vmatprep.mubr.bf16.mxu1 %v3311_v50 }
  0x8a   : > { %3048 = vmatprep.subr.bf16.mxu1 %v3297_v37  ;;  %1816 = vmatprep.mubr.bf16.mxu0 %v3685_v14 }
  0x8d   : > { %3056 = vmatpush3.bf16.msra.mxu1 %v3297_v37 }
  0x8e   : > { %3049 = vmatprep.subr.bf16.mxu1 %v3302_v38 }
  0x90   : > { %3004 = vmatmul.mubr.bf16.gmra.mrb[4].mxu1 %v3312_v51  ;;  %1817 = vmatmul.mubr.bf16.gmra.mrb[52].mxu0 %v3694_v17 }
  0x91   : > { %3057 = vmatpush3.bf16.msra.mxu1 %v3302_v38  ;;  %3007 = vmatprep.mubr.bf16.mxu1 %v3314_v52 }
  0x92   : > { %3050 = vmatprep.subr.bf16.mxu1 %v3307_v36  ;;  %1824 = vmatprep.mubr.bf16.mxu0 %v3704_v21 }
  0x95   : > { %3058 = vmatpush3.bf16.msra.mxu1 %v3307_v36 }
  0x96   : > { %3051 = vmatprep.subr.bf16.mxu1 %v3310_v41 }
  0x98   : > { %3008 = vmatmul.mubr.bf16.gmra.mrb[8].mxu1 %v3315_v53  ;;  %1825 = vmatmul.mubr.bf16.gmra.mrb[56].mxu0 %v3719_v26  ;;  %v3808_v26 = vld [vmem:[%s4016_s2] ss:$0 sm:$0xff] }
  0x99   : > { %3059 = vmatpush3.bf16.msra.mxu1 %v3310_v41  ;;  %3011 = vmatprep.mubr.bf16.mxu1 %v3317_v54 }
  0x9a   : > { %3052 = vmatprep.subr.bf16.mxu1 %v3313_v44  ;;  %1832 = vmatprep.mubr.bf16.mxu0 %v3318_v55 }
  0x9d   : > { %3060 = vmatpush3.bf16.msra.mxu1 %v3313_v44 }
  0x9e   : > { %3053 = vmatprep.subr.bf16.mxu1 %v3316_v45 }
  0xa0   : > { %3012 = vmatmul.mubr.bf16.gmra.mrb[12].mxu1 %v3320_v56  ;;  %1833 = vmatmul.mubr.bf16.gmra.mrb[60].mxu0 %v3321_v57 }
  0xa1   : > { %3061 = vmatpush3.bf16.msra.mxu1 %v3316_v45  ;;  %3031 = vmatprep.mubr.bf16.mxu0 %v3323_v58 }
  0xa2   : > { %3054 = vmatprep.subr.bf16.mxu1 %v3322_v48  ;;  %3039 = vmatprep.mubr.bf16.mxu1 %v3324_v59 }
  0xa5   : > { %3062 = vmatpush3.bf16.msra.mxu1 %v3322_v48 }
  0xa8   : > { %3032 = vmatmul.mubr.bf16.vlgmr.msra.gmra.mrb[64].mxu0 %v3325_v60  ;;  %3040 = vmatmul.mubr.bf16.vlgmr.msra.gmra.mrb[8].mxu1 %v3326_v61 }
  0xa9   : > { %3035 = vmatprep.mubr.bf16.mxu0 %v3327_v62  ;;  %3043 = vmatprep.mubr.bf16.mxu1 %v3328_v63 }
  0xb0   : > { %3036 = vmatmul.mubr.bf16.gmra.mrb[68].mxu0 %v3329_v0  ;;  %3044 = vmatmul.mubr.bf16.gmra.mrb[12].mxu1 %v3330_v1 }
  0xfb   : > { %v2727_v2 = vpop.f32.mrb[0].mxu0 }
  0xfc   : > { %v2728_v3 = vpop.f32.mrb[1].mxu0 }
  0xfd   : > { %v2729_v4 = vadd.f32 %v2728_v3, %v2727_v2  ;;  %v2730_v5 = vpop.f32.mrb[2].mxu0 }
  0xfe   : > { %v2731_v6 = vpop.f32.mrb[3].mxu0 }
  0xff   : > { %v2732_v7 = vadd.f32 %v2731_v6, %v2730_v5  ;;  %v3068_v31 = vadd.f32 %v2729_v4, %v3808_v26 }
 0x101   : > { %v3078_v39 = vadd.f32 %v2732_v7, %v3808_v26 }
 0x103   : > { %v2733_v8 = vpop.f32.mrb[4].mxu0 }
 0x104   : > { %v2734_v9 = vpop.f32.mrb[5].mxu0 }
 0x105   : > { %v2735_v10 = vadd.f32 %v2734_v9, %v2733_v8  ;;  %v2736_v11 = vpop.f32.mrb[6].mxu0 }
 0x106   : > { %v2737_v12 = vpop.f32.mrb[7].mxu0 }
 0x107   : > { %v2738_v13 = vadd.f32 %v2737_v12, %v2736_v11  ;;  %v3063_v47 = vadd.f32 %v2735_v10, %v3808_v26 }
 0x109   : > { %v3073_v54 = vadd.f32 %v2738_v13, %v3808_v26 }
 0x10b   : > { %v2739_v14 = vpop.f32.mrb[8].mxu0 }
 0x10c   : > { %v2740_v15 = vpop.f32.mrb[9].mxu0 }
 0x10d   : > { %v2741_v16 = vadd.f32 %v2740_v15, %v2739_v14  ;;  %v2742_v17 = vpop.f32.mrb[10].mxu0 }
 0x10e   : > { %v2743_v18 = vpop.f32.mrb[11].mxu0 }
 0x10f   : > { %v2744_v19 = vadd.f32 %v2743_v18, %v2742_v17  ;;  %v3088_v63 = vadd.f32 %v2741_v16, %v3808_v26 }
 0x111   : > { %v3098_v6 = vadd.f32 %v2744_v19, %v3808_v26 }
 0x113   : > { %v2745_v20 = vpop.f32.mrb[12].mxu0 }
 0x114   : > { %v2746_v21 = vpop.f32.mrb[13].mxu0 }
 0x115   : > { %v2747_v22 = vadd.f32 %v2746_v21, %v2745_v20  ;;  %v2748_v23 = vpop.f32.mrb[14].mxu0 }
 0x116   : > { %v2749_v24 = vpop.f32.mrb[15].mxu0 }
 0x117   : > { %v2750_v25 = vadd.f32 %v2749_v24, %v2748_v23  ;;  %v3083_v15 = vadd.f32 %v2747_v22, %v3808_v26 }
 0x119   : > { %v3093_v23 = vadd.f32 %v2750_v25, %v3808_v26 }
 0x11b   : > { %v2751_v27 = vpop.f32.mrb[16].mxu0  ;;  %v2807_v28 = vpop.f32.mrb[16].mxu1 }
 0x11c   : > { %v2752_v29 = vpop.f32.mrb[17].mxu0  ;;  %v2808_v30 = vpop.f32.mrb[17].mxu1 }
 0x11d   : > { %v3811_v32 = vadd.f32 %v2752_v29, %v2751_v27  ;;  %v2809_v34 = vadd.f32 %v2808_v30, %v2807_v28  ;;  %v2754_v35 = vpop.f32.mrb[18].mxu0  ;;  %v2810_v37 = vpop.f32.mrb[18].mxu1 }
 0x11e   : > { %v2755_v33 = vpop.f32.mrb[19].mxu0  ;;  %v2811_v38 = vpop.f32.mrb[19].mxu1 }
 0x11f   : > { %v3814_v40 = vadd.f32 %v2755_v33, %v2754_v35  ;;  %v2812_v36 = vadd.f32 %v2811_v38, %v2810_v37  ;;  %v3816_v41 = vadd.f32 %v3068_v31, %v2809_v34  ;;  %v3107_v35 = vadd.f32 %v3811_v32, %v3808_v26 }
 0x121   : > { %v3818_v42 = vadd.f32 %v3078_v39, %v2812_v36 }
 0x123   : > { %v2757_v43 = vpop.f32.mrb[20].mxu0  ;;  %v2813_v44 = vpop.f32.mrb[20].mxu1 }
 0x124   : > { %v2758_v45 = vpop.f32.mrb[21].mxu0  ;;  %v2814_v46 = vpop.f32.mrb[21].mxu1 }
 0x125   : > { %v3821_v48 = vadd.f32 %v2758_v45, %v2757_v43  ;;  %v2815_v49 = vadd.f32 %v2814_v46, %v2813_v44  ;;  %v2760_v50 = vpop.f32.mrb[22].mxu0  ;;  %v2816_v51 = vpop.f32.mrb[22].mxu1  ;;  %v3115_v43 = vadd.f32 %v3814_v40, %v3808_v26 }
 0x126   : > { %v2761_v52 = vpop.f32.mrb[23].mxu0  ;;  %v2817_v53 = vpop.f32.mrb[23].mxu1 }
 0x127   : > { %v3824_v55 = vadd.f32 %v2761_v52, %v2760_v50  ;;  %v2818_v56 = vadd.f32 %v2817_v53, %v2816_v51  ;;  %v3826_v57 = vadd.f32 %v3063_v47, %v2815_v49  ;;  %v3103_v52 = vadd.f32 %v3821_v48, %v3808_v26 }
 0x129   : > { %v3828_v58 = vadd.f32 %v3073_v54, %v2818_v56 }
 0x12b   : > { %v2763_v59 = vpop.f32.mrb[24].mxu0  ;;  %v2819_v60 = vpop.f32.mrb[24].mxu1 }
 0x12c   : > { %v2764_v61 = vpop.f32.mrb[25].mxu0  ;;  %v2820_v62 = vpop.f32.mrb[25].mxu1 }
 0x12d   : > { %v3831_v0 = vadd.f32 %v2764_v61, %v2763_v59  ;;  %v2821_v1 = vadd.f32 %v2820_v62, %v2819_v60  ;;  %v2766_v2 = vpop.f32.mrb[26].mxu0  ;;  %v2822_v3 = vpop.f32.mrb[26].mxu1  ;;  %v3111_v61 = vadd.f32 %v3824_v55, %v3808_v26 }
 0x12e   : > { %v2767_v4 = vpop.f32.mrb[27].mxu0  ;;  %v2823_v5 = vpop.f32.mrb[27].mxu1 }
 0x12f   : > { %v3834_v7 = vadd.f32 %v2767_v4, %v2766_v2  ;;  %v2824_v8 = vadd.f32 %v2823_v5, %v2822_v3  ;;  %v3836_v9 = vadd.f32 %v3088_v63, %v2821_v1  ;;  %v3123_v48 = vadd.f32 %v3831_v0, %v3808_v26 }
 0x131   : > { %v3838_v10 = vadd.f32 %v3098_v6, %v2824_v8  ;;  %v3131_v55 = vadd.f32 %v3834_v7, %v3808_v26 }
 0x133   : > { %v2769_v11 = vpop.f32.mrb[28].mxu0  ;;  %v2825_v12 = vpop.f32.mrb[28].mxu1 }
 0x134   : > { %v2770_v13 = vpop.f32.mrb[29].mxu0  ;;  %v2826_v14 = vpop.f32.mrb[29].mxu1 }
 0x135   : > { %v3841_v16 = vadd.f32 %v2770_v13, %v2769_v11  ;;  %v2827_v17 = vadd.f32 %v2826_v14, %v2825_v12  ;;  %v2772_v18 = vpop.f32.mrb[30].mxu0  ;;  %v2828_v20 = vpop.f32.mrb[30].mxu1 }
 0x136   : > { %v2773_v21 = vpop.f32.mrb[31].mxu0  ;;  %v2829_v19 = vpop.f32.mrb[31].mxu1 }
 0x137   : > { %v3844_v24 = vadd.f32 %v2773_v21, %v2772_v18  ;;  %v2830_v27 = vadd.f32 %v2829_v19, %v2828_v20  ;;  %v3846_v28 = vadd.f32 %v3083_v15, %v2827_v17  ;;  %v3119_v0 = vadd.f32 %v3841_v16, %v3808_v26 }
 0x139   : > { %v3848_v29 = vadd.f32 %v3093_v23, %v2830_v27  ;;  %v3127_v7 = vadd.f32 %v3844_v24, %v3808_v26 }
 0x13b   : > { %v2831_v30 = vpop.f32.mrb[32].mxu1  ;;  %v2887_v31 = vpop.f32.mrb[32].mxu0 }
 0x13c   : > { %v2832_v34 = vpop.f32.mrb[33].mxu1  ;;  %v2888_v22 = vpop.f32.mrb[33].mxu0 }
 0x13d   : > { %v2833_v37 = vadd.f32 %v2832_v34, %v2831_v30  ;;  %v3852_v33 = vadd.f32 %v2888_v22, %v2887_v31  ;;  %v2834_v38 = vpop.f32.mrb[34].mxu1  ;;  %v2890_v39 = vpop.f32.mrb[34].mxu0 }
 0x13e   : > { %v2835_v25 = vpop.f32.mrb[35].mxu1  ;;  %v2891_v36 = vpop.f32.mrb[35].mxu0 }
 0x13f   : > { %v3856_v44 = vadd.f32 %v3107_v35, %v2833_v37  ;;  %v2836_v45 = vadd.f32 %v2835_v25, %v2834_v38  ;;  %v3858_v46 = vadd.f32 %v2891_v36, %v2890_v39 }
 0x141   : > { %v3860_v47 = vadd.f32 %v3115_v43, %v2836_v45 }
 0x143   : > { %v2837_v49 = vpop.f32.mrb[36].mxu1  ;;  %v2893_v50 = vpop.f32.mrb[36].mxu0 }
 0x144   : > { %v2838_v32 = vpop.f32.mrb[37].mxu1  ;;  %v2894_v51 = vpop.f32.mrb[37].mxu0 }
 0x145   : > { %v2839_v53 = vadd.f32 %v2838_v32, %v2837_v49  ;;  %v2895_v54 = vadd.f32 %v2894_v51, %v2893_v50  ;;  %v2840_v56 = vpop.f32.mrb[38].mxu1  ;;  %v2896_v59 = vpop.f32.mrb[38].mxu0 }
 0x146   : > { %v2841_v60 = vpop.f32.mrb[39].mxu1  ;;  %v2897_v40 = vpop.f32.mrb[39].mxu0 }
 0x147   : > { %v3866_v62 = vadd.f32 %v3103_v52, %v2839_v53  ;;  %v2842_v63 = vadd.f32 %v2841_v60, %v2840_v56  ;;  %v2898_v1 = vadd.f32 %v2897_v40, %v2896_v59 }
 0x149   : > { %v3868_v2 = vadd.f32 %v3111_v61, %v2842_v63 }
 0x14b   : > { %v2843_v3 = vpop.f32.mrb[40].mxu1  ;;  %v2899_v4 = vpop.f32.mrb[40].mxu0 }
 0x14c   : > { %v2844_v5 = vpop.f32.mrb[41].mxu1  ;;  %v2900_v6 = vpop.f32.mrb[41].mxu0 }
 0x14d   : > { %v2845_v8 = vadd.f32 %v2844_v5, %v2843_v3  ;;  %v2901_v11 = vadd.f32 %v2900_v6, %v2899_v4  ;;  %v2846_v12 = vpop.f32.mrb[42].mxu1  ;;  %v2902_v13 = vpop.f32.mrb[42].mxu0 }
 0x14e   : > { %v2847_v14 = vpop.f32.mrb[43].mxu1  ;;  %v2903_v15 = vpop.f32.mrb[43].mxu0 }
 0x14f   : > { %v3874_v17 = vadd.f32 %v3123_v48, %v2845_v8  ;;  %v2848_v18 = vadd.f32 %v2847_v14, %v2846_v12  ;;  %v2904_v20 = vadd.f32 %v2903_v15, %v2902_v13 }
 0x151   : > { %v3876_v21 = vadd.f32 %v3131_v55, %v2848_v18 }
 0x153   : > { %v2849_v19 = vpop.f32.mrb[44].mxu1  ;;  %v2905_v23 = vpop.f32.mrb[44].mxu0 }
 0x154   : > { %v2850_v27 = vpop.f32.mrb[45].mxu1  ;;  %v2906_v30 = vpop.f32.mrb[45].mxu0 }
 0x155   : > { %v2851_v31 = vadd.f32 %v2850_v27, %v2849_v19  ;;  %v2907_v34 = vadd.f32 %v2906_v30, %v2905_v23  ;;  %v2852_v22 = vpop.f32.mrb[46].mxu1  ;;  %v2908_v35 = vpop.f32.mrb[46].mxu0 }
 0x156   : > { %v2853_v37 = vpop.f32.mrb[47].mxu1  ;;  %v2909_v38 = vpop.f32.mrb[47].mxu0 }
 0x157   : > { %v3120_v39 = vadd.f32 %v3119_v0, %v2851_v31  ;;  %v2854_v25 = vadd.f32 %v2853_v37, %v2852_v22  ;;  %v2910_v36 = vadd.f32 %v2909_v38, %v2908_v35 }
 0x159   : > { %v3128_v43 = vadd.f32 %v3127_v7, %v2854_v25 }
 0x15b   : > { %v3001_v45 = vpop.f32.mrb[0].mxu1  ;;  %v2911_v49 = vpop.f32.mrb[48].mxu0 }
 0x15c   : > { %v3065_v50 = vadd.f32 %v3826_v57, %v3001_v45  ;;  %v1311_v32 = vpop.f32.mrb[1].mxu1  ;;  %v2912_v51 = vpop.f32.mrb[49].mxu0 }
 0x15d   : > { %v3070_v16 = vadd.f32 %v3816_v41, %v1311_v32  ;;  %v2913_v52 = vadd.f32 %v2912_v51, %v2911_v49  ;;  %v3002_v53 = vpop.f32.mrb[2].mxu1  ;;  %v2914_v56 = vpop.f32.mrb[50].mxu0 }
 0x15e   : > { %v3075_v59 = vadd.f32 %v3828_v58, %v3002_v53  ;;  %v1314_v60 = vpop.f32.mrb[3].mxu1  ;;  %v2915_v40 = vpop.f32.mrb[51].mxu0  ;;  %v3066_v26 = vadd.f32 %v3065_v50, %v2895_v54 }
 0x15f   : > { %v3080_v24 = vadd.f32 %v3818_v42, %v1314_v60  ;;  %v2916_v61 = vadd.f32 %v2915_v40, %v2914_v56  ;;  %v3071_v63 = vadd.f32 %v3070_v16, %v3852_v33  ;;  %v3109_v3 = vadd.f32 %v3856_v44, %v2913_v52 }
 0x160   : > { %v3076_v57 = vadd.f32 %v3075_v59, %v2898_v1 }
 0x161   : > { %v3081_v4 = vadd.f32 %v3080_v24, %v3858_v46  ;;  %v3117_v41 = vadd.f32 %v3860_v47, %v2916_v61 }
 0x163   : > { %v3005_v5 = vpop.f32.mrb[4].mxu1  ;;  %v2917_v6 = vpop.f32.mrb[52].mxu0 }
 0x164   : > { %v3085_v48 = vadd.f32 %v3846_v28, %v3005_v5  ;;  %v1327_v58 = vpop.f32.mrb[5].mxu1  ;;  %v2918_v8 = vpop.f32.mrb[53].mxu0 }
 0x165   : > { %v3090_v54 = vadd.f32 %v3836_v9, %v1327_v58  ;;  %v2919_v12 = vadd.f32 %v2918_v8, %v2917_v6  ;;  %v3006_v42 = vpop.f32.mrb[6].mxu1  ;;  %v2920_v13 = vpop.f32.mrb[54].mxu0 }
 0x166   : > { %v3095_v33 = vadd.f32 %v3848_v29, %v3006_v42  ;;  %v1330_v14 = vpop.f32.mrb[7].mxu1  ;;  %v2921_v44 = vpop.f32.mrb[55].mxu0  ;;  %v3086_v1 = vadd.f32 %v3085_v48, %v2907_v34 }
 0x167   : > { %v3100_v46 = vadd.f32 %v3838_v10, %v1330_v14  ;;  %v2922_v15 = vadd.f32 %v2921_v44, %v2920_v13  ;;  %v3105_v47 = vadd.f32 %v3866_v62, %v2919_v12  ;;  %v3091_v55 = vadd.f32 %v3090_v54, %v2901_v11 }
 0x168   : > { %v3895_v18 = vadd.f32 %v3095_v33, %v2910_v36 }
 0x169   : > { %v3113_v28 = vadd.f32 %v3868_v2, %v2922_v15  ;;  %v3898_v19 = vadd.f32 %v3100_v46, %v2904_v20 }
 0x16b   : > { %v2923_v9 = vpop.f32.mrb[56].mxu0 }
 0x16c   : > { %v2924_v23 = vpop.f32.mrb[57].mxu0 }
 0x16d   : > { %v2925_v27 = vadd.f32 %v2924_v23, %v2923_v9  ;;  %v2926_v30 = vpop.f32.mrb[58].mxu0 }
 0x16e   : > { %v2927_v29 = vpop.f32.mrb[59].mxu0 }
 0x16f   : > { %v2928_v0 = vadd.f32 %v2927_v29, %v2926_v30  ;;  %v3125_v31 = vadd.f32 %v3874_v17, %v2925_v27 }
 0x171   : > { %v3902_v10 = vadd.f32 %v3876_v21, %v2928_v0 }
 0x173   : > { %v2929_v34 = vpop.f32.mrb[60].mxu0 }
 0x174   : > { %v2930_v62 = vpop.f32.mrb[61].mxu0 }
 0x175   : > { %v2931_v11 = vadd.f32 %v2930_v62, %v2929_v34  ;;  %v2932_v22 = vpop.f32.mrb[62].mxu0 }
 0x176   : > { %v2933_v35 = vpop.f32.mrb[63].mxu0 }
 0x177   : > { %v2934_v37 = vadd.f32 %v2933_v35, %v2932_v22  ;;  %v3121_v2 = vadd.f32 %v3120_v39, %v2931_v11 }
 0x179   : > { %v3129_v20 = vadd.f32 %v3128_v43, %v2934_v37 }
 0x17b   : > { %v3033_v38 = vpop.f32.mrb[64].mxu0  ;;  %v3041_v7 = vpop.f32.mrb[8].mxu1 }
 0x17c   : > { %v3904_v25 = vadd.f32 %v3066_v26, %v3033_v38  ;;  %v3906_v36 = vadd.f32 %v3105_v47, %v3041_v7  ;;  %v1875_v45 = vpop.f32.mrb[65].mxu0  ;;  %v1907_v49 = vpop.f32.mrb[9].mxu1 }
 0x17d   : > { %v3908_v17 = vadd.f32 %v3071_v63, %v1875_v45  ;;  %v3910_v21 = vadd.f32 %v3109_v3, %v1907_v49  ;;  %v3034_v50 = vpop.f32.mrb[66].mxu0  ;;  %v3042_v32 = vpop.f32.mrb[10].mxu1 }
 0x17e   : > { %v1956_v51 = vmin.f32 %v3904_v25, 20.0  ;;  %v1964_v16 = vmin.f32 %v3906_v36, 20.0  ;;  %v3914_v39 = vadd.f32 %v3076_v57, %v3034_v50  ;;  %v3916_v43 = vadd.f32 %v3113_v28, %v3042_v32  ;;  %v1878_v52 = vpop.f32.mrb[67].mxu0  ;;  %v1910_v53 = vpop.f32.mrb[11].mxu1 }
 0x17f   : > { %v1954_v56 = vmin.f32 %v3908_v17, 20.0  ;;  %v1962_v59 = vmin.f32 %v3910_v21, 20.0  ;;  %v3920_v60 = vadd.f32 %v3081_v4, %v1878_v52  ;;  %v3922_v40 = vadd.f32 %v3117_v41, %v1910_v53 }
 0x180   : > { %v1974_v26 = vmul.f32 1.442695, %v1956_v51  ;;  %v1990_v24 = vmul.f32 1.442695, %v1964_v16  ;;  %v1957_v61 = vmin.f32 %v3914_v39, 20.0  ;;  %v1965_v63 = vmin.f32 %v3916_v43, 20.0 }
 0x181   : > { %v1970_v3 = vmul.f32 1.442695, %v1954_v56  ;;  %v1986_v57 = vmul.f32 1.442695, %v1962_v59  ;;  %v1955_v5 = vmin.f32 %v3920_v60, 20.0  ;;  %v1963_v6 = vmin.f32 %v3922_v40, 20.0 }
 0x182   : > { %3331 = vpow2.f32 %v1974_v26  ;;  %v1976_v48 = vmul.f32 1.442695, %v1957_v61  ;;  %v1992_v58 = vmul.f32 1.442695, %v1965_v63 }
 0x183   : > { %3333 = vpow2.f32 %v1990_v24  ;;  %v3037_v4 = vpop.f32.mrb[68].mxu0  ;;  %v3045_v8 = vpop.f32.mrb[12].mxu1  ;;  %v1972_v41 = vmul.f32 1.442695, %v1955_v5  ;;  %v1988_v33 = vmul.f32 1.442695, %v1963_v6 }
 0x184   : > { %3335 = vpow2.f32 %v1970_v3  ;;  %v3928_v54 = vadd.f32 %v3086_v1, %v3037_v4  ;;  %v3930_v12 = vadd.f32 %v3121_v2, %v3045_v8  ;;  %v1891_v42 = vpop.f32.mrb[69].mxu0  ;;  %v1923_v13 = vpop.f32.mrb[13].mxu1 }
 0x185   : > { %3337 = vpow2.f32 %v1986_v57  ;;  %v3932_v14 = vadd.f32 %v3091_v55, %v1891_v42  ;;  %v3934_v44 = vadd.f32 %v3125_v31, %v1923_v13  ;;  %v3038_v46 = vpop.f32.mrb[70].mxu0  ;;  %v3046_v15 = vpop.f32.mrb[14].mxu1 }
 0x186   : > { %3339 = vpow2.f32 %v1976_v48  ;;  %v1960_v47 = vmin.f32 %v3928_v54, 20.0  ;;  %v1968_v28 = vmin.f32 %v3930_v12, 20.0  ;;  %v3939_v1 = vadd.f32 %v3895_v18, %v3038_v46  ;;  %v1894_v9 = vpop.f32.mrb[71].mxu0  ;;  %v1926_v23 = vpop.f32.mrb[15].mxu1 }
 0x187   : > { %3341 = vpow2.f32 %v1992_v58  ;;  %v1958_v27 = vmin.f32 %v3932_v14, 20.0  ;;  %v3942_v30 = vadd.f32 %v3129_v20, %v3046_v15  ;;  %v3947_v18 = vadd.f32 %v3898_v19, %v1894_v9 }
 0x188   : > { %3343 = vpow2.f32 %v1972_v41  ;;  %v1982_v55 = vmul.f32 1.442695, %v1960_v47  ;;  %v1998_v29 = vmul.f32 1.442695, %v1968_v28  ;;  %v1961_v0 = vmin.f32 %v3939_v1, 20.0 }
 0x189   : > { %3345 = vpow2.f32 %v1988_v33  ;;  %v1978_v31 = vmul.f32 1.442695, %v1958_v27  ;;  %v1969_v34 = vmin.f32 %v3942_v30, 20.0  ;;  %v3950_v62 = vadd.f32 %v3902_v10, %v1926_v23 }
 0x18a   : > { %3347 = vpow2.f32 %v1982_v55  ;;  %v1984_v11 = vmul.f32 1.442695, %v1961_v0  ;;  %v1966_v35 = vmin.f32 %v3934_v44, 20.0  ;;  %v1959_v2 = vmin.f32 %v3947_v18, 20.0 }
 0x18b   : > { %3349 = vpow2.f32 %v1998_v29  ;;  %v2000_v37 = vmul.f32 1.442695, %v1969_v34  ;;  %v1967_v27 = vmin.f32 %v3950_v62, 20.0 }
 0x18c   : > { %v3332_v22 = vpop.eup %3331  ;;  %3351 = vpow2.f32 %v1978_v31  ;;  %v1980_v49 = vmul.f32 1.442695, %v1959_v2  ;;  %v1994_v52 = vmul.f32 1.442695, %v1966_v35 }
 0x18d   : > { %v3334_v20 = vpop.eup %3333  ;;  %v2004_v38 = vadd.f32 2.0, %v3332_v22  ;;  %3353 = vpow2.f32 %v1984_v11 }
 0x18e   : > { %v3336_v7 = vpop.eup %3335  ;;  %v2012_v45 = vadd.f32 2.0, %v3334_v20  ;;  %3355 = vpow2.f32 %v2000_v37 }
 0x18f   : > { %v3338_v50 = vpop.eup %3337  ;;  %v2020_v19 = vmul.f32 %v3332_v22, %v2004_v38  ;;  %v2002_v32 = vadd.f32 2.0, %v3336_v7  ;;  %3357 = vpow2.f32 %v1980_v49  ;;  %v1996_v38 = vmul.f32 1.442695, %v1967_v27 }
 0x190   : > { %v3340_v10 = vpop.eup %3339  ;;  %v2028_v51 = vmul.f32 %v3334_v20, %v2012_v45  ;;  %v2010_v16 = vadd.f32 2.0, %v3338_v50  ;;  %3359 = vpow2.f32 %v1994_v52 }
 0x191   : > { %v3342_v53 = vpop.eup %3341  ;;  %v2052_v56 = vadd.f32 2.0, %v2020_v19  ;;  %v3954_v59 = vmul.f32 %v3336_v7, %v2002_v32  ;;  %v2005_v26 = vadd.f32 2.0, %v3340_v10 }
 0x192   : > { %v3344_v24 = vpop.eup %3343  ;;  %v2060_v61 = vadd.f32 2.0, %v2028_v51  ;;  %v3956_v63 = vmul.f32 %v3338_v50, %v2010_v16  ;;  %v2013_v3 = vadd.f32 2.0, %v3342_v53  ;;  %v2044_v16 = vmul.f32 %v3906_v36, %v2028_v51 }
 0x193   : > { %v3346_v57 = vpop.eup %3345  ;;  %v2021_v5 = vmul.f32 %v3340_v10, %v2005_v26  ;;  %3361 = vrcp.f32 %v2052_v56  ;;  %v2050_v4 = vadd.f32 2.0, %v3954_v59  ;;  %v2003_v41 = vadd.f32 2.0, %v3344_v24 }
 0x194   : > { %v3348_v6 = vpop.eup %3347  ;;  %v2029_v48 = vmul.f32 %v3342_v53, %v2013_v3  ;;  %3363 = vrcp.f32 %v2060_v61  ;;  %v2058_v13 = vadd.f32 2.0, %v3956_v63  ;;  %v2011_v46 = vadd.f32 2.0, %v3346_v57 }
 0x195   : > { %v3350_v58 = vpop.eup %3349  ;;  %v2053_v8 = vadd.f32 2.0, %v2021_v5  ;;  %v2019_v15 = vmul.f32 %v3344_v24, %v2003_v41  ;;  %v2008_v47 = vadd.f32 2.0, %v3348_v6  ;;  %v2036_v10 = vmul.f32 %v3904_v25, %v2020_v19 }
 0x196   : > { %v3352_v42 = vpop.eup %3351  ;;  %v2061_v33 = vadd.f32 2.0, %v2029_v48  ;;  %v2016_v28 = vadd.f32 2.0, %v3350_v58  ;;  %v2027_v9 = vmul.f32 %v3346_v57, %v2011_v46  ;;  %v2037_v56 = vmul.f32 %v3914_v39, %v2021_v5 }
 0x197   : > { %3365 = vrcp.f32 %v2053_v8  ;;  %v2006_v23 = vadd.f32 2.0, %v3352_v42  ;;  %v3354_v55 = vpop.eup %3353  ;;  %v2051_v29 = vadd.f32 2.0, %v2019_v15  ;;  %v3961_v0 = vmul.f32 %v3348_v6, %v2008_v47 }
 0x198   : > { %3367 = vrcp.f32 %v2061_v33  ;;  %v3963_v31 = vmul.f32 %v3350_v58, %v2016_v28  ;;  %v3356_v34 = vpop.eup %3355  ;;  %v2059_v11 = vadd.f32 2.0, %v2027_v9  ;;  %v2009_v20 = vadd.f32 2.0, %v3354_v55 }
 0x199   : > { %3369 = vrcp.f32 %v2050_v4  ;;  %v3965_v22 = vmul.f32 %v3352_v42, %v2006_v23  ;;  %v3358_v35 = vpop.eup %3357  ;;  %v2056_v37 = vadd.f32 2.0, %v3961_v0  ;;  %v2017_v49 = vadd.f32 2.0, %v3356_v34 }
 0x19a   : > { %3371 = vrcp.f32 %v2058_v13  ;;  %v2064_v2 = vadd.f32 2.0, %v3963_v31  ;;  %v3360_v7 = vpop.eup %3359  ;;  %v2007_v50 = vadd.f32 2.0, %v3358_v35  ;;  %v2025_v52 = vmul.f32 %v3354_v55, %v2009_v20 }
 0x19b   : > { %3373 = vrcp.f32 %v2051_v29  ;;  %v2054_v45 = vadd.f32 2.0, %v3965_v22  ;;  %v2033_v26 = vmul.f32 %v3356_v34, %v2017_v49  ;;  %v2045_v3 = vmul.f32 %v3916_v43, %v2029_v48 }
 0x19c   : > { %3375 = vrcp.f32 %v2059_v11  ;;  %v2023_v24 = vmul.f32 %v3358_v35, %v2007_v50  ;;  %v2014_v57 = vadd.f32 2.0, %v3360_v7  ;;  %v2057_v6 = vadd.f32 2.0, %v2025_v52 }
 0x19d   : > { %v3362_v32 = vpop.eup %3361  ;;  %3377 = vrcp.f32 %v2056_v37  ;;  %v2065_v36 = vadd.f32 2.0, %v2033_v26  ;;  %v2034_v48 = vmul.f32 %v3908_v17, %v3954_v59  ;;  %v2035_v41 = vmul.f32 %v3920_v60, %v2019_v15 }
 0x19e   : > { %v3364_v53 = vpop.eup %3363  ;;  %3379 = vrcp.f32 %v2064_v2  ;;  %v2084_v4 = vmul.f32 %v3362_v32, %v2036_v10  ;;  %v2055_v5 = vadd.f32 2.0, %v2023_v24  ;;  %v2042_v13 = vmul.f32 %v3910_v21, %v3956_v63 }
 0x19f   : > { %3381 = vpow2.f32 %v1996_v38  ;;  %v2092_v51 = vmul.f32 %v3364_v53, %v2044_v16  ;;  %v2043_v46 = vmul.f32 %v3922_v40, %v2027_v9  ;;  %v2030_v59 = vmul.f32 %v3360_v7, %v2014_v57 }
 0x1a0   : > { %3383 = vrcp.f32 %v2054_v45  ;;  %v2040_v40 = vmul.f32 %v3928_v54, %v3961_v0  ;;  %v2041_v9 = vmul.f32 %v3939_v1, %v2025_v52  ;;  %v2048_v37 = vmul.f32 %v3930_v12, %v3963_v31 }
 0x1a1   : > { %v3366_v61 = vpop.eup %3365  ;;  %3385 = vrcp.f32 %v2057_v6  ;;  %v2062_v63 = vadd.f32 2.0, %v2030_v59  ;;  %v2038_v2 = vmul.f32 %v3932_v14, %v3965_v22  ;;  %v2049_v20 = vmul.f32 %v3942_v30, %v2033_v26 }
 0x1a2   : > { %v3368_v58 = vpop.eup %3367  ;;  %v2085_v25 = vmul.f32 %v3366_v61, %v2037_v56  ;;  %3387 = vrcp.f32 %v2065_v36  ;;  %v2039_v54 = vmul.f32 %v3947_v18, %v2023_v24  ;;  %v2046_v16 = vmul.f32 %v3934_v44, %v2030_v59 }
 0x1a3   : > { %v3370_v19 = vpop.eup %3369  ;;  %v2093_v39 = vmul.f32 %v3368_v58, %v2045_v3  ;;  %3389 = vrcp.f32 %v2055_v5 }
 0x1a4   : > { %v3372_v43 = vpop.eup %3371  ;;  %v2672_v8 = vpack.c.bf16 %v2085_v25, %v2084_v4  ;;  %v2082_v28 = vmul.f32 %v3370_v19, %v2034_v48  ;;  %3391 = vrcp.f32 %v2062_v63 }
 0x1a5   : > { %v3374_v42 = vpop.eup %3373  ;;  %v2692_v33 = vpack.c.bf16 %v2093_v39, %v2092_v51  ;;  %v2090_v27 = vmul.f32 %v3372_v43, %v2042_v13 }
 0x1a6   : > { %v3376_v47 = vpop.eup %3375  ;;  %2704 = vst [vmem:[%s3978_s6 + $0x8] sm:$0xff] %v2672_v8   ;;  %v2083_v23 = vmul.f32 %v3374_v42, %v2035_v41 }
 0x1a7   : > { %2708 = vst [vmem:[%s3978_s6 + $0x28] sm:$0xff] %v2692_v33   ;;  %v2091_v17 = vmul.f32 %v3376_v47, %v2043_v46  ;;  %v3378_v15 = vpop.eup %3377 }
 0x1a8   : > { %v2667_v60 = vpack.c.bf16 %v2083_v23, %v2082_v28  ;;  %v3380_v29 = vpop.eup %3379  ;;  %v2088_v7 = vmul.f32 %v3378_v15, %v2040_v40 }
 0x1a9   : > { %v2687_v55 = vpack.c.bf16 %v2091_v17, %v2090_v27  ;;  %v3382_v21 = vpop.eup %3381  ;;  %v2096_v49 = vmul.f32 %v3380_v29, %v2048_v37 }
 0x1aa   : > { %2668 = vst [vmem:[%s3978_s6] sm:$0xff] %v2667_v60   ;;  %v3384_v34 = vpop.eup %3383  ;;  %v2015_v11 = vadd.f32 2.0, %v3382_v21 }
 0x1ab   : > { %2707 = vst [vmem:[%s3978_s6 + $0x20] sm:$0xff] %v2687_v55   ;;  %v3386_v35 = vpop.eup %3385  ;;  %v2086_v32 = vmul.f32 %v3384_v34, %v2038_v2 }
 0x1ac   : > { %v3388_v38 = vpop.eup %3387  ;;  %v2089_v45 = vmul.f32 %v3386_v35, %v2041_v9  ;;  %v2031_v0 = vmul.f32 %v3382_v21, %v2015_v11 }
 0x1ad   : > { %v3390_v1 = vpop.eup %3389  ;;  %v2097_v50 = vmul.f32 %v3388_v38, %v2049_v20 }
 0x1ae   : > { %v2682_v12 = vpack.c.bf16 %v2089_v45, %v2088_v7  ;;  %v2087_v31 = vmul.f32 %v3390_v1, %v2039_v54  ;;  %v2063_v14 = vadd.f32 2.0, %v2031_v0  ;;  %v3392_v10 = vpop.eup %3391  ;;  %v2047_v18 = vmul.f32 %v3950_v62, %v2031_v0 }
 0x1af   : > { %v2702_v22 = vpack.c.bf16 %v2097_v50, %v2096_v49  ;;  %v2094_v53 = vmul.f32 %v3392_v10, %v2046_v16 }
 0x1b0   : > { %2706 = vst [vmem:[%s3978_s6 + $0x18] sm:$0xff] %v2682_v12   ;;  %v2677_v30 = vpack.c.bf16 %v2087_v31, %v2086_v32  ;;  %3393 = vrcp.f32 %v2063_v14 }
 0x1b1   : > { %2710 = vst [vmem:[%s3978_s6 + $0x38] sm:$0xff] %v2702_v22  }
 0x1b2   : > { %2705 = vst [vmem:[%s3978_s6 + $0x10] sm:$0xff] %v2677_v30  }
 0x1ba   : > { %v3394_v52 = vpop.eup %3393 }
 0x1bb   : > { %v2095_v56 = vmul.f32 %v3394_v52, %v2047_v18 }
 0x1bd   : > { %v2697_v26 = vpack.c.bf16 %v2095_v56, %v2094_v53 }
 0x1bf   : > { %2709 = vst [vmem:[%s3978_s6 + $0x30] sm:$0xff] %v2697_v26  }
 0x1c0 PF: > { %s13_s14 = sadd.s32 1, %s3417_s14   ;;  %s4018_s12 = smov %s3413_s13 }
 0x1c1   : > { %p10_p5 = scmp.ge.s32.totalorder %s13_s14, 4   ;;  %s4019_s13 = smov %s4021_s15 }
 0x1c3   :  { %12 = sbr.rel (!%p10_p5) target bundleno = 2 (0x2), region = 72 }

// kernel: a_call__.5
= control target key start
LH: loop header
LB: loop body
LE: loop exit
PB: predicated region body
PF: predicated region fallthrough
CT: control target
= control target key end

     0   :  { %s2523_s12 = smov 0   ;;  %s2525_s13 = smov 0   ;;  %s2879_s0 = inlined_call_operand.vmem [shape: bf16[2,1,10,16,384], index: 0, kind: input, shape index: {}]   ;;  %s2880_s1 = inlined_call_operand.vmem [shape: bf16[3,384,128], index: 1, kind: input, shape index: {}]   ;;  %s2881_s2 = inlined_call_operand.vmem [shape: f32[1,128], index: 2, kind: input, shape index: {}]   ;;  %s2882_s3 = inlined_call_operand.vmem [shape: bf16[2,4,16,128], index: 3, kind: output, shape index: {}]  }
   0x1   :  { %s2527_s14 = smov 0  }
   0x2 LB: > { %s28_s15 = sadd.s32 1, %s2497_s13  ;;  %p1752_p0 = scmp.ge.s32.totalorder %s2501_s14, 1  ;;  %s2501_s14 = sphi %s2527_s14, %s13_s14   ;;  %s2497_s13 = sphi %s2525_s13, %s2884_s13   ;;  %s2493_s12 = sphi %s2523_s12, %s2883_s12  }
   0x3   : > { %p30_p1 = scmp.ge.s32.totalorder %s28_s15, 2  ;;  %p183_p2 = scmp.lt.s32.totalorder %s2501_s14, 3 }
   0x5   : > { %s2886_s15 = smov (%p30_p1, %s28_s15), 0  ;;  %p184_p3 = pnand %p1752_p0, %p183_p2 }
   0x6   : > { %v2336_v0 = vld [vmem:[%s2880_s1 + $0x40] sm:$0xff] (!%p184_p3)   ;;  %v2339_v3 = vld [vmem:[%s2880_s1 + $0x48] sm:$0xff] (!%p184_p3)   ;;  %v2342_v6 = vld [vmem:[%s2880_s1 + $0x50] sm:$0xff] (!%p184_p3)   ;;  %p226_p4 = scmp.lt.s32.totalorder (!%p184_p3), %s2493_s12, 1 }
   0x7   : > { %187 = sbr.rel (%p184_p3) target bundleno = 386 (0x182), region = 32  ;;  %v2337_v1 = vld [vmem:[%s2880_s1 + $0x80] sm:$0xff] (!%p184_p3)   ;;  %2035 = vmatprep.subr.bf16.mxu0 (!%p184_p3), %v2336_v0  ;;  %v2340_v4 = vld [vmem:[%s2880_s1 + $0x88] sm:$0xff] (!%p184_p3)   ;;  %v2343_v7 = vld [vmem:[%s2880_s1 + $0x90] sm:$0xff] (!%p184_p3)  }
   0x8   : > { %v2338_v2 = vld [vmem:[%s2880_s1] sm:$0xff] (!%p184_p3)   ;;  %2191 = vmatprep.subr.bf16.mxu1 (!%p184_p3), %v2337_v1  ;;  %v2341_v5 = vld [vmem:[%s2880_s1 + $0x8] sm:$0xff] (!%p184_p3)   ;;  %v2344_v8 = vld [vmem:[%s2880_s1 + $0x10] sm:$0xff] (!%p184_p3)  }
   0x9   : > { %2036 = vmatpush3.bf16.msra.mxu0 (!%p184_p3), %v2338_v2  ;;  %2192 = vmatpush3.bf16.msra.mxu1 (!%p184_p3), %v2337_v1  ;;  %v2345_v9 = vld [vmem:[%s2880_s1 + $0x58] sm:$0xff] (!%p184_p3)   ;;  %v2348_v12 = vld [vmem:[%s2880_s1 + $0x60] sm:$0xff] (!%p184_p3)   ;;  %v2351_v15 = vld [vmem:[%s2880_s1 + $0x68] sm:$0xff] (!%p184_p3)  }
   0xa   : > { %2037 = vmatprep.subr.bf16.mxu0 (!%p184_p3), %v2339_v3  ;;  %2193 = vmatprep.subr.bf16.mxu1 (!%p184_p3), %v2340_v4  ;;  %v2346_v10 = vld [vmem:[%s2880_s1 + $0x98] sm:$0xff] (!%p184_p3)   ;;  %v2349_v13 = vld [vmem:[%s2880_s1 + $0xa0] sm:$0xff] (!%p184_p3)   ;;  %v2352_v16 = vld [vmem:[%s2880_s1 + $0xa8] sm:$0xff] (!%p184_p3)  }
   0xb   : > { %v2347_v11 = vld [vmem:[%s2880_s1 + $0x18] sm:$0xff] (!%p184_p3)   ;;  %v2350_v14 = vld [vmem:[%s2880_s1 + $0x20] sm:$0xff] (!%p184_p3)   ;;  %v2353_v17 = vld [vmem:[%s2880_s1 + $0x28] sm:$0xff] (!%p184_p3)  }
   0xc   : > { %v2354_v18 = vld [vmem:[%s2880_s1 + $0x70] sm:$0xff] (!%p184_p3)   ;;  %v2357_v21 = vld [vmem:[%s2880_s1 + $0x78] sm:$0xff] (!%p184_p3)   ;;  %v2364_v26 = vld [vmem:[%s2880_s1 + $0x100] sm:$0xff] (!%p184_p3)  }
   0xd   : > { %2038 = vmatpush3.bf16.msra.mxu0 (!%p184_p3), %v2341_v5  ;;  %2194 = vmatpush3.bf16.msra.mxu1 (!%p184_p3), %v2340_v4  ;;  %v2355_v19 = vld [vmem:[%s2880_s1 + $0xb0] sm:$0xff] (!%p184_p3)   ;;  %v2358_v22 = vld [vmem:[%s2880_s1 + $0xb8] sm:$0xff] (!%p184_p3)   ;;  %v2365_v28 = vld [vmem:[%s2880_s1 + $0x140] sm:$0xff] (!%p184_p3)  }
   0xe   : > { %2039 = vmatprep.subr.bf16.mxu0 %v2342_v6  ;;  %2195 = vmatprep.subr.bf16.mxu1 %v2343_v7  ;;  %s2888_s12 = smov (!%p226_p4, %s2493_s12), 1  ;;  %v2356_v20 = vld [vmem:[%s2880_s1 + $0x30] sm:$0xff]   ;;  %v2359_v25 = vld [vmem:[%s2880_s1 + $0x38] sm:$0xff]   ;;  %v2367_v30 = vld [vmem:[%s2880_s1 + $0xc0] sm:$0xff]  }
   0xf   : > { %s2311_s27 = smul.u32 240, %s2888_s12  ;;  %v2368_v31 = vld [vmem:[%s2880_s1 + $0x108] sm:$0xff]   ;;  %v2374_v35 = vld [vmem:[%s2880_s1 + $0x110] sm:$0xff]   ;;  %v2377_v39 = vld [vmem:[%s2880_s1 + $0x118] sm:$0xff]   ;;  %s2003_s4 = sshll.u32 %s2888_s12, 5 }
  0x10   : > { %v2369_v32 = vld [vmem:[%s2880_s1 + $0x148] sm:$0xff]   ;;  %v2375_v36 = vld [vmem:[%s2880_s1 + $0x150] sm:$0xff]   ;;  %v2378_v40 = vld [vmem:[%s2880_s1 + $0x158] sm:$0xff]   ;;  %s2859_s7 = scalar_lea.vmem %s2882_s3, %s2003_s4 }
  0x11   : > { %2040 = vmatpush3.bf16.msra.mxu0 %v2344_v8  ;;  %2196 = vmatpush3.bf16.msra.mxu1 %v2343_v7  ;;  %s2614_s11 = scalar_lea.vmem %s2879_s0, %s2311_s27  ;;  %v2370_v34 = vld [vmem:[%s2880_s1 + $0xc8] sm:$0xff]   ;;  %v2376_v38 = vld [vmem:[%s2880_s1 + $0xd0] sm:$0xff]   ;;  %v2379_v42 = vld [vmem:[%s2880_s1 + $0xd8] sm:$0xff]  }
  0x12   : > { %2041 = vmatprep.subr.bf16.mxu0 %v2345_v9  ;;  %2197 = vmatprep.subr.bf16.mxu1 %v2346_v10  ;;  %v2362_v23 = vld [vmem:[%s2614_s11 + $0x4] ss:$12 sps:$4 sm:$0xff]   ;;  %v2363_v24 = vld [vmem:[%s2614_s11 + $0x8] ss:$12 sps:$4 sm:$0xff]   ;;  %v2360_v27 = vld [vmem:[%s2614_s11] ss:$12 sps:$4 sm:$0xff]  }
  0x13   : > { %562 = vmatprep.mubr.bf16.mxu0 %v2362_v23  ;;  %2207 = vmatprep.mubr.bf16.mxu1 %v2363_v24  ;;  %v2366_v29 = vld [vmem:[%s2614_s11 + $0x20] ss:$12 sps:$4 sm:$0xff]   ;;  %v2645_v33 = vld [vmem:[%s2614_s11 + $0x1c] ss:$12 sps:$4 sm:$0xff]   ;;  %v2658_v37 = vld [vmem:[%s2614_s11 + $0x18] ss:$12 sps:$4 sm:$0xff]  }
  0x14   : > { %v2670_v41 = vld [vmem:[%s2614_s11 + $0x34] ss:$12 sps:$4 sm:$0xff]   ;;  %v2680_v44 = vld [vmem:[%s2614_s11 + $0x30] ss:$12 sps:$4 sm:$0xff]   ;;  %v2386_v47 = vld [vmem:[%s2880_s1 + $0x128] sm:$0xff]  }
  0x15   : > { %2042 = vmatpush3.bf16.msra.mxu0 %v2347_v11  ;;  %2198 = vmatpush3.bf16.msra.mxu1 %v2346_v10  ;;  %v2383_v43 = vld [vmem:[%s2880_s1 + $0x120] sm:$0xff]   ;;  %v2387_v48 = vld [vmem:[%s2880_s1 + $0x168] sm:$0xff]   ;;  %v2393_v52 = vld [vmem:[%s2880_s1 + $0x130] sm:$0xff]  }
  0x16   : > { %2043 = vmatprep.subr.bf16.mxu0 %v2348_v12  ;;  %2199 = vmatprep.subr.bf16.mxu1 %v2349_v13  ;;  %v2384_v45 = vld [vmem:[%s2880_s1 + $0x160] sm:$0xff]   ;;  %v2696_v49 = vld [vmem:[%s2614_s11 + $0x4c] ss:$12 sps:$4 sm:$0xff]   ;;  %v2394_v53 = vld [vmem:[%s2880_s1 + $0x170] sm:$0xff]  }
  0x17   : > { %v2385_v46 = vld [vmem:[%s2880_s1 + $0xe0] sm:$0xff]   ;;  %v2388_v50 = vld [vmem:[%s2880_s1 + $0xe8] sm:$0xff]   ;;  %v2395_v54 = vld [vmem:[%s2614_s11 + $0x50] ss:$12 sps:$4 sm:$0xff]  }
  0x18   : > { %v2392_v51 = vld [vmem:[%s2614_s11 + $0x38] ss:$12 sps:$4 sm:$0xff]   ;;  %v2712_v55 = vld [vmem:[%s2614_s11 + $0x48] ss:$12 sps:$4 sm:$0xff]   ;;  %v2403_v61 = vld [vmem:[%s2614_s11 + $0x80] ss:$12 sps:$4 sm:$0xff]  }
  0x19   : > { %2044 = vmatpush3.bf16.msra.mxu0 %v2350_v14  ;;  %2200 = vmatpush3.bf16.msra.mxu1 %v2349_v13  ;;  %v2396_v56 = vld [vmem:[%s2880_s1 + $0xf0] sm:$0xff]   ;;  %v2397_v57 = vld [vmem:[%s2880_s1 + $0x138] sm:$0xff]   ;;  %v2404_v62 = vld [vmem:[%s2880_s1 + $0x1c0] sm:$0xff]  }
  0x1a   : > { %2045 = vmatprep.subr.bf16.mxu0 %v2351_v15  ;;  %2201 = vmatprep.subr.bf16.mxu1 %v2352_v16  ;;  %v2398_v58 = vld [vmem:[%s2880_s1 + $0x178] sm:$0xff]   ;;  %v2405_v0 = vld [vmem:[%s2880_s1 + $0x200] sm:$0xff]   ;;  %v2408_v3 = vld [vmem:[%s2880_s1 + $0x1c8] sm:$0xff]  }
  0x1b   : > { %v2399_v59 = vld [vmem:[%s2880_s1 + $0xf8] sm:$0xff]   ;;  %v2407_v2 = vld [vmem:[%s2880_s1 + $0x180] sm:$0xff]   ;;  %v2409_v4 = vld [vmem:[%s2880_s1 + $0x208] sm:$0xff]  }
  0x1c   : > { %v2402_v60 = vld [vmem:[%s2614_s11 + $0x7c] ss:$12 sps:$4 sm:$0xff]   ;;  %v2400_v63 = vld [vmem:[%s2614_s11 + $0x78] ss:$12 sps:$4 sm:$0xff]   ;;  %v2411_v6 = vld [vmem:[%s2614_s11 + $0x94] ss:$12 sps:$4 sm:$0xff]  }
  0x1d   : > { %2046 = vmatpush3.bf16.msra.mxu0 %v2353_v17  ;;  %2202 = vmatpush3.bf16.msra.mxu1 %v2352_v16  ;;  %v2406_v1 = vld [vmem:[%s2614_s11 + $0x98] ss:$12 sps:$4 sm:$0xff]   ;;  %v2410_v5 = vld [vmem:[%s2880_s1 + $0x188] sm:$0xff]   ;;  %v2414_v7 = vld [vmem:[%s2880_s1 + $0x1d0] sm:$0xff]  }
  0x1e   : > { %2047 = vmatprep.subr.bf16.mxu0 %v2354_v18  ;;  %2203 = vmatprep.subr.bf16.mxu1 %v2355_v19  ;;  %v2415_v8 = vld [vmem:[%s2880_s1 + $0x210] sm:$0xff]   ;;  %v2417_v11 = vld [vmem:[%s2880_s1 + $0x1d8] sm:$0xff]   ;;  %v2423_v15 = vld [vmem:[%s2880_s1 + $0x1e0] sm:$0xff]  }
  0x1f   : > { %v2413_v9 = vld [vmem:[%s2614_s11 + $0x90] ss:$12 sps:$4 sm:$0xff]   ;;  %v2420_v13 = vld [vmem:[%s2614_s11 + $0xac] ss:$12 sps:$4 sm:$0xff]   ;;  %v2424_v16 = vld [vmem:[%s2880_s1 + $0x220] sm:$0xff]  }
  0x20   : > { %v2416_v10 = vld [vmem:[%s2880_s1 + $0x190] sm:$0xff]   ;;  %v2418_v12 = vld [vmem:[%s2880_s1 + $0x218] sm:$0xff]   ;;  %v2425_v18 = vld [vmem:[%s2880_s1 + $0x1a0] sm:$0xff]  }
  0x21   : > { %2048 = vmatpush3.bf16.msra.mxu0 %v2356_v20  ;;  %2204 = vmatpush3.bf16.msra.mxu1 %v2355_v19  ;;  %v2419_v14 = vld [vmem:[%s2880_s1 + $0x198] sm:$0xff]   ;;  %v2422_v17 = vld [vmem:[%s2614_s11 + $0xa8] ss:$12 sps:$4 sm:$0xff]  }
  0x22   : > { %2049 = vmatprep.subr.bf16.mxu0 %v2357_v21  ;;  %2205 = vmatprep.subr.bf16.mxu1 %v2358_v22  ;;  %v2426_v19 = vld [vmem:[%s2880_s1 + $0x1e8] sm:$0xff]   ;;  %v2429_v21 = vld [vmem:[%s2614_s11 + $0xc4] ss:$12 sps:$4 sm:$0xff]  }
  0x23   : > { %v2427_v20 = vld [vmem:[%s2880_s1 + $0x228] sm:$0xff]   ;;  %v2431_v23 = vld [vmem:[%s2614_s11 + $0xb0] ss:$12 sps:$4 sm:$0xff]  }
  0x24   : > { %v2433_v24 = vld [vmem:[%s2614_s11 + $0xc8] ss:$12 sps:$4 sm:$0xff]  }
  0x25   : > { %2050 = vmatpush3.bf16.msra.mxu0 %v2359_v25  ;;  %2206 = vmatpush3.bf16.msra.mxu1 %v2358_v22  ;;  %v2428_v22 = vld [vmem:[%s2880_s1 + $0x1a8] sm:$0xff]  }
  0x26   : > { %2087 = vmatprep.subr.bf16.mxu0 %v2364_v26  ;;  %2215 = vmatprep.subr.bf16.mxu1 %v2365_v28  ;;  %v2432_v25 = vld [vmem:[%s2614_s11 + $0xc0] ss:$12 sps:$4 sm:$0xff]   ;;  %v2434_v26 = vld [vmem:[%s2880_s1 + $0x1f0] sm:$0xff]  }
  0x28   : > { %563 = vmatmul.mubr.bf16.vlgmr.msra.gmra.mrb[0].mxu0 %v2360_v27  ;;  %2208 = vmatmul.mubr.bf16.vlgmr.msra.gmra.mrb[0].mxu1 %v2366_v29  ;;  %v2435_v27 = vld [vmem:[%s2880_s1 + $0x230] sm:$0xff]   ;;  %v2437_v29 = vld [vmem:[%s2880_s1 + $0x1f8] sm:$0xff]  }
  0x29   : > { %2088 = vmatpush3.bf16.msra.mxu0 %v2367_v30  ;;  %2216 = vmatpush3.bf16.msra.mxu1 %v2365_v28  ;;  %v2436_v28 = vld [vmem:[%s2880_s1 + $0x1b0] sm:$0xff]   ;;  %v2438_v30 = vld [vmem:[%s2880_s1 + $0x238] sm:$0xff]  }
  0x2a   : > { %2089 = vmatprep.subr.bf16.mxu0 %v2368_v31  ;;  %2217 = vmatprep.subr.bf16.mxu1 %v2369_v32  ;;  %v2440_v31 = vld [vmem:[%s2614_s11 + $0x20] ss:$12 sps:$4 sm:$0xff]  }
  0x2b   : > { %570 = vmatprep.mubr.bf16.mxu0 %v2645_v33  ;;  %2211 = vmatprep.mubr.bf16.mxu1 %v2392_v51 }
  0x2d   : > { %2090 = vmatpush3.bf16.msra.mxu0 %v2370_v34  ;;  %2218 = vmatpush3.bf16.msra.mxu1 %v2369_v32  ;;  %v2439_v32 = vld [vmem:[%s2880_s1 + $0x1b8] sm:$0xff]  }
  0x2e   : > { %2091 = vmatprep.subr.bf16.mxu0 %v2374_v35  ;;  %2219 = vmatprep.subr.bf16.mxu1 %v2375_v36  ;;  %v2441_v34 = vld [vmem:[%s2614_s11 + $0x38] ss:$12 sps:$4 sm:$0xff]   ;;  %v2442_v35 = vld [vmem:[%s2614_s11 + $0x50] ss:$12 sps:$4 sm:$0xff]  }
  0x30   : > { %571 = vmatmul.mubr.bf16.gmra.mrb[4].mxu0 %v2658_v37  ;;  %2212 = vmatmul.mubr.bf16.gmra.mrb[4].mxu1 %v2395_v54 }
  0x31   : > { %2092 = vmatpush3.bf16.msra.mxu0 %v2376_v38  ;;  %2220 = vmatpush3.bf16.msra.mxu1 %v2375_v36  ;;  %v2443_v36 = vld [vmem:[%s2614_s11 + $0x68] ss:$12 sps:$4 sm:$0xff]   ;;  %v2444_v38 = vld [vmem:[%s2614_s11 + $0x64] ss:$12 sps:$4 sm:$0xff]  }
  0x32   : > { %2093 = vmatprep.subr.bf16.mxu0 %v2377_v39  ;;  %2221 = vmatprep.subr.bf16.mxu1 %v2378_v40 }
  0x33   : > { %578 = vmatprep.mubr.bf16.mxu0 %v2670_v41  ;;  %2231 = vmatprep.mubr.bf16.mxu1 %v2403_v61 }
  0x35   : > { %2094 = vmatpush3.bf16.msra.mxu0 %v2379_v42  ;;  %2222 = vmatpush3.bf16.msra.mxu1 %v2378_v40 }
  0x36   : > { %2095 = vmatprep.subr.bf16.mxu0 %v2383_v43  ;;  %2223 = vmatprep.subr.bf16.mxu1 %v2384_v45 }
  0x38   : > { %579 = vmatmul.mubr.bf16.gmra.mrb[8].mxu0 %v2680_v44 }
  0x39   : > { %2096 = vmatpush3.bf16.msra.mxu0 %v2385_v46  ;;  %2224 = vmatpush3.bf16.msra.mxu1 %v2384_v45 }
  0x3a   : > { %2097 = vmatprep.subr.bf16.mxu0 %v2386_v47  ;;  %2225 = vmatprep.subr.bf16.mxu1 %v2387_v48 }
  0x3b   : > { %586 = vmatprep.mubr.bf16.mxu0 %v2696_v49 }
  0x3d   : > { %2098 = vmatpush3.bf16.msra.mxu0 %v2388_v50  ;;  %2226 = vmatpush3.bf16.msra.mxu1 %v2387_v48 }
  0x3e   : > { %2099 = vmatprep.subr.bf16.mxu0 %v2393_v52  ;;  %2227 = vmatprep.subr.bf16.mxu1 %v2394_v53 }
  0x40   : > { %587 = vmatmul.mubr.bf16.gmra.mrb[12].mxu0 %v2712_v55 }
  0x41   : > { %2100 = vmatpush3.bf16.msra.mxu0 %v2396_v56  ;;  %2228 = vmatpush3.bf16.msra.mxu1 %v2394_v53 }
  0x42   : > { %2101 = vmatprep.subr.bf16.mxu0 %v2397_v57  ;;  %2229 = vmatprep.subr.bf16.mxu1 %v2398_v58 }
  0x43   : > { %980 = vmatprep.mubr.bf16.mxu0 %v2402_v60 }
  0x45   : > { %2102 = vmatpush3.bf16.msra.mxu0 %v2399_v59  ;;  %2230 = vmatpush3.bf16.msra.mxu1 %v2398_v58 }
  0x46   : > { %2139 = vmatprep.subr.bf16.mxu0 %v2404_v62  ;;  %2239 = vmatprep.subr.bf16.mxu1 %v2405_v0  ;;  %v1792_v62 = vld [vmem:[%s2881_s2] ss:$0 sm:$0xff] }
  0x48   : > { %981 = vmatmul.mubr.bf16.vlgmr.msra.gmra.mrb[16].mxu0 %v2400_v63  ;;  %2232 = vmatmul.mubr.bf16.vlgmr.msra.gmra.mrb[0].mxu1 %v2406_v1 }
  0x49   : > { %2140 = vmatpush3.bf16.msra.mxu0 %v2407_v2  ;;  %2240 = vmatpush3.bf16.msra.mxu1 %v2405_v0 }
  0x4a   : > { %2141 = vmatprep.subr.bf16.mxu0 %v2408_v3  ;;  %2241 = vmatprep.subr.bf16.mxu1 %v2409_v4 }
  0x4b   : > { %988 = vmatprep.mubr.bf16.mxu0 %v2411_v6  ;;  %2235 = vmatprep.mubr.bf16.mxu1 %v2431_v23 }
  0x4d   : > { %2142 = vmatpush3.bf16.msra.mxu0 %v2410_v5  ;;  %2242 = vmatpush3.bf16.msra.mxu1 %v2409_v4 }
  0x4e   : > { %2143 = vmatprep.subr.bf16.mxu0 %v2414_v7  ;;  %2243 = vmatprep.subr.bf16.mxu1 %v2415_v8 }
  0x50   : > { %989 = vmatmul.mubr.bf16.gmra.mrb[20].mxu0 %v2413_v9  ;;  %2236 = vmatmul.mubr.bf16.gmra.mrb[4].mxu1 %v2433_v24 }
  0x51   : > { %2144 = vmatpush3.bf16.msra.mxu0 %v2416_v10  ;;  %2244 = vmatpush3.bf16.msra.mxu1 %v2415_v8 }
  0x52   : > { %2145 = vmatprep.subr.bf16.mxu0 %v2417_v11  ;;  %2245 = vmatprep.subr.bf16.mxu1 %v2418_v12 }
  0x53   : > { %996 = vmatprep.mubr.bf16.mxu0 %v2420_v13  ;;  %2255 = vmatprep.mubr.bf16.mxu1 %v2440_v31 }
  0x55   : > { %2146 = vmatpush3.bf16.msra.mxu0 %v2419_v14  ;;  %2246 = vmatpush3.bf16.msra.mxu1 %v2418_v12 }
  0x56   : > { %2147 = vmatprep.subr.bf16.mxu0 %v2423_v15  ;;  %2247 = vmatprep.subr.bf16.mxu1 %v2424_v16 }
  0x58   : > { %997 = vmatmul.mubr.bf16.gmra.mrb[24].mxu0 %v2422_v17 }
  0x59   : > { %2148 = vmatpush3.bf16.msra.mxu0 %v2425_v18  ;;  %2248 = vmatpush3.bf16.msra.mxu1 %v2424_v16 }
  0x5a   : > { %2149 = vmatprep.subr.bf16.mxu0 %v2426_v19  ;;  %2249 = vmatprep.subr.bf16.mxu1 %v2427_v20 }
  0x5b   : > { %1004 = vmatprep.mubr.bf16.mxu0 %v2429_v21 }
  0x5d   : > { %2150 = vmatpush3.bf16.msra.mxu0 %v2428_v22  ;;  %2250 = vmatpush3.bf16.msra.mxu1 %v2427_v20 }
  0x5e   : > { %2151 = vmatprep.subr.bf16.mxu0 %v2434_v26  ;;  %2251 = vmatprep.subr.bf16.mxu1 %v2435_v27 }
  0x60   : > { %1005 = vmatmul.mubr.bf16.gmra.mrb[28].mxu0 %v2432_v25 }
  0x61   : > { %2152 = vmatpush3.bf16.msra.mxu0 %v2436_v28  ;;  %2252 = vmatpush3.bf16.msra.mxu1 %v2435_v27 }
  0x62   : > { %2153 = vmatprep.subr.bf16.mxu0 %v2437_v29  ;;  %2253 = vmatprep.subr.bf16.mxu1 %v2438_v30 }
  0x63   : > { %1392 = vmatprep.mubr.bf16.mxu0 %v2645_v33  ;;  %v2446_v33 = vld [vmem:[%s2614_s11 + $0x60] ss:$12 sps:$4 sm:$0xff]  }
  0x65   : > { %2154 = vmatpush3.bf16.msra.mxu0 %v2439_v32  ;;  %2254 = vmatpush3.bf16.msra.mxu1 %v2438_v30 }
  0x68   : > { %1393 = vmatmul.mubr.bf16.vlgmr.msra.gmra.mrb[32].mxu0 %v2658_v37  ;;  %2256 = vmatmul.mubr.bf16.vlgmr.msra.gmra.mrb[0].mxu1 %v2441_v34 }
  0x69   : > { %1400 = vmatprep.mubr.bf16.mxu0 %v2670_v41  ;;  %2259 = vmatprep.mubr.bf16.mxu1 %v2442_v35 }
  0x70   : > { %1401 = vmatmul.mubr.bf16.gmra.mrb[36].mxu0 %v2680_v44  ;;  %2260 = vmatmul.mubr.bf16.gmra.mrb[4].mxu1 %v2443_v36 }
  0x71   : > { %1408 = vmatprep.mubr.bf16.mxu0 %v2696_v49 }
  0x78   : > { %1409 = vmatmul.mubr.bf16.gmra.mrb[40].mxu0 %v2712_v55 }
  0x79   : > { %1416 = vmatprep.mubr.bf16.mxu0 %v2444_v38 }
  0x80   : > { %1417 = vmatmul.mubr.bf16.gmra.mrb[44].mxu0 %v2446_v33 }
  0xfb   : > { %v2051_v39 = vpop.f32.mrb[0].mxu0 }
  0xfc   : > { %v2052_v40 = vpop.f32.mrb[1].mxu0 }
  0xfd   : > { %v2053_v42 = vadd.f32 %v2052_v40, %v2051_v39  ;;  %v2054_v37 = vpop.f32.mrb[2].mxu0 }
  0xfe   : > { %v2055_v43 = vpop.f32.mrb[3].mxu0 }
  0xff   : > { %v2056_v45 = vadd.f32 %v2055_v43, %v2054_v37  ;;  %v2267_v1 = vadd.f32 %v2053_v42, %v1792_v62 }
 0x101   : > { %v2275_v5 = vadd.f32 %v2056_v45, %v1792_v62 }
 0x103   : > { %v2057_v41 = vpop.f32.mrb[4].mxu0 }
 0x104   : > { %v2058_v46 = vpop.f32.mrb[5].mxu0 }
 0x105   : > { %v2059_v47 = vadd.f32 %v2058_v46, %v2057_v41  ;;  %v2060_v48 = vpop.f32.mrb[6].mxu0 }
 0x106   : > { %v2061_v44 = vpop.f32.mrb[7].mxu0 }
 0x107   : > { %v2062_v50 = vadd.f32 %v2061_v44, %v2060_v48  ;;  %v2263_v11 = vadd.f32 %v2059_v47, %v1792_v62 }
 0x109   : > { %v2271_v15 = vadd.f32 %v2062_v50, %v1792_v62 }
 0x10b   : > { %v2063_v51 = vpop.f32.mrb[8].mxu0 }
 0x10c   : > { %v2064_v49 = vpop.f32.mrb[9].mxu0 }
 0x10d   : > { %v2065_v52 = vadd.f32 %v2064_v49, %v2063_v51  ;;  %v2066_v53 = vpop.f32.mrb[10].mxu0 }
 0x10e   : > { %v2067_v54 = vpop.f32.mrb[11].mxu0 }
 0x10f   : > { %v2068_v55 = vadd.f32 %v2067_v54, %v2066_v53  ;;  %v2283_v21 = vadd.f32 %v2065_v52, %v1792_v62 }
 0x111   : > { %v2291_v25 = vadd.f32 %v2068_v55, %v1792_v62 }
 0x113   : > { %v2069_v56 = vpop.f32.mrb[12].mxu0 }
 0x114   : > { %v2070_v57 = vpop.f32.mrb[13].mxu0 }
 0x115   : > { %v2071_v58 = vadd.f32 %v2070_v57, %v2069_v56  ;;  %v2072_v59 = vpop.f32.mrb[14].mxu0 }
 0x116   : > { %v2073_v60 = vpop.f32.mrb[15].mxu0 }
 0x117   : > { %v2074_v61 = vadd.f32 %v2073_v60, %v2072_v59  ;;  %v2279_v31 = vadd.f32 %v2071_v58, %v1792_v62 }
 0x119   : > { %v2287_v36 = vadd.f32 %v2074_v61, %v1792_v62 }
 0x11b   : > { %v2103_v63 = vpop.f32.mrb[16].mxu0 }
 0x11c   : > { %v2104_v0 = vpop.f32.mrb[17].mxu0 }
 0x11d   : > { %v2105_v2 = vadd.f32 %v2104_v0, %v2103_v63  ;;  %v2106_v3 = vpop.f32.mrb[18].mxu0 }
 0x11e   : > { %v2107_v4 = vpop.f32.mrb[19].mxu0 }
 0x11f   : > { %v2268_v6 = vadd.f32 %v2267_v1, %v2105_v2  ;;  %v2108_v7 = vadd.f32 %v2107_v4, %v2106_v3 }
 0x121   : > { %v2276_v8 = vadd.f32 %v2275_v5, %v2108_v7 }
 0x123   : > { %v2109_v9 = vpop.f32.mrb[20].mxu0 }
 0x124   : > { %v2110_v10 = vpop.f32.mrb[21].mxu0 }
 0x125   : > { %v2111_v12 = vadd.f32 %v2110_v10, %v2109_v9  ;;  %v2112_v13 = vpop.f32.mrb[22].mxu0 }
 0x126   : > { %v2113_v14 = vpop.f32.mrb[23].mxu0 }
 0x127   : > { %v2264_v16 = vadd.f32 %v2263_v11, %v2111_v12  ;;  %v2114_v17 = vadd.f32 %v2113_v14, %v2112_v13 }
 0x129   : > { %v2272_v18 = vadd.f32 %v2271_v15, %v2114_v17 }
 0x12b   : > { %v2115_v19 = vpop.f32.mrb[24].mxu0 }
 0x12c   : > { %v2116_v20 = vpop.f32.mrb[25].mxu0 }
 0x12d   : > { %v2117_v22 = vadd.f32 %v2116_v20, %v2115_v19  ;;  %v2118_v23 = vpop.f32.mrb[26].mxu0 }
 0x12e   : > { %v2119_v24 = vpop.f32.mrb[27].mxu0 }
 0x12f   : > { %v2284_v26 = vadd.f32 %v2283_v21, %v2117_v22  ;;  %v2120_v27 = vadd.f32 %v2119_v24, %v2118_v23 }
 0x131   : > { %v2292_v28 = vadd.f32 %v2291_v25, %v2120_v27 }
 0x133   : > { %v2121_v29 = vpop.f32.mrb[28].mxu0 }
 0x134   : > { %v2122_v30 = vpop.f32.mrb[29].mxu0 }
 0x135   : > { %v2123_v32 = vadd.f32 %v2122_v30, %v2121_v29  ;;  %v2124_v34 = vpop.f32.mrb[30].mxu0 }
 0x136   : > { %v2125_v35 = vpop.f32.mrb[31].mxu0 }
 0x137   : > { %v2826_v38 = vadd.f32 %v2279_v31, %v2123_v32  ;;  %v2126_v33 = vadd.f32 %v2125_v35, %v2124_v34 }
 0x139   : > { %v2828_v39 = vadd.f32 %v2287_v36, %v2126_v33 }
 0x13b   : > { %v2155_v40 = vpop.f32.mrb[32].mxu0  ;;  %v2257_v42 = vpop.f32.mrb[0].mxu1 }
 0x13c   : > { %v2156_v37 = vpop.f32.mrb[33].mxu0  ;;  %v1459_v43 = vpop.f32.mrb[1].mxu1 }
 0x13d   : > { %v2157_v45 = vadd.f32 %v2156_v37, %v2155_v40  ;;  %v2158_v41 = vpop.f32.mrb[34].mxu0  ;;  %v2258_v46 = vpop.f32.mrb[2].mxu1 }
 0x13e   : > { %v2159_v47 = vpop.f32.mrb[35].mxu0  ;;  %v1462_v48 = vpop.f32.mrb[3].mxu1 }
 0x13f   : > { %v2269_v44 = vadd.f32 %v2268_v6, %v2157_v45  ;;  %v2160_v50 = vadd.f32 %v2159_v47, %v2158_v41 }
 0x141   : > { %v2830_v51 = vadd.f32 %v2269_v44, %v1459_v43  ;;  %v2277_v49 = vadd.f32 %v2276_v8, %v2160_v50 }
 0x143   : > { %v1498_v52 = vmin.f32 %v2830_v51, 20.0  ;;  %v2833_v53 = vadd.f32 %v2277_v49, %v1462_v48  ;;  %v2161_v54 = vpop.f32.mrb[36].mxu0  ;;  %v2261_v55 = vpop.f32.mrb[4].mxu1 }
 0x144   : > { %v2162_v56 = vpop.f32.mrb[37].mxu0  ;;  %v1475_v57 = vpop.f32.mrb[5].mxu1 }
 0x145   : > { %v1506_v58 = vmul.f32 1.442695, %v1498_v52  ;;  %v1499_v59 = vmin.f32 %v2833_v53, 20.0  ;;  %v2163_v60 = vadd.f32 %v2162_v56, %v2161_v54  ;;  %v2164_v61 = vpop.f32.mrb[38].mxu0  ;;  %v2262_v62 = vpop.f32.mrb[6].mxu1 }
 0x146   : > { %v2165_v63 = vpop.f32.mrb[39].mxu0  ;;  %v1478_v0 = vpop.f32.mrb[7].mxu1 }
 0x147   : > { %2447 = vpow2.f32 %v1506_v58  ;;  %v1508_v1 = vmul.f32 1.442695, %v1499_v59  ;;  %v2265_v2 = vadd.f32 %v2264_v16, %v2163_v60  ;;  %v2166_v3 = vadd.f32 %v2165_v63, %v2164_v61 }
 0x149   : > { %2449 = vpow2.f32 %v1508_v1  ;;  %v2836_v4 = vadd.f32 %v2265_v2, %v2257_v42  ;;  %v2273_v5 = vadd.f32 %v2272_v18, %v2166_v3 }
 0x14b   : > { %v1500_v6 = vmin.f32 %v2836_v4, 20.0  ;;  %v2839_v7 = vadd.f32 %v2273_v5, %v2258_v46  ;;  %v2167_v8 = vpop.f32.mrb[40].mxu0 }
 0x14c   : > { %v2168_v9 = vpop.f32.mrb[41].mxu0 }
 0x14d   : > { %v1510_v10 = vmul.f32 1.442695, %v1500_v6  ;;  %v1501_v11 = vmin.f32 %v2839_v7, 20.0  ;;  %v2169_v12 = vadd.f32 %v2168_v9, %v2167_v8  ;;  %v2170_v13 = vpop.f32.mrb[42].mxu0 }
 0x14e   : > { %v2171_v14 = vpop.f32.mrb[43].mxu0 }
 0x14f   : > { %2451 = vpow2.f32 %v1510_v10  ;;  %v1512_v15 = vmul.f32 1.442695, %v1501_v11  ;;  %v2285_v16 = vadd.f32 %v2284_v26, %v2169_v12  ;;  %v2172_v17 = vadd.f32 %v2171_v14, %v2170_v13 }
 0x151   : > { %v2448_v19 = vpop.eup %2447  ;;  %2453 = vpow2.f32 %v1512_v15  ;;  %v2842_v20 = vadd.f32 %v2285_v16, %v1475_v57  ;;  %v2293_v18 = vadd.f32 %v2292_v28, %v2172_v17 }
 0x152   : > { %v1522_v21 = vadd.f32 2.0, %v2448_v19 }
 0x153   : > { %v2450_v22 = vpop.eup %2449  ;;  %v1502_v23 = vmin.f32 %v2842_v20, 20.0  ;;  %v2845_v24 = vadd.f32 %v2293_v18, %v1478_v0  ;;  %v2173_v25 = vpop.f32.mrb[44].mxu0 }
 0x154   : > { %v1530_v27 = vmul.f32 %v2448_v19, %v1522_v21  ;;  %v1523_v29 = vadd.f32 2.0, %v2450_v22  ;;  %v2174_v30 = vpop.f32.mrb[45].mxu0 }
 0x155   : > { %v1514_v31 = vmul.f32 1.442695, %v1502_v23  ;;  %v1503_v32 = vmin.f32 %v2845_v24, 20.0  ;;  %v2175_v26 = vadd.f32 %v2174_v30, %v2173_v25  ;;  %v2176_v34 = vpop.f32.mrb[46].mxu0 }
 0x156   : > { %v1546_v35 = vadd.f32 2.0, %v1530_v27  ;;  %v1531_v36 = vmul.f32 %v2450_v22, %v1523_v29  ;;  %v2177_v33 = vpop.f32.mrb[47].mxu0  ;;  %v1538_v61 = vmul.f32 %v2830_v51, %v1530_v27 }
 0x157   : > { %2455 = vpow2.f32 %v1514_v31  ;;  %v1516_v28 = vmul.f32 1.442695, %v1503_v32  ;;  %v2281_v40 = vadd.f32 %v2826_v38, %v2175_v26  ;;  %v2178_v42 = vadd.f32 %v2177_v33, %v2176_v34 }
 0x158   : > { %2457 = vrcp.f32 %v1546_v35  ;;  %v1547_v37 = vadd.f32 2.0, %v1531_v36 }
 0x159   : > { %v2452_v43 = vpop.eup %2451  ;;  %2459 = vpow2.f32 %v1516_v28  ;;  %v2849_v45 = vadd.f32 %v2281_v40, %v2261_v55  ;;  %v2289_v41 = vadd.f32 %v2828_v39, %v2178_v42 }
 0x15a   : > { %2461 = vrcp.f32 %v1547_v37  ;;  %v1524_v46 = vadd.f32 2.0, %v2452_v43 }
 0x15b   : > { %v2454_v47 = vpop.eup %2453  ;;  %v1504_v48 = vmin.f32 %v2849_v45, 20.0  ;;  %v2290_v44 = vadd.f32 %v2289_v41, %v2262_v62  ;;  %v1539_v62 = vmul.f32 %v2833_v53, %v1531_v36 }
 0x15c   : > { %v1532_v50 = vmul.f32 %v2452_v43, %v1524_v46  ;;  %v1525_v49 = vadd.f32 2.0, %v2454_v47 }
 0x15d   : > { %v1518_v52 = vmul.f32 1.442695, %v1504_v48  ;;  %v1505_v38 = vmin.f32 %v2290_v44, 20.0 }
 0x15e   : > { %v1548_v54 = vadd.f32 2.0, %v1532_v50  ;;  %v1533_v56 = vmul.f32 %v2454_v47, %v1525_v49  ;;  %v1540_v12 = vmul.f32 %v2836_v4, %v1532_v50 }
 0x15f   : > { %2463 = vpow2.f32 %v1518_v52  ;;  %v1520_v57 = vmul.f32 1.442695, %v1505_v38 }
 0x160   : > { %2465 = vrcp.f32 %v1548_v54  ;;  %v1549_v55 = vadd.f32 2.0, %v1533_v56  ;;  %v1541_v13 = vmul.f32 %v2839_v7, %v1533_v56 }
 0x161   : > { %v2456_v58 = vpop.eup %2455  ;;  %2467 = vpow2.f32 %v1520_v57 }
 0x162   : > { %v2458_v39 = vpop.eup %2457  ;;  %2469 = vrcp.f32 %v1549_v55  ;;  %v1526_v59 = vadd.f32 2.0, %v2456_v58 }
 0x163   : > { %v2460_v60 = vpop.eup %2459  ;;  %v1562_v2 = vmul.f32 %v2458_v39, %v1538_v61 }
 0x164   : > { %v2462_v63 = vpop.eup %2461  ;;  %v1534_v0 = vmul.f32 %v2456_v58, %v1526_v59  ;;  %v1527_v1 = vadd.f32 2.0, %v2460_v60 }
 0x165   : > { %v1563_v3 = vmul.f32 %v2462_v63, %v1539_v62 }
 0x166   : > { %v1550_v5 = vadd.f32 2.0, %v1534_v0  ;;  %v1535_v6 = vmul.f32 %v2460_v60, %v1527_v1  ;;  %v1542_v27 = vmul.f32 %v2842_v20, %v1534_v0 }
 0x167   : > { %v2015_v8 = vpack.c.bf16 %v1563_v3, %v1562_v2 }
 0x168   : > { %2471 = vrcp.f32 %v1550_v5  ;;  %v1551_v9 = vadd.f32 2.0, %v1535_v6  ;;  %v1543_v4 = vmul.f32 %v2845_v24, %v1535_v6 }
 0x169   : > { %v2464_v51 = vpop.eup %2463  ;;  %2016 = vst [vmem:[%s2859_s7] sm:$0xff] %v2015_v8  }
 0x16a   : > { %v2466_v10 = vpop.eup %2465  ;;  %2473 = vrcp.f32 %v1551_v9  ;;  %v1528_v53 = vadd.f32 2.0, %v2464_v51 }
 0x16b   : > { %v2468_v11 = vpop.eup %2467  ;;  %v1564_v17 = vmul.f32 %v2466_v10, %v1540_v12 }
 0x16c   : > { %v2470_v14 = vpop.eup %2469  ;;  %v1536_v15 = vmul.f32 %v2464_v51, %v1528_v53  ;;  %v1529_v16 = vadd.f32 2.0, %v2468_v11 }
 0x16d   : > { %v1565_v19 = vmul.f32 %v2470_v14, %v1541_v13 }
 0x16e   : > { %v1552_v18 = vadd.f32 2.0, %v1536_v15  ;;  %v1537_v21 = vmul.f32 %v2468_v11, %v1529_v16  ;;  %v1544_v26 = vmul.f32 %v2849_v45, %v1536_v15 }
 0x16f   : > { %v2020_v22 = vpack.c.bf16 %v1565_v19, %v1564_v17 }
 0x170   : > { %2475 = vrcp.f32 %v1552_v18  ;;  %v1553_v23 = vadd.f32 2.0, %v1537_v21  ;;  %v1545_v34 = vmul.f32 %v2290_v44, %v1537_v21 }
 0x171   : > { %2032 = vst [vmem:[%s2859_s7 + $0x8] sm:$0xff] %v2020_v22  }
 0x172   : > { %v2472_v25 = vpop.eup %2471  ;;  %2477 = vrcp.f32 %v1553_v23 }
 0x173   : > { %v1566_v29 = vmul.f32 %v2472_v25, %v1542_v27 }
 0x174   : > { %v2474_v7 = vpop.eup %2473 }
 0x175   : > { %v1567_v30 = vmul.f32 %v2474_v7, %v1543_v4 }
 0x177   : > { %v2025_v31 = vpack.c.bf16 %v1567_v30, %v1566_v29 }
 0x179   : > { %2033 = vst [vmem:[%s2859_s7 + $0x10] sm:$0xff] %v2025_v31  }
 0x17a   : > { %v2476_v32 = vpop.eup %2475 }
 0x17b   : > { %v1568_v36 = vmul.f32 %v2476_v32, %v1544_v26 }
 0x17c   : > { %v2478_v35 = vpop.eup %2477 }
 0x17d   : > { %v1569_v33 = vmul.f32 %v2478_v35, %v1545_v34 }
 0x17f   : > { %v2030_v28 = vpack.c.bf16 %v1569_v33, %v1568_v36 }
 0x181   : > { %2034 = vst [vmem:[%s2859_s7 + $0x18] sm:$0xff] %v2030_v28  }
 0x182 PF: > { %s13_s14 = sadd.s32 1, %s2501_s14   ;;  %s2883_s12 = smov %s2497_s13 }
 0x183   : > { %p10_p5 = scmp.ge.s32.totalorder %s13_s14, 4   ;;  %s2884_s13 = smov %s2886_s15 }
 0x185   :  { %12 = sbr.rel (!%p10_p5) target bundleno = 2 (0x2), region = 72 }

</bundles_post_ra>
